<compile_context>
chip_gen: v5e
topology: v5e:2x2
jax: 0.10.0
libtpu: 0.0.40
codegen_flags: <defaults>
</compile_context>

<pallas_src>
import math
import functools

import jax
import jax.numpy as jnp
from jax.experimental import pallas as pl
from jax.experimental.pallas import tpu as pltpu


def _layernorm(x, g, b, eps=1e-5):
    mu = jnp.mean(x, axis=-1, keepdims=True)
    var = jnp.mean((x - mu) ** 2, axis=-1, keepdims=True)
    return (x - mu) * jax.lax.rsqrt(var + eps) * g + b


def transformer_kernel(x_ref, pe_ref, pool_ref,
                       we_ref,
                       wqkv_ref, bqkv_ref, wo_ref, bo_ref,
                       ln1g_ref, ln1b_ref, w1_ref, b1_ref,
                       w2_ref, b2_ref, ln2g_ref, ln2b_ref,
                       wc_ref, bc_ref, out_ref,
                       *, num_layers, nhead, bb, seq_len):
    T = seq_len
    D = we_ref.shape[1]
    hd = D // nhead
    bf16 = jnp.bfloat16
    f32 = jnp.float32
    M = bb * T                                        # folded (batch*seq) rows

    # ---- input embedding (folded (BB*T, C) @ (C, D)) ----
    x = x_ref[...].astype(bf16)                       # (BB*T, C)
    h = jnp.dot(x, we_ref[...], preferred_element_type=f32)
    # positional encoding (embedding bias pre-folded on host): broadcast (T, D)
    h = (h.reshape(bb, T, D) + pe_ref[...][None, :, :]).reshape(M, D)

    for l in range(num_layers):
        # ---- multi-head self attention (post-norm) ----
        # Q rows of wqkv were pre-scaled by 1/sqrt(hd) on the host.
        qkv = jnp.dot(h.astype(bf16), wqkv_ref[l],
                      preferred_element_type=f32) + bqkv_ref[l]   # (M, 3D)

        # Gather all heads into one combined batch: (nhead*BB, T, hd).
        # Slices / leading-dim reshapes / concats only -- all matmuls below are
        # single batched dispatches over every head at once.
        q = jnp.concatenate(
            [qkv[:, i * hd:(i + 1) * hd].reshape(bb, T, hd)
             for i in range(nhead)], axis=0).astype(bf16)
        k = jnp.concatenate(
            [qkv[:, D + i * hd:D + (i + 1) * hd].reshape(bb, T, hd)
             for i in range(nhead)], axis=0).astype(bf16)
        v = jnp.concatenate(
            [qkv[:, 2 * D + i * hd:2 * D + (i + 1) * hd].reshape(bb, T, hd)
             for i in range(nhead)], axis=0).astype(bf16)

        s = jnp.einsum('btd,bsd->bts', q, k,
                       preferred_element_type=f32)               # (nh*BB, T, T)
        s = s - jnp.max(s, axis=-1, keepdims=True)
        p = jnp.exp(s)
        p = p * pl.reciprocal(jnp.sum(p, axis=-1, keepdims=True), approx=True)

        o = jnp.einsum('bts,bsd->btd', p.astype(bf16), v,
                       preferred_element_type=f32)               # (nh*BB, T, hd)

        # Re-assemble heads into an (M, D) slab (head h -> cols [h*hd:(h+1)*hd])
        # and run ONE output projection with full K=D depth.
        o_cat = jnp.concatenate(
            [o[i * bb:(i + 1) * bb].reshape(M, hd) for i in range(nhead)],
            axis=-1)                                             # (M, D)
        attn = jnp.dot(o_cat.astype(bf16), wo_ref[l],
                       preferred_element_type=f32) + bo_ref[l]

        h = _layernorm(h + attn, ln1g_ref[l], ln1b_ref[l])

        # ---- feed forward (ReLU) ----
        ff = jnp.dot(h.astype(bf16), w1_ref[l],
                     preferred_element_type=f32) + b1_ref[l]
        ff = jnp.maximum(ff, 0.0)
        ff = jnp.dot(ff.astype(bf16), w2_ref[l],
                     preferred_element_type=f32) + b2_ref[l]

        h = _layernorm(h + ff, ln2g_ref[l], ln2b_ref[l])

    # ---- mean pool over sequence (MXU matmul, 1/T folded into pool matrix) ----
    pooled = jnp.dot(pool_ref[...], h.astype(bf16),
                     preferred_element_type=f32)                 # (BB, D)

    # ---- classifier (output padded to lane-dense 128-wide block) ----
    logits = jnp.dot(pooled.astype(bf16), wc_ref[...],
                     preferred_element_type=f32) + bc_ref[...]   # (BB, NCP)
    out_ref[...] = logits


def make_positional_encoding(T, D):
    position = jnp.arange(T, dtype=jnp.float32)[:, None]
    div_term = jnp.exp(jnp.arange(0, D, 2, dtype=jnp.float32)
                       * (-math.log(10000.0) / D))
    pe = jnp.zeros((T, D), jnp.float32)
    pe = pe.at[:, 0::2].set(jnp.sin(position * div_term))
    pe = pe.at[:, 1::2].set(jnp.cos(position * div_term))
    return pe


def init_params(key, in_channels, d_model, nhead, num_layers, num_classes):
    ks = iter(jax.random.split(key, 8 + 6 * num_layers))

    def w(shape, scale=0.02):
        return (scale * jax.random.normal(next(ks), shape)).astype(jnp.float32)

    D, F = d_model, 4 * d_model
    params = dict(
        we=w((D, in_channels)), be=jnp.zeros((1, D), jnp.float32),
        wqkv=jnp.stack([w((3 * D, D)) for _ in range(num_layers)]),
        bqkv=jnp.zeros((num_layers, 1, 3 * D), jnp.float32),
        wo=jnp.stack([w((D, D)) for _ in range(num_layers)]),
        bo=jnp.zeros((num_layers, 1, D), jnp.float32),
        ln1g=jnp.ones((num_layers, 1, D), jnp.float32),
        ln1b=jnp.zeros((num_layers, 1, D), jnp.float32),
        w1=jnp.stack([w((F, D)) for _ in range(num_layers)]),
        b1=jnp.zeros((num_layers, 1, F), jnp.float32),
        w2=jnp.stack([w((D, F)) for _ in range(num_layers)]),
        b2=jnp.zeros((num_layers, 1, D), jnp.float32),
        ln2g=jnp.ones((num_layers, 1, D), jnp.float32),
        ln2b=jnp.zeros((num_layers, 1, D), jnp.float32),
        wc=w((num_classes, D)), bc=jnp.zeros((1, num_classes), jnp.float32),
    )
    return params


def prepare_weights(params, pe, *, nhead):
    """One-time host-side weight prep (transpose / bf16 cast / pad / folds).

    Call once at init and cache the result -- the forward pass does zero
    weight re-layout work.
    """
    D = params["we"].shape[0]
    hd = D // nhead
    NC = params["wc"].shape[0]
    NCP = max(128, ((NC + 127) // 128) * 128)          # lane-dense logits block
    bf16 = jnp.bfloat16

    # fold 1/sqrt(hd) into the Q rows of the QKV projection (and its bias)
    qscale = 1.0 / math.sqrt(hd)
    scale_rows = jnp.concatenate(
        [jnp.full((D,), qscale, jnp.float32), jnp.ones((2 * D,), jnp.float32)])
    wqkv = params["wqkv"] * scale_rows[None, :, None]            # (L, 3D, D)
    bqkv = params["bqkv"] * scale_rows[None, None, :]            # (L, 1, 3D)

    return dict(
        num_classes=NC,
        # embedding bias folded into the (T, D) positional encoding
        pe_be=(pe + params["be"]).astype(jnp.float32),
        we_t=params["we"].T.astype(bf16),                        # (C, D)
        wqkv_t=jnp.transpose(wqkv, (0, 2, 1)).astype(bf16),      # (L, D, 3D)
        bqkv=bqkv.astype(jnp.float32),
        wo_t=jnp.transpose(params["wo"], (0, 2, 1)).astype(bf16),  # (L, D, D)
        bo=params["bo"],
        ln1g=params["ln1g"], ln1b=params["ln1b"],
        w1_t=jnp.transpose(params["w1"], (0, 2, 1)).astype(bf16),  # (L, D, F)
        b1=params["b1"],
        w2_t=jnp.transpose(params["w2"], (0, 2, 1)).astype(bf16),  # (L, F, D)
        b2=params["b2"],
        ln2g=params["ln2g"], ln2b=params["ln2b"],
        wc_t=jnp.zeros((D, NCP), bf16).at[:, :NC].set(
            params["wc"].T.astype(bf16)),                        # (D, NCP)
        bc_p=jnp.zeros((1, NCP), jnp.float32).at[:, :NC].set(params["bc"]),
    )


def transformer_classifier(x_bct, prep, *, nhead, num_layers,
                           block_b=128, vmem_limit_bytes=48 * 1024 * 1024):
    """Forward pass.  Per-generation tuning:
         v5e/v6e: block_b 128-256, vmem_limit_bytes up to ~96-112 MiB
                  (128 MiB physical VMEM) to amortize per-grid-step overhead.
         v7x    : keep vmem_limit_bytes <= ~56 MiB (64 MiB physical) and make
                  sure the batch grid has >= 2 "parallel" steps (2 TensorCores).
    """
    # glue: x.permute(0, 2, 1) -> (B, T, C), then fold batch into rows
    x = jnp.transpose(x_bct, (0, 2, 1)).astype(jnp.float32)
    B, T, C = x.shape
    D = prep["we_t"].shape[1]
    NC = prep["num_classes"]
    NCP = prep["wc_t"].shape[1]
    L = num_layers

    # ---- batch blocking: BB*T rows per grid step ----
    BB = min(block_b, B)
    if BB == B and B >= 16:
        # split even a fits-in-one-block batch into >=2 blocks (v7x megacore),
        # keeping the row-block a multiple of 8 (sublane tile); may pad batch.
        BB = ((B + 1) // 2 + 7) // 8 * 8
    nblk = -(-B // BB)
    Bpad = nblk * BB

    xf = x.reshape(B * T, C)
    if Bpad != B:
        xf = jnp.concatenate(
            [xf, jnp.zeros(((Bpad - B) * T, C), jnp.float32)], axis=0)

    # mean-pool as an MXU matmul; 1/T folded into the pooling matrix
    pool = (jnp.repeat(jnp.eye(BB, dtype=jnp.float32), T, axis=1)
            / T).astype(jnp.bfloat16)                            # (BB, BB*T)

    weight_names = ["we_t", "wqkv_t", "bqkv", "wo_t", "bo",
                    "ln1g", "ln1b", "w1_t", "b1", "w2_t", "b2",
                    "ln2g", "ln2b", "wc_t", "bc_p"]
    weights = [prep[k] for k in weight_names]

    kernel = functools.partial(transformer_kernel, num_layers=L, nhead=nhead,
                               bb=BB, seq_len=T)

    def call(weight_mode):
        # grid-invariant arrays (pe / pool / all weights): constant index map;
        # request a single pipeline buffer to halve their resident VMEM.
        def const_spec(a):
            nd = a.ndim
            kwargs = {} if weight_mode is None else {"pipeline_mode": weight_mode}
            return pl.BlockSpec(a.shape, lambda i, nd=nd: (0,) * nd, **kwargs)

        return pl.pallas_call(
            kernel,
            out_shape=jax.ShapeDtypeStruct((Bpad, NCP), jnp.float32),
            grid=(nblk,),
            in_specs=[pl.BlockSpec((BB * T, C), lambda i: (i, 0)),
                      const_spec(prep["pe_be"]),
                      const_spec(pool)] + [const_spec(a) for a in weights],
            out_specs=pl.BlockSpec((BB, NCP), lambda i: (i, 0)),
            compiler_params=pltpu.CompilerParams(
                dimension_semantics=("parallel",),
                vmem_limit_bytes=vmem_limit_bytes),
        )(xf, prep["pe_be"], pool, *weights)

    try:
        out = call(pl.Buffered(1))          # single-buffer grid-invariant inputs
    except Exception:
        out = call(None)                    # fallback: default double buffering

    return out[:B, :NC]                     # (B, NC)


if __name__ == "__main__":
    # small shapes consistent with the module's forward
    B, C, T = 2, 4, 8          # batch, in_channels, seq_len
    D, NHEAD, L, NC = 32, 4, 2, 10

    key = jax.random.PRNGKey(0)
    kx, kp = jax.random.split(key)
    x = jax.random.normal(kx, (B, C, T), dtype=jnp.float32)

    params = init_params(kp, C, D, NHEAD, L, NC)
    pe = make_positional_encoding(T, D)
    prep = prepare_weights(params, pe, nhead=NHEAD)   # one-time, cached at init

    logits = transformer_classifier(x, prep, nhead=NHEAD, num_layers=L)
    logits = jax.block_until_ready(logits)

    assert logits.shape == (B, NC)
    assert bool(jnp.all(jnp.isfinite(logits)))
    print("KERNEL_OK")
</pallas_src>

<mosaic_0001>
module attributes {stable_mosaic.version = 11 : i64} {
  func.func @transformer_kernel(%arg0: i32, %arg1: memref<16x4xf32, #tpu.memory_space<vmem>>, %arg2: memref<8x32xf32, #tpu.memory_space<vmem>>, %arg3: memref<2x16xbf16, #tpu.memory_space<vmem>>, %arg4: memref<4x32xbf16, #tpu.memory_space<vmem>>, %arg5: memref<2x32x96xbf16, #tpu.memory_space<vmem>>, %arg6: memref<2x1x96xf32, #tpu.memory_space<vmem>>, %arg7: memref<2x32x32xbf16, #tpu.memory_space<vmem>>, %arg8: memref<2x1x32xf32, #tpu.memory_space<vmem>>, %arg9: memref<2x1x32xf32, #tpu.memory_space<vmem>>, %arg10: memref<2x1x32xf32, #tpu.memory_space<vmem>>, %arg11: memref<2x32x128xbf16, #tpu.memory_space<vmem>>, %arg12: memref<2x1x128xf32, #tpu.memory_space<vmem>>, %arg13: memref<2x128x32xbf16, #tpu.memory_space<vmem>>, %arg14: memref<2x1x32xf32, #tpu.memory_space<vmem>>, %arg15: memref<2x1x32xf32, #tpu.memory_space<vmem>>, %arg16: memref<2x1x32xf32, #tpu.memory_space<vmem>>, %arg17: memref<32x128xbf16, #tpu.memory_space<vmem>>, %arg18: memref<1x128xf32, #tpu.memory_space<vmem>>, %arg19: memref<2x128xf32, #tpu.memory_space<vmem>>) attributes {dimension_semantics = [#tpu.dimension_semantics<parallel>], iteration_bounds = array<i64: 1>, scalar_prefetch = 0 : i64, scratch_operands = 0 : i64, tpu.core_type = #tpu.core_type<tc>, window_params = [{transform_indices = @transform_0, window_bounds = array<i64: 16, 4>}, {pipeline_mode = #tpu.pipeline_mode<synchronous>, transform_indices = @transform_1, window_bounds = array<i64: 8, 32>}, {pipeline_mode = #tpu.pipeline_mode<synchronous>, transform_indices = @transform_2, window_bounds = array<i64: 2, 16>}, {pipeline_mode = #tpu.pipeline_mode<synchronous>, transform_indices = @transform_3, window_bounds = array<i64: 4, 32>}, {pipeline_mode = #tpu.pipeline_mode<synchronous>, transform_indices = @transform_4, window_bounds = array<i64: 2, 32, 96>}, {pipeline_mode = #tpu.pipeline_mode<synchronous>, transform_indices = @transform_5, window_bounds = array<i64: 2, 1, 96>}, {pipeline_mode = #tpu.pipeline_mode<synchronous>, transform_indices = @transform_6, window_bounds = array<i64: 2, 32, 32>}, {pipeline_mode = #tpu.pipeline_mode<synchronous>, transform_indices = @transform_7, window_bounds = array<i64: 2, 1, 32>}, {pipeline_mode = #tpu.pipeline_mode<synchronous>, transform_indices = @transform_8, window_bounds = array<i64: 2, 1, 32>}, {pipeline_mode = #tpu.pipeline_mode<synchronous>, transform_indices = @transform_9, window_bounds = array<i64: 2, 1, 32>}, {pipeline_mode = #tpu.pipeline_mode<synchronous>, transform_indices = @transform_10, window_bounds = array<i64: 2, 32, 128>}, {pipeline_mode = #tpu.pipeline_mode<synchronous>, transform_indices = @transform_11, window_bounds = array<i64: 2, 1, 128>}, {pipeline_mode = #tpu.pipeline_mode<synchronous>, transform_indices = @transform_12, window_bounds = array<i64: 2, 128, 32>}, {pipeline_mode = #tpu.pipeline_mode<synchronous>, transform_indices = @transform_13, window_bounds = array<i64: 2, 1, 32>}, {pipeline_mode = #tpu.pipeline_mode<synchronous>, transform_indices = @transform_14, window_bounds = array<i64: 2, 1, 32>}, {pipeline_mode = #tpu.pipeline_mode<synchronous>, transform_indices = @transform_15, window_bounds = array<i64: 2, 1, 32>}, {pipeline_mode = #tpu.pipeline_mode<synchronous>, transform_indices = @transform_16, window_bounds = array<i64: 32, 128>}, {pipeline_mode = #tpu.pipeline_mode<synchronous>, transform_indices = @transform_17, window_bounds = array<i64: 1, 128>}, {transform_indices = @transform_18, window_bounds = array<i64: 2, 128>}]} {
    %c0 = arith.constant 0 : index
    %c0_0 = arith.constant 0 : index
    %0 = vector.load %arg1[%c0, %c0_0] : memref<16x4xf32, #tpu.memory_space<vmem>>, vector<16x4xf32>
    %1 = arith.truncf %0 : vector<16x4xf32> to vector<16x4xbf16>
    %c0_1 = arith.constant 0 : index
    %c0_2 = arith.constant 0 : index
    %2 = vector.load %arg4[%c0_1, %c0_2] : memref<4x32xbf16, #tpu.memory_space<vmem>>, vector<4x32xbf16>
    %cst = arith.constant dense<0.000000e+00> : vector<16x32xf32>
    %3 = tpu.matmul %1, %2, %cst {dimension_numbers = #tpu.dot_dimension_numbers<[1], [0], [0], [1], [0, 0, 1, 1], [], []>} : vector<16x4xbf16>, vector<4x32xbf16>, vector<16x32xf32> -> vector<16x32xf32>
    %4 = vector.shape_cast %3 : vector<16x32xf32> to vector<2x8x32xf32>
    %c0_3 = arith.constant 0 : index
    %c0_4 = arith.constant 0 : index
    %5 = vector.load %arg2[%c0_3, %c0_4] : memref<8x32xf32, #tpu.memory_space<vmem>>, vector<8x32xf32>
    %6 = vector.shape_cast %5 : vector<8x32xf32> to vector<1x8x32xf32>
    %7 = vector.broadcast %6 : vector<1x8x32xf32> to vector<2x8x32xf32>
    %8 = arith.addf %4, %7 : vector<2x8x32xf32>
    %9 = vector.shape_cast %8 : vector<2x8x32xf32> to vector<16x32xf32>
    %10 = arith.truncf %9 : vector<16x32xf32> to vector<16x32xbf16>
    %c0_5 = arith.constant 0 : index
    %c0_6 = arith.constant 0 : index
    %c0_7 = arith.constant 0 : index
    %11 = vector.load %arg5[%c0_5, %c0_6, %c0_7] : memref<2x32x96xbf16, #tpu.memory_space<vmem>>, vector<1x32x96xbf16>
    %12 = vector.shape_cast %11 : vector<1x32x96xbf16> to vector<32x96xbf16>
    %cst_8 = arith.constant dense<0.000000e+00> : vector<16x96xf32>
    %13 = tpu.matmul %10, %12, %cst_8 {dimension_numbers = #tpu.dot_dimension_numbers<[1], [0], [0], [1], [0, 0, 1, 1], [], []>} : vector<16x32xbf16>, vector<32x96xbf16>, vector<16x96xf32> -> vector<16x96xf32>
    %c0_9 = arith.constant 0 : index
    %c0_10 = arith.constant 0 : index
    %c0_11 = arith.constant 0 : index
    %14 = vector.load %arg6[%c0_9, %c0_10, %c0_11] : memref<2x1x96xf32, #tpu.memory_space<vmem>>, vector<1x1x96xf32>
    %15 = vector.shape_cast %14 : vector<1x1x96xf32> to vector<1x96xf32>
    %16 = vector.broadcast %15 : vector<1x96xf32> to vector<16x96xf32>
    %17 = arith.addf %13, %16 : vector<16x96xf32>
    %18 = vector.extract_strided_slice %17 {offsets = [0, 0], sizes = [16, 8], strides = [1, 1]} : vector<16x96xf32> to vector<16x8xf32>
    %19 = vector.shape_cast %18 : vector<16x8xf32> to vector<2x8x8xf32>
    %20 = vector.extract_strided_slice %17 {offsets = [0, 8], sizes = [16, 8], strides = [1, 1]} : vector<16x96xf32> to vector<16x8xf32>
    %21 = vector.shape_cast %20 : vector<16x8xf32> to vector<2x8x8xf32>
    %22 = vector.extract_strided_slice %17 {offsets = [0, 16], sizes = [16, 8], strides = [1, 1]} : vector<16x96xf32> to vector<16x8xf32>
    %23 = vector.shape_cast %22 : vector<16x8xf32> to vector<2x8x8xf32>
    %24 = vector.extract_strided_slice %17 {offsets = [0, 24], sizes = [16, 8], strides = [1, 1]} : vector<16x96xf32> to vector<16x8xf32>
    %25 = vector.shape_cast %24 : vector<16x8xf32> to vector<2x8x8xf32>
    %26 = tpu.concatenate %19, %21, %23, %25 in 0 : vector<2x8x8xf32>, vector<2x8x8xf32>, vector<2x8x8xf32>, vector<2x8x8xf32> -> vector<8x8x8xf32>
    %27 = arith.truncf %26 : vector<8x8x8xf32> to vector<8x8x8xbf16>
    %28 = vector.extract_strided_slice %17 {offsets = [0, 32], sizes = [16, 8], strides = [1, 1]} : vector<16x96xf32> to vector<16x8xf32>
    %29 = vector.shape_cast %28 : vector<16x8xf32> to vector<2x8x8xf32>
    %30 = vector.extract_strided_slice %17 {offsets = [0, 40], sizes = [16, 8], strides = [1, 1]} : vector<16x96xf32> to vector<16x8xf32>
    %31 = vector.shape_cast %30 : vector<16x8xf32> to vector<2x8x8xf32>
    %32 = vector.extract_strided_slice %17 {offsets = [0, 48], sizes = [16, 8], strides = [1, 1]} : vector<16x96xf32> to vector<16x8xf32>
    %33 = vector.shape_cast %32 : vector<16x8xf32> to vector<2x8x8xf32>
    %34 = vector.extract_strided_slice %17 {offsets = [0, 56], sizes = [16, 8], strides = [1, 1]} : vector<16x96xf32> to vector<16x8xf32>
    %35 = vector.shape_cast %34 : vector<16x8xf32> to vector<2x8x8xf32>
    %36 = tpu.concatenate %29, %31, %33, %35 in 0 : vector<2x8x8xf32>, vector<2x8x8xf32>, vector<2x8x8xf32>, vector<2x8x8xf32> -> vector<8x8x8xf32>
    %37 = arith.truncf %36 : vector<8x8x8xf32> to vector<8x8x8xbf16>
    %38 = vector.extract_strided_slice %17 {offsets = [0, 64], sizes = [16, 8], strides = [1, 1]} : vector<16x96xf32> to vector<16x8xf32>
    %39 = vector.shape_cast %38 : vector<16x8xf32> to vector<2x8x8xf32>
    %40 = vector.extract_strided_slice %17 {offsets = [0, 72], sizes = [16, 8], strides = [1, 1]} : vector<16x96xf32> to vector<16x8xf32>
    %41 = vector.shape_cast %40 : vector<16x8xf32> to vector<2x8x8xf32>
    %42 = vector.extract_strided_slice %17 {offsets = [0, 80], sizes = [16, 8], strides = [1, 1]} : vector<16x96xf32> to vector<16x8xf32>
    %43 = vector.shape_cast %42 : vector<16x8xf32> to vector<2x8x8xf32>
    %44 = vector.extract_strided_slice %17 {offsets = [0, 88], sizes = [16, 8], strides = [1, 1]} : vector<16x96xf32> to vector<16x8xf32>
    %45 = vector.shape_cast %44 : vector<16x8xf32> to vector<2x8x8xf32>
    %46 = tpu.concatenate %39, %41, %43, %45 in 0 : vector<2x8x8xf32>, vector<2x8x8xf32>, vector<2x8x8xf32>, vector<2x8x8xf32> -> vector<8x8x8xf32>
    %47 = arith.truncf %46 : vector<8x8x8xf32> to vector<8x8x8xbf16>
    "tpu.trace_start"() <{level = 10 : i32, message = "btd,bsd->bts"}> : () -> ()
    %cst_12 = arith.constant dense<0.000000e+00> : vector<8x8x8xf32>
    %48 = tpu.matmul %27, %37, %cst_12 {dimension_numbers = #tpu.dot_dimension_numbers<[2], [2], [1], [1], [0, 0, 0, 1, 1, 1], [0], [0]>} : vector<8x8x8xbf16>, vector<8x8x8xbf16>, vector<8x8x8xf32> -> vector<8x8x8xf32>
    "tpu.trace_stop"() : () -> ()
    %cst_13 = arith.constant dense<0xFF800000> : vector<8x8xf32>
    %49 = vector.multi_reduction <maximumf>, %48, %cst_13 [2] : vector<8x8x8xf32> to vector<8x8xf32>
    %50 = vector.shape_cast %49 : vector<8x8xf32> to vector<8x8x1xf32>
    %51 = vector.broadcast %50 : vector<8x8x1xf32> to vector<8x8x8xf32>
    %52 = arith.subf %48, %51 : vector<8x8x8xf32>
    %53 = math.exp %52 : vector<8x8x8xf32>
    %cst_14 = arith.constant dense<0.000000e+00> : vector<8x8xf32>
    %54 = vector.multi_reduction <add>, %53, %cst_14 [2] : vector<8x8x8xf32> to vector<8x8xf32>
    %55 = vector.shape_cast %54 : vector<8x8xf32> to vector<8x8x1xf32>
    %56 = tpu.reciprocal %55 {approx = true} : vector<8x8x1xf32> -> vector<8x8x1xf32>
    %57 = vector.broadcast %56 : vector<8x8x1xf32> to vector<8x8x8xf32>
    %58 = arith.mulf %53, %57 : vector<8x8x8xf32>
    %59 = arith.truncf %58 : vector<8x8x8xf32> to vector<8x8x8xbf16>
    "tpu.trace_start"() <{level = 10 : i32, message = "bts,bsd->btd"}> : () -> ()
    %cst_15 = arith.constant dense<0.000000e+00> : vector<8x8x8xf32>
    %60 = tpu.matmul %59, %47, %cst_15 {dimension_numbers = #tpu.dot_dimension_numbers<[2], [1], [1], [2], [0, 0, 0, 1, 1, 2], [0], [0]>} : vector<8x8x8xbf16>, vector<8x8x8xbf16>, vector<8x8x8xf32> -> vector<8x8x8xf32>
    "tpu.trace_stop"() : () -> ()
    %61 = vector.extract_strided_slice %60 {offsets = [0, 0, 0], sizes = [2, 8, 8], strides = [1, 1, 1]} : vector<8x8x8xf32> to vector<2x8x8xf32>
    %62 = vector.shape_cast %61 : vector<2x8x8xf32> to vector<16x8xf32>
    %63 = vector.extract_strided_slice %60 {offsets = [2, 0, 0], sizes = [2, 8, 8], strides = [1, 1, 1]} : vector<8x8x8xf32> to vector<2x8x8xf32>
    %64 = vector.shape_cast %63 : vector<2x8x8xf32> to vector<16x8xf32>
    %65 = vector.extract_strided_slice %60 {offsets = [4, 0, 0], sizes = [2, 8, 8], strides = [1, 1, 1]} : vector<8x8x8xf32> to vector<2x8x8xf32>
    %66 = vector.shape_cast %65 : vector<2x8x8xf32> to vector<16x8xf32>
    %67 = vector.extract_strided_slice %60 {offsets = [6, 0, 0], sizes = [2, 8, 8], strides = [1, 1, 1]} : vector<8x8x8xf32> to vector<2x8x8xf32>
    %68 = vector.shape_cast %67 : vector<2x8x8xf32> to vector<16x8xf32>
    %69 = tpu.concatenate %62, %64, %66, %68 in 1 : vector<16x8xf32>, vector<16x8xf32>, vector<16x8xf32>, vector<16x8xf32> -> vector<16x32xf32>
    %70 = arith.truncf %69 : vector<16x32xf32> to vector<16x32xbf16>
    %c0_16 = arith.constant 0 : index
    %c0_17 = arith.constant 0 : index
    %c0_18 = arith.constant 0 : index
    %71 = vector.load %arg7[%c0_16, %c0_17, %c0_18] : memref<2x32x32xbf16, #tpu.memory_space<vmem>>, vector<1x32x32xbf16>
    %72 = vector.shape_cast %71 : vector<1x32x32xbf16> to vector<32x32xbf16>
    %cst_19 = arith.constant dense<0.000000e+00> : vector<16x32xf32>
    %73 = tpu.matmul %70, %72, %cst_19 {dimension_numbers = #tpu.dot_dimension_numbers<[1], [0], [0], [1], [0, 0, 1, 1], [], []>} : vector<16x32xbf16>, vector<32x32xbf16>, vector<16x32xf32> -> vector<16x32xf32>
    %c0_20 = arith.constant 0 : index
    %c0_21 = arith.constant 0 : index
    %c0_22 = arith.constant 0 : index
    %74 = vector.load %arg8[%c0_20, %c0_21, %c0_22] : memref<2x1x32xf32, #tpu.memory_space<vmem>>, vector<1x1x32xf32>
    %75 = vector.shape_cast %74 : vector<1x1x32xf32> to vector<1x32xf32>
    %76 = vector.broadcast %75 : vector<1x32xf32> to vector<16x32xf32>
    %77 = arith.addf %73, %76 : vector<16x32xf32>
    %78 = arith.addf %9, %77 : vector<16x32xf32>
    %c0_23 = arith.constant 0 : index
    %c0_24 = arith.constant 0 : index
    %c0_25 = arith.constant 0 : index
    %79 = vector.load %arg9[%c0_23, %c0_24, %c0_25] : memref<2x1x32xf32, #tpu.memory_space<vmem>>, vector<1x1x32xf32>
    %80 = vector.shape_cast %79 : vector<1x1x32xf32> to vector<1x32xf32>
    %c0_26 = arith.constant 0 : index
    %c0_27 = arith.constant 0 : index
    %c0_28 = arith.constant 0 : index
    %81 = vector.load %arg10[%c0_26, %c0_27, %c0_28] : memref<2x1x32xf32, #tpu.memory_space<vmem>>, vector<1x1x32xf32>
    %82 = vector.shape_cast %81 : vector<1x1x32xf32> to vector<1x32xf32>
    %cst_29 = arith.constant dense<0.000000e+00> : vector<16xf32>
    %83 = vector.multi_reduction <add>, %78, %cst_29 [1] : vector<16x32xf32> to vector<16xf32>
    %84 = vector.shape_cast %83 : vector<16xf32> to vector<16x1xf32>
    %cst_30 = arith.constant 3.200000e+01 : f32
    %85 = vector.broadcast %cst_30 : f32 to vector<16x1xf32>
    %86 = arith.divf %84, %85 : vector<16x1xf32>
    %87 = vector.broadcast %86 : vector<16x1xf32> to vector<16x32xf32>
    %88 = arith.subf %78, %87 : vector<16x32xf32>
    %89 = arith.mulf %88, %88 : vector<16x32xf32>
    %cst_31 = arith.constant dense<0.000000e+00> : vector<16xf32>
    %90 = vector.multi_reduction <add>, %89, %cst_31 [1] : vector<16x32xf32> to vector<16xf32>
    %91 = vector.shape_cast %90 : vector<16xf32> to vector<16x1xf32>
    %cst_32 = arith.constant 3.200000e+01 : f32
    %92 = vector.broadcast %cst_32 : f32 to vector<16x1xf32>
    %93 = arith.divf %91, %92 : vector<16x1xf32>
    %94 = vector.broadcast %86 : vector<16x1xf32> to vector<16x32xf32>
    %95 = arith.subf %78, %94 : vector<16x32xf32>
    %cst_33 = arith.constant 9.99999974E-6 : f32
    %96 = vector.broadcast %cst_33 : f32 to vector<16x1xf32>
    %97 = arith.addf %93, %96 : vector<16x1xf32>
    %98 = math.rsqrt %97 : vector<16x1xf32>
    %99 = vector.broadcast %98 : vector<16x1xf32> to vector<16x32xf32>
    %100 = arith.mulf %95, %99 : vector<16x32xf32>
    %101 = vector.broadcast %80 : vector<1x32xf32> to vector<16x32xf32>
    %102 = arith.mulf %100, %101 : vector<16x32xf32>
    %103 = vector.broadcast %82 : vector<1x32xf32> to vector<16x32xf32>
    %104 = arith.addf %102, %103 : vector<16x32xf32>
    %105 = arith.truncf %104 : vector<16x32xf32> to vector<16x32xbf16>
    %c0_34 = arith.constant 0 : index
    %c0_35 = arith.constant 0 : index
    %c0_36 = arith.constant 0 : index
    %106 = vector.load %arg11[%c0_34, %c0_35, %c0_36] : memref<2x32x128xbf16, #tpu.memory_space<vmem>>, vector<1x32x128xbf16>
    %107 = vector.shape_cast %106 : vector<1x32x128xbf16> to vector<32x128xbf16>
    %cst_37 = arith.constant dense<0.000000e+00> : vector<16x128xf32>
    %108 = tpu.matmul %105, %107, %cst_37 {dimension_numbers = #tpu.dot_dimension_numbers<[1], [0], [0], [1], [0, 0, 1, 1], [], []>} : vector<16x32xbf16>, vector<32x128xbf16>, vector<16x128xf32> -> vector<16x128xf32>
    %c0_38 = arith.constant 0 : index
    %c0_39 = arith.constant 0 : index
    %c0_40 = arith.constant 0 : index
    %109 = vector.load %arg12[%c0_38, %c0_39, %c0_40] : memref<2x1x128xf32, #tpu.memory_space<vmem>>, vector<1x1x128xf32>
    %110 = vector.shape_cast %109 : vector<1x1x128xf32> to vector<1x128xf32>
    %111 = vector.broadcast %110 : vector<1x128xf32> to vector<16x128xf32>
    %112 = arith.addf %108, %111 : vector<16x128xf32>
    %cst_41 = arith.constant 0.000000e+00 : f32
    %113 = vector.broadcast %cst_41 : f32 to vector<16x128xf32>
    %114 = arith.maximumf %112, %113 : vector<16x128xf32>
    %115 = arith.truncf %114 : vector<16x128xf32> to vector<16x128xbf16>
    %c0_42 = arith.constant 0 : index
    %c0_43 = arith.constant 0 : index
    %c0_44 = arith.constant 0 : index
    %116 = vector.load %arg13[%c0_42, %c0_43, %c0_44] : memref<2x128x32xbf16, #tpu.memory_space<vmem>>, vector<1x128x32xbf16>
    %117 = vector.shape_cast %116 : vector<1x128x32xbf16> to vector<128x32xbf16>
    %cst_45 = arith.constant dense<0.000000e+00> : vector<16x32xf32>
    %118 = tpu.matmul %115, %117, %cst_45 {dimension_numbers = #tpu.dot_dimension_numbers<[1], [0], [0], [1], [0, 0, 1, 1], [], []>} : vector<16x128xbf16>, vector<128x32xbf16>, vector<16x32xf32> -> vector<16x32xf32>
    %c0_46 = arith.constant 0 : index
    %c0_47 = arith.constant 0 : index
    %c0_48 = arith.constant 0 : index
    %119 = vector.load %arg14[%c0_46, %c0_47, %c0_48] : memref<2x1x32xf32, #tpu.memory_space<vmem>>, vector<1x1x32xf32>
    %120 = vector.shape_cast %119 : vector<1x1x32xf32> to vector<1x32xf32>
    %121 = vector.broadcast %120 : vector<1x32xf32> to vector<16x32xf32>
    %122 = arith.addf %118, %121 : vector<16x32xf32>
    %123 = arith.addf %104, %122 : vector<16x32xf32>
    %c0_49 = arith.constant 0 : index
    %c0_50 = arith.constant 0 : index
    %c0_51 = arith.constant 0 : index
    %124 = vector.load %arg15[%c0_49, %c0_50, %c0_51] : memref<2x1x32xf32, #tpu.memory_space<vmem>>, vector<1x1x32xf32>
    %125 = vector.shape_cast %124 : vector<1x1x32xf32> to vector<1x32xf32>
    %c0_52 = arith.constant 0 : index
    %c0_53 = arith.constant 0 : index
    %c0_54 = arith.constant 0 : index
    %126 = vector.load %arg16[%c0_52, %c0_53, %c0_54] : memref<2x1x32xf32, #tpu.memory_space<vmem>>, vector<1x1x32xf32>
    %127 = vector.shape_cast %126 : vector<1x1x32xf32> to vector<1x32xf32>
    %cst_55 = arith.constant dense<0.000000e+00> : vector<16xf32>
    %128 = vector.multi_reduction <add>, %123, %cst_55 [1] : vector<16x32xf32> to vector<16xf32>
    %129 = vector.shape_cast %128 : vector<16xf32> to vector<16x1xf32>
    %cst_56 = arith.constant 3.200000e+01 : f32
    %130 = vector.broadcast %cst_56 : f32 to vector<16x1xf32>
    %131 = arith.divf %129, %130 : vector<16x1xf32>
    %132 = vector.broadcast %131 : vector<16x1xf32> to vector<16x32xf32>
    %133 = arith.subf %123, %132 : vector<16x32xf32>
    %134 = arith.mulf %133, %133 : vector<16x32xf32>
    %cst_57 = arith.constant dense<0.000000e+00> : vector<16xf32>
    %135 = vector.multi_reduction <add>, %134, %cst_57 [1] : vector<16x32xf32> to vector<16xf32>
    %136 = vector.shape_cast %135 : vector<16xf32> to vector<16x1xf32>
    %cst_58 = arith.constant 3.200000e+01 : f32
    %137 = vector.broadcast %cst_58 : f32 to vector<16x1xf32>
    %138 = arith.divf %136, %137 : vector<16x1xf32>
    %139 = vector.broadcast %131 : vector<16x1xf32> to vector<16x32xf32>
    %140 = arith.subf %123, %139 : vector<16x32xf32>
    %cst_59 = arith.constant 9.99999974E-6 : f32
    %141 = vector.broadcast %cst_59 : f32 to vector<16x1xf32>
    %142 = arith.addf %138, %141 : vector<16x1xf32>
    %143 = math.rsqrt %142 : vector<16x1xf32>
    %144 = vector.broadcast %143 : vector<16x1xf32> to vector<16x32xf32>
    %145 = arith.mulf %140, %144 : vector<16x32xf32>
    %146 = vector.broadcast %125 : vector<1x32xf32> to vector<16x32xf32>
    %147 = arith.mulf %145, %146 : vector<16x32xf32>
    %148 = vector.broadcast %127 : vector<1x32xf32> to vector<16x32xf32>
    %149 = arith.addf %147, %148 : vector<16x32xf32>
    %150 = arith.truncf %149 : vector<16x32xf32> to vector<16x32xbf16>
    %c1 = arith.constant 1 : index
    %c0_60 = arith.constant 0 : index
    %c0_61 = arith.constant 0 : index
    %151 = vector.load %arg5[%c1, %c0_60, %c0_61] : memref<2x32x96xbf16, #tpu.memory_space<vmem>>, vector<1x32x96xbf16>
    %152 = vector.shape_cast %151 : vector<1x32x96xbf16> to vector<32x96xbf16>
    %cst_62 = arith.constant dense<0.000000e+00> : vector<16x96xf32>
    %153 = tpu.matmul %150, %152, %cst_62 {dimension_numbers = #tpu.dot_dimension_numbers<[1], [0], [0], [1], [0, 0, 1, 1], [], []>} : vector<16x32xbf16>, vector<32x96xbf16>, vector<16x96xf32> -> vector<16x96xf32>
    %c1_63 = arith.constant 1 : index
    %c0_64 = arith.constant 0 : index
    %c0_65 = arith.constant 0 : index
    %154 = vector.load %arg6[%c1_63, %c0_64, %c0_65] : memref<2x1x96xf32, #tpu.memory_space<vmem>>, vector<1x1x96xf32>
    %155 = vector.shape_cast %154 : vector<1x1x96xf32> to vector<1x96xf32>
    %156 = vector.broadcast %155 : vector<1x96xf32> to vector<16x96xf32>
    %157 = arith.addf %153, %156 : vector<16x96xf32>
    %158 = vector.extract_strided_slice %157 {offsets = [0, 0], sizes = [16, 8], strides = [1, 1]} : vector<16x96xf32> to vector<16x8xf32>
    %159 = vector.shape_cast %158 : vector<16x8xf32> to vector<2x8x8xf32>
    %160 = vector.extract_strided_slice %157 {offsets = [0, 8], sizes = [16, 8], strides = [1, 1]} : vector<16x96xf32> to vector<16x8xf32>
    %161 = vector.shape_cast %160 : vector<16x8xf32> to vector<2x8x8xf32>
    %162 = vector.extract_strided_slice %157 {offsets = [0, 16], sizes = [16, 8], strides = [1, 1]} : vector<16x96xf32> to vector<16x8xf32>
    %163 = vector.shape_cast %162 : vector<16x8xf32> to vector<2x8x8xf32>
    %164 = vector.extract_strided_slice %157 {offsets = [0, 24], sizes = [16, 8], strides = [1, 1]} : vector<16x96xf32> to vector<16x8xf32>
    %165 = vector.shape_cast %164 : vector<16x8xf32> to vector<2x8x8xf32>
    %166 = tpu.concatenate %159, %161, %163, %165 in 0 : vector<2x8x8xf32>, vector<2x8x8xf32>, vector<2x8x8xf32>, vector<2x8x8xf32> -> vector<8x8x8xf32>
    %167 = arith.truncf %166 : vector<8x8x8xf32> to vector<8x8x8xbf16>
    %168 = vector.extract_strided_slice %157 {offsets = [0, 32], sizes = [16, 8], strides = [1, 1]} : vector<16x96xf32> to vector<16x8xf32>
    %169 = vector.shape_cast %168 : vector<16x8xf32> to vector<2x8x8xf32>
    %170 = vector.extract_strided_slice %157 {offsets = [0, 40], sizes = [16, 8], strides = [1, 1]} : vector<16x96xf32> to vector<16x8xf32>
    %171 = vector.shape_cast %170 : vector<16x8xf32> to vector<2x8x8xf32>
    %172 = vector.extract_strided_slice %157 {offsets = [0, 48], sizes = [16, 8], strides = [1, 1]} : vector<16x96xf32> to vector<16x8xf32>
    %173 = vector.shape_cast %172 : vector<16x8xf32> to vector<2x8x8xf32>
    %174 = vector.extract_strided_slice %157 {offsets = [0, 56], sizes = [16, 8], strides = [1, 1]} : vector<16x96xf32> to vector<16x8xf32>
    %175 = vector.shape_cast %174 : vector<16x8xf32> to vector<2x8x8xf32>
    %176 = tpu.concatenate %169, %171, %173, %175 in 0 : vector<2x8x8xf32>, vector<2x8x8xf32>, vector<2x8x8xf32>, vector<2x8x8xf32> -> vector<8x8x8xf32>
    %177 = arith.truncf %176 : vector<8x8x8xf32> to vector<8x8x8xbf16>
    %178 = vector.extract_strided_slice %157 {offsets = [0, 64], sizes = [16, 8], strides = [1, 1]} : vector<16x96xf32> to vector<16x8xf32>
    %179 = vector.shape_cast %178 : vector<16x8xf32> to vector<2x8x8xf32>
    %180 = vector.extract_strided_slice %157 {offsets = [0, 72], sizes = [16, 8], strides = [1, 1]} : vector<16x96xf32> to vector<16x8xf32>
    %181 = vector.shape_cast %180 : vector<16x8xf32> to vector<2x8x8xf32>
    %182 = vector.extract_strided_slice %157 {offsets = [0, 80], sizes = [16, 8], strides = [1, 1]} : vector<16x96xf32> to vector<16x8xf32>
    %183 = vector.shape_cast %182 : vector<16x8xf32> to vector<2x8x8xf32>
    %184 = vector.extract_strided_slice %157 {offsets = [0, 88], sizes = [16, 8], strides = [1, 1]} : vector<16x96xf32> to vector<16x8xf32>
    %185 = vector.shape_cast %184 : vector<16x8xf32> to vector<2x8x8xf32>
    %186 = tpu.concatenate %179, %181, %183, %185 in 0 : vector<2x8x8xf32>, vector<2x8x8xf32>, vector<2x8x8xf32>, vector<2x8x8xf32> -> vector<8x8x8xf32>
    %187 = arith.truncf %186 : vector<8x8x8xf32> to vector<8x8x8xbf16>
    "tpu.trace_start"() <{level = 10 : i32, message = "btd,bsd->bts"}> : () -> ()
    %cst_66 = arith.constant dense<0.000000e+00> : vector<8x8x8xf32>
    %188 = tpu.matmul %167, %177, %cst_66 {dimension_numbers = #tpu.dot_dimension_numbers<[2], [2], [1], [1], [0, 0, 0, 1, 1, 1], [0], [0]>} : vector<8x8x8xbf16>, vector<8x8x8xbf16>, vector<8x8x8xf32> -> vector<8x8x8xf32>
    "tpu.trace_stop"() : () -> ()
    %cst_67 = arith.constant dense<0xFF800000> : vector<8x8xf32>
    %189 = vector.multi_reduction <maximumf>, %188, %cst_67 [2] : vector<8x8x8xf32> to vector<8x8xf32>
    %190 = vector.shape_cast %189 : vector<8x8xf32> to vector<8x8x1xf32>
    %191 = vector.broadcast %190 : vector<8x8x1xf32> to vector<8x8x8xf32>
    %192 = arith.subf %188, %191 : vector<8x8x8xf32>
    %193 = math.exp %192 : vector<8x8x8xf32>
    %cst_68 = arith.constant dense<0.000000e+00> : vector<8x8xf32>
    %194 = vector.multi_reduction <add>, %193, %cst_68 [2] : vector<8x8x8xf32> to vector<8x8xf32>
    %195 = vector.shape_cast %194 : vector<8x8xf32> to vector<8x8x1xf32>
    %196 = tpu.reciprocal %195 {approx = true} : vector<8x8x1xf32> -> vector<8x8x1xf32>
    %197 = vector.broadcast %196 : vector<8x8x1xf32> to vector<8x8x8xf32>
    %198 = arith.mulf %193, %197 : vector<8x8x8xf32>
    %199 = arith.truncf %198 : vector<8x8x8xf32> to vector<8x8x8xbf16>
    "tpu.trace_start"() <{level = 10 : i32, message = "bts,bsd->btd"}> : () -> ()
    %cst_69 = arith.constant dense<0.000000e+00> : vector<8x8x8xf32>
    %200 = tpu.matmul %199, %187, %cst_69 {dimension_numbers = #tpu.dot_dimension_numbers<[2], [1], [1], [2], [0, 0, 0, 1, 1, 2], [0], [0]>} : vector<8x8x8xbf16>, vector<8x8x8xbf16>, vector<8x8x8xf32> -> vector<8x8x8xf32>
    "tpu.trace_stop"() : () -> ()
    %201 = vector.extract_strided_slice %200 {offsets = [0, 0, 0], sizes = [2, 8, 8], strides = [1, 1, 1]} : vector<8x8x8xf32> to vector<2x8x8xf32>
    %202 = vector.shape_cast %201 : vector<2x8x8xf32> to vector<16x8xf32>
    %203 = vector.extract_strided_slice %200 {offsets = [2, 0, 0], sizes = [2, 8, 8], strides = [1, 1, 1]} : vector<8x8x8xf32> to vector<2x8x8xf32>
    %204 = vector.shape_cast %203 : vector<2x8x8xf32> to vector<16x8xf32>
    %205 = vector.extract_strided_slice %200 {offsets = [4, 0, 0], sizes = [2, 8, 8], strides = [1, 1, 1]} : vector<8x8x8xf32> to vector<2x8x8xf32>
    %206 = vector.shape_cast %205 : vector<2x8x8xf32> to vector<16x8xf32>
    %207 = vector.extract_strided_slice %200 {offsets = [6, 0, 0], sizes = [2, 8, 8], strides = [1, 1, 1]} : vector<8x8x8xf32> to vector<2x8x8xf32>
    %208 = vector.shape_cast %207 : vector<2x8x8xf32> to vector<16x8xf32>
    %209 = tpu.concatenate %202, %204, %206, %208 in 1 : vector<16x8xf32>, vector<16x8xf32>, vector<16x8xf32>, vector<16x8xf32> -> vector<16x32xf32>
    %210 = arith.truncf %209 : vector<16x32xf32> to vector<16x32xbf16>
    %c1_70 = arith.constant 1 : index
    %c0_71 = arith.constant 0 : index
    %c0_72 = arith.constant 0 : index
    %211 = vector.load %arg7[%c1_70, %c0_71, %c0_72] : memref<2x32x32xbf16, #tpu.memory_space<vmem>>, vector<1x32x32xbf16>
    %212 = vector.shape_cast %211 : vector<1x32x32xbf16> to vector<32x32xbf16>
    %cst_73 = arith.constant dense<0.000000e+00> : vector<16x32xf32>
    %213 = tpu.matmul %210, %212, %cst_73 {dimension_numbers = #tpu.dot_dimension_numbers<[1], [0], [0], [1], [0, 0, 1, 1], [], []>} : vector<16x32xbf16>, vector<32x32xbf16>, vector<16x32xf32> -> vector<16x32xf32>
    %c1_74 = arith.constant 1 : index
    %c0_75 = arith.constant 0 : index
    %c0_76 = arith.constant 0 : index
    %214 = vector.load %arg8[%c1_74, %c0_75, %c0_76] : memref<2x1x32xf32, #tpu.memory_space<vmem>>, vector<1x1x32xf32>
    %215 = vector.shape_cast %214 : vector<1x1x32xf32> to vector<1x32xf32>
    %216 = vector.broadcast %215 : vector<1x32xf32> to vector<16x32xf32>
    %217 = arith.addf %213, %216 : vector<16x32xf32>
    %218 = arith.addf %149, %217 : vector<16x32xf32>
    %c1_77 = arith.constant 1 : index
    %c0_78 = arith.constant 0 : index
    %c0_79 = arith.constant 0 : index
    %219 = vector.load %arg9[%c1_77, %c0_78, %c0_79] : memref<2x1x32xf32, #tpu.memory_space<vmem>>, vector<1x1x32xf32>
    %220 = vector.shape_cast %219 : vector<1x1x32xf32> to vector<1x32xf32>
    %c1_80 = arith.constant 1 : index
    %c0_81 = arith.constant 0 : index
    %c0_82 = arith.constant 0 : index
    %221 = vector.load %arg10[%c1_80, %c0_81, %c0_82] : memref<2x1x32xf32, #tpu.memory_space<vmem>>, vector<1x1x32xf32>
    %222 = vector.shape_cast %221 : vector<1x1x32xf32> to vector<1x32xf32>
    %cst_83 = arith.constant dense<0.000000e+00> : vector<16xf32>
    %223 = vector.multi_reduction <add>, %218, %cst_83 [1] : vector<16x32xf32> to vector<16xf32>
    %224 = vector.shape_cast %223 : vector<16xf32> to vector<16x1xf32>
    %cst_84 = arith.constant 3.200000e+01 : f32
    %225 = vector.broadcast %cst_84 : f32 to vector<16x1xf32>
    %226 = arith.divf %224, %225 : vector<16x1xf32>
    %227 = vector.broadcast %226 : vector<16x1xf32> to vector<16x32xf32>
    %228 = arith.subf %218, %227 : vector<16x32xf32>
    %229 = arith.mulf %228, %228 : vector<16x32xf32>
    %cst_85 = arith.constant dense<0.000000e+00> : vector<16xf32>
    %230 = vector.multi_reduction <add>, %229, %cst_85 [1] : vector<16x32xf32> to vector<16xf32>
    %231 = vector.shape_cast %230 : vector<16xf32> to vector<16x1xf32>
    %cst_86 = arith.constant 3.200000e+01 : f32
    %232 = vector.broadcast %cst_86 : f32 to vector<16x1xf32>
    %233 = arith.divf %231, %232 : vector<16x1xf32>
    %234 = vector.broadcast %226 : vector<16x1xf32> to vector<16x32xf32>
    %235 = arith.subf %218, %234 : vector<16x32xf32>
    %cst_87 = arith.constant 9.99999974E-6 : f32
    %236 = vector.broadcast %cst_87 : f32 to vector<16x1xf32>
    %237 = arith.addf %233, %236 : vector<16x1xf32>
    %238 = math.rsqrt %237 : vector<16x1xf32>
    %239 = vector.broadcast %238 : vector<16x1xf32> to vector<16x32xf32>
    %240 = arith.mulf %235, %239 : vector<16x32xf32>
    %241 = vector.broadcast %220 : vector<1x32xf32> to vector<16x32xf32>
    %242 = arith.mulf %240, %241 : vector<16x32xf32>
    %243 = vector.broadcast %222 : vector<1x32xf32> to vector<16x32xf32>
    %244 = arith.addf %242, %243 : vector<16x32xf32>
    %245 = arith.truncf %244 : vector<16x32xf32> to vector<16x32xbf16>
    %c1_88 = arith.constant 1 : index
    %c0_89 = arith.constant 0 : index
    %c0_90 = arith.constant 0 : index
    %246 = vector.load %arg11[%c1_88, %c0_89, %c0_90] : memref<2x32x128xbf16, #tpu.memory_space<vmem>>, vector<1x32x128xbf16>
    %247 = vector.shape_cast %246 : vector<1x32x128xbf16> to vector<32x128xbf16>
    %cst_91 = arith.constant dense<0.000000e+00> : vector<16x128xf32>
    %248 = tpu.matmul %245, %247, %cst_91 {dimension_numbers = #tpu.dot_dimension_numbers<[1], [0], [0], [1], [0, 0, 1, 1], [], []>} : vector<16x32xbf16>, vector<32x128xbf16>, vector<16x128xf32> -> vector<16x128xf32>
    %c1_92 = arith.constant 1 : index
    %c0_93 = arith.constant 0 : index
    %c0_94 = arith.constant 0 : index
    %249 = vector.load %arg12[%c1_92, %c0_93, %c0_94] : memref<2x1x128xf32, #tpu.memory_space<vmem>>, vector<1x1x128xf32>
    %250 = vector.shape_cast %249 : vector<1x1x128xf32> to vector<1x128xf32>
    %251 = vector.broadcast %250 : vector<1x128xf32> to vector<16x128xf32>
    %252 = arith.addf %248, %251 : vector<16x128xf32>
    %cst_95 = arith.constant 0.000000e+00 : f32
    %253 = vector.broadcast %cst_95 : f32 to vector<16x128xf32>
    %254 = arith.maximumf %252, %253 : vector<16x128xf32>
    %255 = arith.truncf %254 : vector<16x128xf32> to vector<16x128xbf16>
    %c1_96 = arith.constant 1 : index
    %c0_97 = arith.constant 0 : index
    %c0_98 = arith.constant 0 : index
    %256 = vector.load %arg13[%c1_96, %c0_97, %c0_98] : memref<2x128x32xbf16, #tpu.memory_space<vmem>>, vector<1x128x32xbf16>
    %257 = vector.shape_cast %256 : vector<1x128x32xbf16> to vector<128x32xbf16>
    %cst_99 = arith.constant dense<0.000000e+00> : vector<16x32xf32>
    %258 = tpu.matmul %255, %257, %cst_99 {dimension_numbers = #tpu.dot_dimension_numbers<[1], [0], [0], [1], [0, 0, 1, 1], [], []>} : vector<16x128xbf16>, vector<128x32xbf16>, vector<16x32xf32> -> vector<16x32xf32>
    %c1_100 = arith.constant 1 : index
    %c0_101 = arith.constant 0 : index
    %c0_102 = arith.constant 0 : index
    %259 = vector.load %arg14[%c1_100, %c0_101, %c0_102] : memref<2x1x32xf32, #tpu.memory_space<vmem>>, vector<1x1x32xf32>
    %260 = vector.shape_cast %259 : vector<1x1x32xf32> to vector<1x32xf32>
    %261 = vector.broadcast %260 : vector<1x32xf32> to vector<16x32xf32>
    %262 = arith.addf %258, %261 : vector<16x32xf32>
    %263 = arith.addf %244, %262 : vector<16x32xf32>
    %c1_103 = arith.constant 1 : index
    %c0_104 = arith.constant 0 : index
    %c0_105 = arith.constant 0 : index
    %264 = vector.load %arg15[%c1_103, %c0_104, %c0_105] : memref<2x1x32xf32, #tpu.memory_space<vmem>>, vector<1x1x32xf32>
    %265 = vector.shape_cast %264 : vector<1x1x32xf32> to vector<1x32xf32>
    %c1_106 = arith.constant 1 : index
    %c0_107 = arith.constant 0 : index
    %c0_108 = arith.constant 0 : index
    %266 = vector.load %arg16[%c1_106, %c0_107, %c0_108] : memref<2x1x32xf32, #tpu.memory_space<vmem>>, vector<1x1x32xf32>
    %267 = vector.shape_cast %266 : vector<1x1x32xf32> to vector<1x32xf32>
    %cst_109 = arith.constant dense<0.000000e+00> : vector<16xf32>
    %268 = vector.multi_reduction <add>, %263, %cst_109 [1] : vector<16x32xf32> to vector<16xf32>
    %269 = vector.shape_cast %268 : vector<16xf32> to vector<16x1xf32>
    %cst_110 = arith.constant 3.200000e+01 : f32
    %270 = vector.broadcast %cst_110 : f32 to vector<16x1xf32>
    %271 = arith.divf %269, %270 : vector<16x1xf32>
    %272 = vector.broadcast %271 : vector<16x1xf32> to vector<16x32xf32>
    %273 = arith.subf %263, %272 : vector<16x32xf32>
    %274 = arith.mulf %273, %273 : vector<16x32xf32>
    %cst_111 = arith.constant dense<0.000000e+00> : vector<16xf32>
    %275 = vector.multi_reduction <add>, %274, %cst_111 [1] : vector<16x32xf32> to vector<16xf32>
    %276 = vector.shape_cast %275 : vector<16xf32> to vector<16x1xf32>
    %cst_112 = arith.constant 3.200000e+01 : f32
    %277 = vector.broadcast %cst_112 : f32 to vector<16x1xf32>
    %278 = arith.divf %276, %277 : vector<16x1xf32>
    %279 = vector.broadcast %271 : vector<16x1xf32> to vector<16x32xf32>
    %280 = arith.subf %263, %279 : vector<16x32xf32>
    %cst_113 = arith.constant 9.99999974E-6 : f32
    %281 = vector.broadcast %cst_113 : f32 to vector<16x1xf32>
    %282 = arith.addf %278, %281 : vector<16x1xf32>
    %283 = math.rsqrt %282 : vector<16x1xf32>
    %284 = vector.broadcast %283 : vector<16x1xf32> to vector<16x32xf32>
    %285 = arith.mulf %280, %284 : vector<16x32xf32>
    %286 = vector.broadcast %265 : vector<1x32xf32> to vector<16x32xf32>
    %287 = arith.mulf %285, %286 : vector<16x32xf32>
    %288 = vector.broadcast %267 : vector<1x32xf32> to vector<16x32xf32>
    %289 = arith.addf %287, %288 : vector<16x32xf32>
    %c0_114 = arith.constant 0 : index
    %c0_115 = arith.constant 0 : index
    %290 = vector.load %arg3[%c0_114, %c0_115] : memref<2x16xbf16, #tpu.memory_space<vmem>>, vector<2x16xbf16>
    %291 = arith.truncf %289 : vector<16x32xf32> to vector<16x32xbf16>
    %cst_116 = arith.constant dense<0.000000e+00> : vector<2x32xf32>
    %292 = tpu.matmul %290, %291, %cst_116 {dimension_numbers = #tpu.dot_dimension_numbers<[1], [0], [0], [1], [0, 0, 1, 1], [], []>} : vector<2x16xbf16>, vector<16x32xbf16>, vector<2x32xf32> -> vector<2x32xf32>
    %293 = arith.truncf %292 : vector<2x32xf32> to vector<2x32xbf16>
    %c0_117 = arith.constant 0 : index
    %c0_118 = arith.constant 0 : index
    %294 = vector.load %arg17[%c0_117, %c0_118] : memref<32x128xbf16, #tpu.memory_space<vmem>>, vector<32x128xbf16>
    %cst_119 = arith.constant dense<0.000000e+00> : vector<2x128xf32>
    %295 = tpu.matmul %293, %294, %cst_119 {dimension_numbers = #tpu.dot_dimension_numbers<[1], [0], [0], [1], [0, 0, 1, 1], [], []>} : vector<2x32xbf16>, vector<32x128xbf16>, vector<2x128xf32> -> vector<2x128xf32>
    %c0_120 = arith.constant 0 : index
    %c0_121 = arith.constant 0 : index
    %296 = vector.load %arg18[%c0_120, %c0_121] : memref<1x128xf32, #tpu.memory_space<vmem>>, vector<1x128xf32>
    %297 = vector.broadcast %296 : vector<1x128xf32> to vector<2x128xf32>
    %298 = arith.addf %295, %297 : vector<2x128xf32>
    %c0_122 = arith.constant 0 : index
    %c0_123 = arith.constant 0 : index
    %299 = vector.load %arg19[%c0_122, %c0_123] : memref<2x128xf32, #tpu.memory_space<vmem>>, vector<2x128xf32>
    tpu.vector_store %arg19[%c0_122, %c0_123], %298 {strides = array<i32>} : memref<2x128xf32, #tpu.memory_space<vmem>>, vector<2x128xf32>,
    return
  }
  func.func @transform_0(%arg0: i32) -> (i32, i32) {
    %c0_i32 = arith.constant 0 : i32
    %c0_i32_0 = arith.constant 0 : i32
    return %arg0, %c0_i32 : i32, i32
  }
  func.func @transform_1(%arg0: i32) -> (i32, i32) {
    %c0_i32 = arith.constant 0 : i32
    %c0_i32_0 = arith.constant 0 : i32
    %c0_i32_1 = arith.constant 0 : i32
    return %c0_i32, %c0_i32_0 : i32, i32
  }
  func.func @transform_2(%arg0: i32) -> (i32, i32) {
    %c0_i32 = arith.constant 0 : i32
    %c0_i32_0 = arith.constant 0 : i32
    %c0_i32_1 = arith.constant 0 : i32
    return %c0_i32, %c0_i32_0 : i32, i32
  }
  func.func @transform_3(%arg0: i32) -> (i32, i32) {
    %c0_i32 = arith.constant 0 : i32
    %c0_i32_0 = arith.constant 0 : i32
    %c0_i32_1 = arith.constant 0 : i32
    return %c0_i32, %c0_i32_0 : i32, i32
  }
  func.func @transform_4(%arg0: i32) -> (i32, i32, i32) {
    %c0_i32 = arith.constant 0 : i32
    %c0_i32_0 = arith.constant 0 : i32
    %c0_i32_1 = arith.constant 0 : i32
    %c0_i32_2 = arith.constant 0 : i32
    return %c0_i32, %c0_i32_0, %c0_i32_1 : i32, i32, i32
  }
  func.func @transform_5(%arg0: i32) -> (i32, i32, i32) {
    %c0_i32 = arith.constant 0 : i32
    %c0_i32_0 = arith.constant 0 : i32
    %c0_i32_1 = arith.constant 0 : i32
    %c0_i32_2 = arith.constant 0 : i32
    return %c0_i32, %c0_i32_0, %c0_i32_1 : i32, i32, i32
  }
  func.func @transform_6(%arg0: i32) -> (i32, i32, i32) {
    %c0_i32 = arith.constant 0 : i32
    %c0_i32_0 = arith.constant 0 : i32
    %c0_i32_1 = arith.constant 0 : i32
    %c0_i32_2 = arith.constant 0 : i32
    return %c0_i32, %c0_i32_0, %c0_i32_1 : i32, i32, i32
  }
  func.func @transform_7(%arg0: i32) -> (i32, i32, i32) {
    %c0_i32 = arith.constant 0 : i32
    %c0_i32_0 = arith.constant 0 : i32
    %c0_i32_1 = arith.constant 0 : i32
    %c0_i32_2 = arith.constant 0 : i32
    return %c0_i32, %c0_i32_0, %c0_i32_1 : i32, i32, i32
  }
  func.func @transform_8(%arg0: i32) -> (i32, i32, i32) {
    %c0_i32 = arith.constant 0 : i32
    %c0_i32_0 = arith.constant 0 : i32
    %c0_i32_1 = arith.constant 0 : i32
    %c0_i32_2 = arith.constant 0 : i32
    return %c0_i32, %c0_i32_0, %c0_i32_1 : i32, i32, i32
  }
  func.func @transform_9(%arg0: i32) -> (i32, i32, i32) {
    %c0_i32 = arith.constant 0 : i32
    %c0_i32_0 = arith.constant 0 : i32
    %c0_i32_1 = arith.constant 0 : i32
    %c0_i32_2 = arith.constant 0 : i32
    return %c0_i32, %c0_i32_0, %c0_i32_1 : i32, i32, i32
  }
  func.func @transform_10(%arg0: i32) -> (i32, i32, i32) {
    %c0_i32 = arith.constant 0 : i32
    %c0_i32_0 = arith.constant 0 : i32
    %c0_i32_1 = arith.constant 0 : i32
    %c0_i32_2 = arith.constant 0 : i32
    return %c0_i32, %c0_i32_0, %c0_i32_1 : i32, i32, i32
  }
  func.func @transform_11(%arg0: i32) -> (i32, i32, i32) {
    %c0_i32 = arith.constant 0 : i32
    %c0_i32_0 = arith.constant 0 : i32
    %c0_i32_1 = arith.constant 0 : i32
    %c0_i32_2 = arith.constant 0 : i32
    return %c0_i32, %c0_i32_0, %c0_i32_1 : i32, i32, i32
  }
  func.func @transform_12(%arg0: i32) -> (i32, i32, i32) {
    %c0_i32 = arith.constant 0 : i32
    %c0_i32_0 = arith.constant 0 : i32
    %c0_i32_1 = arith.constant 0 : i32
    %c0_i32_2 = arith.constant 0 : i32
    return %c0_i32, %c0_i32_0, %c0_i32_1 : i32, i32, i32
  }
  func.func @transform_13(%arg0: i32) -> (i32, i32, i32) {
    %c0_i32 = arith.constant 0 : i32
    %c0_i32_0 = arith.constant 0 : i32
    %c0_i32_1 = arith.constant 0 : i32
    %c0_i32_2 = arith.constant 0 : i32
    return %c0_i32, %c0_i32_0, %c0_i32_1 : i32, i32, i32
  }
  func.func @transform_14(%arg0: i32) -> (i32, i32, i32) {
    %c0_i32 = arith.constant 0 : i32
    %c0_i32_0 = arith.constant 0 : i32
    %c0_i32_1 = arith.constant 0 : i32
    %c0_i32_2 = arith.constant 0 : i32
    return %c0_i32, %c0_i32_0, %c0_i32_1 : i32, i32, i32
  }
  func.func @transform_15(%arg0: i32) -> (i32, i32, i32) {
    %c0_i32 = arith.constant 0 : i32
    %c0_i32_0 = arith.constant 0 : i32
    %c0_i32_1 = arith.constant 0 : i32
    %c0_i32_2 = arith.constant 0 : i32
    return %c0_i32, %c0_i32_0, %c0_i32_1 : i32, i32, i32
  }
  func.func @transform_16(%arg0: i32) -> (i32, i32) {
    %c0_i32 = arith.constant 0 : i32
    %c0_i32_0 = arith.constant 0 : i32
    %c0_i32_1 = arith.constant 0 : i32
    return %c0_i32, %c0_i32_0 : i32, i32
  }
  func.func @transform_17(%arg0: i32) -> (i32, i32) {
    %c0_i32 = arith.constant 0 : i32
    %c0_i32_0 = arith.constant 0 : i32
    %c0_i32_1 = arith.constant 0 : i32
    return %c0_i32, %c0_i32_0 : i32, i32
  }
  func.func @transform_18(%arg0: i32) -> (i32, i32) {
    %c0_i32 = arith.constant 0 : i32
    %c0_i32_0 = arith.constant 0 : i32
    return %arg0, %c0_i32 : i32, i32
  }
}

module attributes {stable_mosaic.version = 11 : i64} {
  func.func @transformer_kernel(%arg0: i32, %arg1: memref<16x4xf32, #tpu.memory_space<vmem>>, %arg2: memref<8x32xf32, #tpu.memory_space<vmem>>, %arg3: memref<2x16xbf16, #tpu.memory_space<vmem>>, %arg4: memref<4x32xbf16, #tpu.memory_space<vmem>>, %arg5: memref<2x32x96xbf16, #tpu.memory_space<vmem>>, %arg6: memref<2x1x96xf32, #tpu.memory_space<vmem>>, %arg7: memref<2x32x32xbf16, #tpu.memory_space<vmem>>, %arg8: memref<2x1x32xf32, #tpu.memory_space<vmem>>, %arg9: memref<2x1x32xf32, #tpu.memory_space<vmem>>, %arg10: memref<2x1x32xf32, #tpu.memory_space<vmem>>, %arg11: memref<2x32x128xbf16, #tpu.memory_space<vmem>>, %arg12: memref<2x1x128xf32, #tpu.memory_space<vmem>>, %arg13: memref<2x128x32xbf16, #tpu.memory_space<vmem>>, %arg14: memref<2x1x32xf32, #tpu.memory_space<vmem>>, %arg15: memref<2x1x32xf32, #tpu.memory_space<vmem>>, %arg16: memref<2x1x32xf32, #tpu.memory_space<vmem>>, %arg17: memref<32x128xbf16, #tpu.memory_space<vmem>>, %arg18: memref<1x128xf32, #tpu.memory_space<vmem>>, %arg19: memref<2x128xf32, #tpu.memory_space<vmem>>) attributes {dimension_semantics = [#tpu.dimension_semantics<parallel>], iteration_bounds = array<i64: 1>, scalar_prefetch = 0 : i64, scratch_operands = 0 : i64, tpu.core_type = #tpu.core_type<tc>, window_params = [{transform_indices = @transform_0, window_bounds = array<i64: 16, 4>}, {pipeline_mode = #tpu.pipeline_mode<synchronous>, transform_indices = @transform_1, window_bounds = array<i64: 8, 32>}, {pipeline_mode = #tpu.pipeline_mode<synchronous>, transform_indices = @transform_2, window_bounds = array<i64: 2, 16>}, {pipeline_mode = #tpu.pipeline_mode<synchronous>, transform_indices = @transform_3, window_bounds = array<i64: 4, 32>}, {pipeline_mode = #tpu.pipeline_mode<synchronous>, transform_indices = @transform_4, window_bounds = array<i64: 2, 32, 96>}, {pipeline_mode = #tpu.pipeline_mode<synchronous>, transform_indices = @transform_5, window_bounds = array<i64: 2, 1, 96>}, {pipeline_mode = #tpu.pipeline_mode<synchronous>, transform_indices = @transform_6, window_bounds = array<i64: 2, 32, 32>}, {pipeline_mode = #tpu.pipeline_mode<synchronous>, transform_indices = @transform_7, window_bounds = array<i64: 2, 1, 32>}, {pipeline_mode = #tpu.pipeline_mode<synchronous>, transform_indices = @transform_8, window_bounds = array<i64: 2, 1, 32>}, {pipeline_mode = #tpu.pipeline_mode<synchronous>, transform_indices = @transform_9, window_bounds = array<i64: 2, 1, 32>}, {pipeline_mode = #tpu.pipeline_mode<synchronous>, transform_indices = @transform_10, window_bounds = array<i64: 2, 32, 128>}, {pipeline_mode = #tpu.pipeline_mode<synchronous>, transform_indices = @transform_11, window_bounds = array<i64: 2, 1, 128>}, {pipeline_mode = #tpu.pipeline_mode<synchronous>, transform_indices = @transform_12, window_bounds = array<i64: 2, 128, 32>}, {pipeline_mode = #tpu.pipeline_mode<synchronous>, transform_indices = @transform_13, window_bounds = array<i64: 2, 1, 32>}, {pipeline_mode = #tpu.pipeline_mode<synchronous>, transform_indices = @transform_14, window_bounds = array<i64: 2, 1, 32>}, {pipeline_mode = #tpu.pipeline_mode<synchronous>, transform_indices = @transform_15, window_bounds = array<i64: 2, 1, 32>}, {pipeline_mode = #tpu.pipeline_mode<synchronous>, transform_indices = @transform_16, window_bounds = array<i64: 32, 128>}, {pipeline_mode = #tpu.pipeline_mode<synchronous>, transform_indices = @transform_17, window_bounds = array<i64: 1, 128>}, {transform_indices = @transform_18, window_bounds = array<i64: 2, 128>}]} {
    %c0 = arith.constant 0 : index
    %c0_0 = arith.constant 0 : index
    %0 = vector.load %arg1[%c0, %c0_0] : memref<16x4xf32, #tpu.memory_space<vmem>>, vector<16x4xf32>
    %1 = arith.truncf %0 : vector<16x4xf32> to vector<16x4xbf16>
    %c0_1 = arith.constant 0 : index
    %c0_2 = arith.constant 0 : index
    %2 = vector.load %arg4[%c0_1, %c0_2] : memref<4x32xbf16, #tpu.memory_space<vmem>>, vector<4x32xbf16>
    %cst = arith.constant dense<0.000000e+00> : vector<16x32xf32>
    %3 = tpu.matmul %1, %2, %cst {dimension_numbers = #tpu.dot_dimension_numbers<[1], [0], [0], [1], [0, 0, 1, 1], [], []>} : vector<16x4xbf16>, vector<4x32xbf16>, vector<16x32xf32> -> vector<16x32xf32>
    %4 = vector.shape_cast %3 : vector<16x32xf32> to vector<2x8x32xf32>
    %c0_3 = arith.constant 0 : index
    %c0_4 = arith.constant 0 : index
    %5 = vector.load %arg2[%c0_3, %c0_4] : memref<8x32xf32, #tpu.memory_space<vmem>>, vector<8x32xf32>
    %6 = vector.shape_cast %5 : vector<8x32xf32> to vector<1x8x32xf32>
    %7 = vector.broadcast %6 : vector<1x8x32xf32> to vector<2x8x32xf32>
    %8 = arith.addf %4, %7 : vector<2x8x32xf32>
    %9 = vector.shape_cast %8 : vector<2x8x32xf32> to vector<16x32xf32>
    %10 = arith.truncf %9 : vector<16x32xf32> to vector<16x32xbf16>
    %c0_5 = arith.constant 0 : index
    %c0_6 = arith.constant 0 : index
    %c0_7 = arith.constant 0 : index
    %11 = vector.load %arg5[%c0_5, %c0_6, %c0_7] : memref<2x32x96xbf16, #tpu.memory_space<vmem>>, vector<1x32x96xbf16>
    %12 = vector.shape_cast %11 : vector<1x32x96xbf16> to vector<32x96xbf16>
    %cst_8 = arith.constant dense<0.000000e+00> : vector<16x96xf32>
    %13 = tpu.matmul %10, %12, %cst_8 {dimension_numbers = #tpu.dot_dimension_numbers<[1], [0], [0], [1], [0, 0, 1, 1], [], []>} : vector<16x32xbf16>, vector<32x96xbf16>, vector<16x96xf32> -> vector<16x96xf32>
    %c0_9 = arith.constant 0 : index
    %c0_10 = arith.constant 0 : index
    %c0_11 = arith.constant 0 : index
    %14 = vector.load %arg6[%c0_9, %c0_10, %c0_11] : memref<2x1x96xf32, #tpu.memory_space<vmem>>, vector<1x1x96xf32>
    %15 = vector.shape_cast %14 : vector<1x1x96xf32> to vector<1x96xf32>
    %16 = vector.broadcast %15 : vector<1x96xf32> to vector<16x96xf32>
    %17 = arith.addf %13, %16 : vector<16x96xf32>
    %18 = vector.extract_strided_slice %17 {offsets = [0, 0], sizes = [16, 8], strides = [1, 1]} : vector<16x96xf32> to vector<16x8xf32>
    %19 = vector.shape_cast %18 : vector<16x8xf32> to vector<2x8x8xf32>
    %20 = vector.extract_strided_slice %17 {offsets = [0, 8], sizes = [16, 8], strides = [1, 1]} : vector<16x96xf32> to vector<16x8xf32>
    %21 = vector.shape_cast %20 : vector<16x8xf32> to vector<2x8x8xf32>
    %22 = vector.extract_strided_slice %17 {offsets = [0, 16], sizes = [16, 8], strides = [1, 1]} : vector<16x96xf32> to vector<16x8xf32>
    %23 = vector.shape_cast %22 : vector<16x8xf32> to vector<2x8x8xf32>
    %24 = vector.extract_strided_slice %17 {offsets = [0, 24], sizes = [16, 8], strides = [1, 1]} : vector<16x96xf32> to vector<16x8xf32>
    %25 = vector.shape_cast %24 : vector<16x8xf32> to vector<2x8x8xf32>
    %26 = tpu.concatenate %19, %21, %23, %25 in 0 : vector<2x8x8xf32>, vector<2x8x8xf32>, vector<2x8x8xf32>, vector<2x8x8xf32> -> vector<8x8x8xf32>
    %27 = arith.truncf %26 : vector<8x8x8xf32> to vector<8x8x8xbf16>
    %28 = vector.extract_strided_slice %17 {offsets = [0, 32], sizes = [16, 8], strides = [1, 1]} : vector<16x96xf32> to vector<16x8xf32>
    %29 = vector.shape_cast %28 : vector<16x8xf32> to vector<2x8x8xf32>
    %30 = vector.extract_strided_slice %17 {offsets = [0, 40], sizes = [16, 8], strides = [1, 1]} : vector<16x96xf32> to vector<16x8xf32>
    %31 = vector.shape_cast %30 : vector<16x8xf32> to vector<2x8x8xf32>
    %32 = vector.extract_strided_slice %17 {offsets = [0, 48], sizes = [16, 8], strides = [1, 1]} : vector<16x96xf32> to vector<16x8xf32>
    %33 = vector.shape_cast %32 : vector<16x8xf32> to vector<2x8x8xf32>
    %34 = vector.extract_strided_slice %17 {offsets = [0, 56], sizes = [16, 8], strides = [1, 1]} : vector<16x96xf32> to vector<16x8xf32>
    %35 = vector.shape_cast %34 : vector<16x8xf32> to vector<2x8x8xf32>
    %36 = tpu.concatenate %29, %31, %33, %35 in 0 : vector<2x8x8xf32>, vector<2x8x8xf32>, vector<2x8x8xf32>, vector<2x8x8xf32> -> vector<8x8x8xf32>
    %37 = arith.truncf %36 : vector<8x8x8xf32> to vector<8x8x8xbf16>
    %38 = vector.extract_strided_slice %17 {offsets = [0, 64], sizes = [16, 8], strides = [1, 1]} : vector<16x96xf32> to vector<16x8xf32>
    %39 = vector.shape_cast %38 : vector<16x8xf32> to vector<2x8x8xf32>
    %40 = vector.extract_strided_slice %17 {offsets = [0, 72], sizes = [16, 8], strides = [1, 1]} : vector<16x96xf32> to vector<16x8xf32>
    %41 = vector.shape_cast %40 : vector<16x8xf32> to vector<2x8x8xf32>
    %42 = vector.extract_strided_slice %17 {offsets = [0, 80], sizes = [16, 8], strides = [1, 1]} : vector<16x96xf32> to vector<16x8xf32>
    %43 = vector.shape_cast %42 : vector<16x8xf32> to vector<2x8x8xf32>
    %44 = vector.extract_strided_slice %17 {offsets = [0, 88], sizes = [16, 8], strides = [1, 1]} : vector<16x96xf32> to vector<16x8xf32>
    %45 = vector.shape_cast %44 : vector<16x8xf32> to vector<2x8x8xf32>
    %46 = tpu.concatenate %39, %41, %43, %45 in 0 : vector<2x8x8xf32>, vector<2x8x8xf32>, vector<2x8x8xf32>, vector<2x8x8xf32> -> vector<8x8x8xf32>
    %47 = arith.truncf %46 : vector<8x8x8xf32> to vector<8x8x8xbf16>
    "tpu.trace_start"() <{level = 10 : i32, message = "btd,bsd->bts"}> : () -> ()
    %cst_12 = arith.constant dense<0.000000e+00> : vector<8x8x8xf32>
    %48 = tpu.matmul %27, %37, %cst_12 {dimension_numbers = #tpu.dot_dimension_numbers<[2], [2], [1], [1], [0, 0, 0, 1, 1, 1], [0], [0]>} : vector<8x8x8xbf16>, vector<8x8x8xbf16>, vector<8x8x8xf32> -> vector<8x8x8xf32>
    "tpu.trace_stop"() : () -> ()
    %cst_13 = arith.constant dense<0xFF800000> : vector<8x8xf32>
    %49 = vector.multi_reduction <maximumf>, %48, %cst_13 [2] : vector<8x8x8xf32> to vector<8x8xf32>
    %50 = vector.shape_cast %49 : vector<8x8xf32> to vector<8x8x1xf32>
    %51 = vector.broadcast %50 : vector<8x8x1xf32> to vector<8x8x8xf32>
    %52 = arith.subf %48, %51 : vector<8x8x8xf32>
    %53 = math.exp %52 : vector<8x8x8xf32>
    %cst_14 = arith.constant dense<0.000000e+00> : vector<8x8xf32>
    %54 = vector.multi_reduction <add>, %53, %cst_14 [2] : vector<8x8x8xf32> to vector<8x8xf32>
    %55 = vector.shape_cast %54 : vector<8x8xf32> to vector<8x8x1xf32>
    %56 = tpu.reciprocal %55 {approx = true} : vector<8x8x1xf32> -> vector<8x8x1xf32>
    %57 = vector.broadcast %56 : vector<8x8x1xf32> to vector<8x8x8xf32>
    %58 = arith.mulf %53, %57 : vector<8x8x8xf32>
    %59 = arith.truncf %58 : vector<8x8x8xf32> to vector<8x8x8xbf16>
    "tpu.trace_start"() <{level = 10 : i32, message = "bts,bsd->btd"}> : () -> ()
    %cst_15 = arith.constant dense<0.000000e+00> : vector<8x8x8xf32>
    %60 = tpu.matmul %59, %47, %cst_15 {dimension_numbers = #tpu.dot_dimension_numbers<[2], [1], [1], [2], [0, 0, 0, 1, 1, 2], [0], [0]>} : vector<8x8x8xbf16>, vector<8x8x8xbf16>, vector<8x8x8xf32> -> vector<8x8x8xf32>
    "tpu.trace_stop"() : () -> ()
    %61 = vector.extract_strided_slice %60 {offsets = [0, 0, 0], sizes = [2, 8, 8], strides = [1, 1, 1]} : vector<8x8x8xf32> to vector<2x8x8xf32>
    %62 = vector.shape_cast %61 : vector<2x8x8xf32> to vector<16x8xf32>
    %63 = vector.extract_strided_slice %60 {offsets = [2, 0, 0], sizes = [2, 8, 8], strides = [1, 1, 1]} : vector<8x8x8xf32> to vector<2x8x8xf32>
    %64 = vector.shape_cast %63 : vector<2x8x8xf32> to vector<16x8xf32>
    %65 = vector.extract_strided_slice %60 {offsets = [4, 0, 0], sizes = [2, 8, 8], strides = [1, 1, 1]} : vector<8x8x8xf32> to vector<2x8x8xf32>
    %66 = vector.shape_cast %65 : vector<2x8x8xf32> to vector<16x8xf32>
    %67 = vector.extract_strided_slice %60 {offsets = [6, 0, 0], sizes = [2, 8, 8], strides = [1, 1, 1]} : vector<8x8x8xf32> to vector<2x8x8xf32>
    %68 = vector.shape_cast %67 : vector<2x8x8xf32> to vector<16x8xf32>
    %69 = tpu.concatenate %62, %64, %66, %68 in 1 : vector<16x8xf32>, vector<16x8xf32>, vector<16x8xf32>, vector<16x8xf32> -> vector<16x32xf32>
    %70 = arith.truncf %69 : vector<16x32xf32> to vector<16x32xbf16>
    %c0_16 = arith.constant 0 : index
    %c0_17 = arith.constant 0 : index
    %c0_18 = arith.constant 0 : index
    %71 = vector.load %arg7[%c0_16, %c0_17, %c0_18] : memref<2x32x32xbf16, #tpu.memory_space<vmem>>, vector<1x32x32xbf16>
    %72 = vector.shape_cast %71 : vector<1x32x32xbf16> to vector<32x32xbf16>
    %cst_19 = arith.constant dense<0.000000e+00> : vector<16x32xf32>
    %73 = tpu.matmul %70, %72, %cst_19 {dimension_numbers = #tpu.dot_dimension_numbers<[1], [0], [0], [1], [0, 0, 1, 1], [], []>} : vector<16x32xbf16>, vector<32x32xbf16>, vector<16x32xf32> -> vector<16x32xf32>
    %c0_20 = arith.constant 0 : index
    %c0_21 = arith.constant 0 : index
    %c0_22 = arith.constant 0 : index
    %74 = vector.load %arg8[%c0_20, %c0_21, %c0_22] : memref<2x1x32xf32, #tpu.memory_space<vmem>>, vector<1x1x32xf32>
    %75 = vector.shape_cast %74 : vector<1x1x32xf32> to vector<1x32xf32>
    %76 = vector.broadcast %75 : vector<1x32xf32> to vector<16x32xf32>
    %77 = arith.addf %73, %76 : vector<16x32xf32>
    %78 = arith.addf %9, %77 : vector<16x32xf32>
    %c0_23 = arith.constant 0 : index
    %c0_24 = arith.constant 0 : index
    %c0_25 = arith.constant 0 : index
    %79 = vector.load %arg9[%c0_23, %c0_24, %c0_25] : memref<2x1x32xf32, #tpu.memory_space<vmem>>, vector<1x1x32xf32>
    %80 = vector.shape_cast %79 : vector<1x1x32xf32> to vector<1x32xf32>
    %c0_26 = arith.constant 0 : index
    %c0_27 = arith.constant 0 : index
    %c0_28 = arith.constant 0 : index
    %81 = vector.load %arg10[%c0_26, %c0_27, %c0_28] : memref<2x1x32xf32, #tpu.memory_space<vmem>>, vector<1x1x32xf32>
    %82 = vector.shape_cast %81 : vector<1x1x32xf32> to vector<1x32xf32>
    %cst_29 = arith.constant dense<0.000000e+00> : vector<16xf32>
    %83 = vector.multi_reduction <add>, %78, %cst_29 [1] : vector<16x32xf32> to vector<16xf32>
    %84 = vector.shape_cast %83 : vector<16xf32> to vector<16x1xf32>
    %cst_30 = arith.constant 3.200000e+01 : f32
    %85 = vector.broadcast %cst_30 : f32 to vector<16x1xf32>
    %86 = arith.divf %84, %85 : vector<16x1xf32>
    %87 = vector.broadcast %86 : vector<16x1xf32> to vector<16x32xf32>
    %88 = arith.subf %78, %87 : vector<16x32xf32>
    %89 = arith.mulf %88, %88 : vector<16x32xf32>
    %cst_31 = arith.constant dense<0.000000e+00> : vector<16xf32>
    %90 = vector.multi_reduction <add>, %89, %cst_31 [1] : vector<16x32xf32> to vector<16xf32>
    %91 = vector.shape_cast %90 : vector<16xf32> to vector<16x1xf32>
    %cst_32 = arith.constant 3.200000e+01 : f32
    %92 = vector.broadcast %cst_32 : f32 to vector<16x1xf32>
    %93 = arith.divf %91, %92 : vector<16x1xf32>
    %94 = vector.broadcast %86 : vector<16x1xf32> to vector<16x32xf32>
    %95 = arith.subf %78, %94 : vector<16x32xf32>
    %cst_33 = arith.constant 9.99999974E-6 : f32
    %96 = vector.broadcast %cst_33 : f32 to vector<16x1xf32>
    %97 = arith.addf %93, %96 : vector<16x1xf32>
    %98 = math.rsqrt %97 : vector<16x1xf32>
    %99 = vector.broadcast %98 : vector<16x1xf32> to vector<16x32xf32>
    %100 = arith.mulf %95, %99 : vector<16x32xf32>
    %101 = vector.broadcast %80 : vector<1x32xf32> to vector<16x32xf32>
    %102 = arith.mulf %100, %101 : vector<16x32xf32>
    %103 = vector.broadcast %82 : vector<1x32xf32> to vector<16x32xf32>
    %104 = arith.addf %102, %103 : vector<16x32xf32>
    %105 = arith.truncf %104 : vector<16x32xf32> to vector<16x32xbf16>
    %c0_34 = arith.constant 0 : index
    %c0_35 = arith.constant 0 : index
    %c0_36 = arith.constant 0 : index
    %106 = vector.load %arg11[%c0_34, %c0_35, %c0_36] : memref<2x32x128xbf16, #tpu.memory_space<vmem>>, vector<1x32x128xbf16>
    %107 = vector.shape_cast %106 : vector<1x32x128xbf16> to vector<32x128xbf16>
    %cst_37 = arith.constant dense<0.000000e+00> : vector<16x128xf32>
    %108 = tpu.matmul %105, %107, %cst_37 {dimension_numbers = #tpu.dot_dimension_numbers<[1], [0], [0], [1], [0, 0, 1, 1], [], []>} : vector<16x32xbf16>, vector<32x128xbf16>, vector<16x128xf32> -> vector<16x128xf32>
    %c0_38 = arith.constant 0 : index
    %c0_39 = arith.constant 0 : index
    %c0_40 = arith.constant 0 : index
    %109 = vector.load %arg12[%c0_38, %c0_39, %c0_40] : memref<2x1x128xf32, #tpu.memory_space<vmem>>, vector<1x1x128xf32>
    %110 = vector.shape_cast %109 : vector<1x1x128xf32> to vector<1x128xf32>
    %111 = vector.broadcast %110 : vector<1x128xf32> to vector<16x128xf32>
    %112 = arith.addf %108, %111 : vector<16x128xf32>
    %cst_41 = arith.constant 0.000000e+00 : f32
    %113 = vector.broadcast %cst_41 : f32 to vector<16x128xf32>
    %114 = arith.maximumf %112, %113 : vector<16x128xf32>
    %115 = arith.truncf %114 : vector<16x128xf32> to vector<16x128xbf16>
    %c0_42 = arith.constant 0 : index
    %c0_43 = arith.constant 0 : index
    %c0_44 = arith.constant 0 : index
    %116 = vector.load %arg13[%c0_42, %c0_43, %c0_44] : memref<2x128x32xbf16, #tpu.memory_space<vmem>>, vector<1x128x32xbf16>
    %117 = vector.shape_cast %116 : vector<1x128x32xbf16> to vector<128x32xbf16>
    %cst_45 = arith.constant dense<0.000000e+00> : vector<16x32xf32>
    %118 = tpu.matmul %115, %117, %cst_45 {dimension_numbers = #tpu.dot_dimension_numbers<[1], [0], [0], [1], [0, 0, 1, 1], [], []>} : vector<16x128xbf16>, vector<128x32xbf16>, vector<16x32xf32> -> vector<16x32xf32>
    %c0_46 = arith.constant 0 : index
    %c0_47 = arith.constant 0 : index
    %c0_48 = arith.constant 0 : index
    %119 = vector.load %arg14[%c0_46, %c0_47, %c0_48] : memref<2x1x32xf32, #tpu.memory_space<vmem>>, vector<1x1x32xf32>
    %120 = vector.shape_cast %119 : vector<1x1x32xf32> to vector<1x32xf32>
    %121 = vector.broadcast %120 : vector<1x32xf32> to vector<16x32xf32>
    %122 = arith.addf %118, %121 : vector<16x32xf32>
    %123 = arith.addf %104, %122 : vector<16x32xf32>
    %c0_49 = arith.constant 0 : index
    %c0_50 = arith.constant 0 : index
    %c0_51 = arith.constant 0 : index
    %124 = vector.load %arg15[%c0_49, %c0_50, %c0_51] : memref<2x1x32xf32, #tpu.memory_space<vmem>>, vector<1x1x32xf32>
    %125 = vector.shape_cast %124 : vector<1x1x32xf32> to vector<1x32xf32>
    %c0_52 = arith.constant 0 : index
    %c0_53 = arith.constant 0 : index
    %c0_54 = arith.constant 0 : index
    %126 = vector.load %arg16[%c0_52, %c0_53, %c0_54] : memref<2x1x32xf32, #tpu.memory_space<vmem>>, vector<1x1x32xf32>
    %127 = vector.shape_cast %126 : vector<1x1x32xf32> to vector<1x32xf32>
    %cst_55 = arith.constant dense<0.000000e+00> : vector<16xf32>
    %128 = vector.multi_reduction <add>, %123, %cst_55 [1] : vector<16x32xf32> to vector<16xf32>
    %129 = vector.shape_cast %128 : vector<16xf32> to vector<16x1xf32>
    %cst_56 = arith.constant 3.200000e+01 : f32
    %130 = vector.broadcast %cst_56 : f32 to vector<16x1xf32>
    %131 = arith.divf %129, %130 : vector<16x1xf32>
    %132 = vector.broadcast %131 : vector<16x1xf32> to vector<16x32xf32>
    %133 = arith.subf %123, %132 : vector<16x32xf32>
    %134 = arith.mulf %133, %133 : vector<16x32xf32>
    %cst_57 = arith.constant dense<0.000000e+00> : vector<16xf32>
    %135 = vector.multi_reduction <add>, %134, %cst_57 [1] : vector<16x32xf32> to vector<16xf32>
    %136 = vector.shape_cast %135 : vector<16xf32> to vector<16x1xf32>
    %cst_58 = arith.constant 3.200000e+01 : f32
    %137 = vector.broadcast %cst_58 : f32 to vector<16x1xf32>
    %138 = arith.divf %136, %137 : vector<16x1xf32>
    %139 = vector.broadcast %131 : vector<16x1xf32> to vector<16x32xf32>
    %140 = arith.subf %123, %139 : vector<16x32xf32>
    %cst_59 = arith.constant 9.99999974E-6 : f32
    %141 = vector.broadcast %cst_59 : f32 to vector<16x1xf32>
    %142 = arith.addf %138, %141 : vector<16x1xf32>
    %143 = math.rsqrt %142 : vector<16x1xf32>
    %144 = vector.broadcast %143 : vector<16x1xf32> to vector<16x32xf32>
    %145 = arith.mulf %140, %144 : vector<16x32xf32>
    %146 = vector.broadcast %125 : vector<1x32xf32> to vector<16x32xf32>
    %147 = arith.mulf %145, %146 : vector<16x32xf32>
    %148 = vector.broadcast %127 : vector<1x32xf32> to vector<16x32xf32>
    %149 = arith.addf %147, %148 : vector<16x32xf32>
    %150 = arith.truncf %149 : vector<16x32xf32> to vector<16x32xbf16>
    %c1 = arith.constant 1 : index
    %c0_60 = arith.constant 0 : index
    %c0_61 = arith.constant 0 : index
    %151 = vector.load %arg5[%c1, %c0_60, %c0_61] : memref<2x32x96xbf16, #tpu.memory_space<vmem>>, vector<1x32x96xbf16>
    %152 = vector.shape_cast %151 : vector<1x32x96xbf16> to vector<32x96xbf16>
    %cst_62 = arith.constant dense<0.000000e+00> : vector<16x96xf32>
    %153 = tpu.matmul %150, %152, %cst_62 {dimension_numbers = #tpu.dot_dimension_numbers<[1], [0], [0], [1], [0, 0, 1, 1], [], []>} : vector<16x32xbf16>, vector<32x96xbf16>, vector<16x96xf32> -> vector<16x96xf32>
    %c1_63 = arith.constant 1 : index
    %c0_64 = arith.constant 0 : index
    %c0_65 = arith.constant 0 : index
    %154 = vector.load %arg6[%c1_63, %c0_64, %c0_65] : memref<2x1x96xf32, #tpu.memory_space<vmem>>, vector<1x1x96xf32>
    %155 = vector.shape_cast %154 : vector<1x1x96xf32> to vector<1x96xf32>
    %156 = vector.broadcast %155 : vector<1x96xf32> to vector<16x96xf32>
    %157 = arith.addf %153, %156 : vector<16x96xf32>
    %158 = vector.extract_strided_slice %157 {offsets = [0, 0], sizes = [16, 8], strides = [1, 1]} : vector<16x96xf32> to vector<16x8xf32>
    %159 = vector.shape_cast %158 : vector<16x8xf32> to vector<2x8x8xf32>
    %160 = vector.extract_strided_slice %157 {offsets = [0, 8], sizes = [16, 8], strides = [1, 1]} : vector<16x96xf32> to vector<16x8xf32>
    %161 = vector.shape_cast %160 : vector<16x8xf32> to vector<2x8x8xf32>
    %162 = vector.extract_strided_slice %157 {offsets = [0, 16], sizes = [16, 8], strides = [1, 1]} : vector<16x96xf32> to vector<16x8xf32>
    %163 = vector.shape_cast %162 : vector<16x8xf32> to vector<2x8x8xf32>
    %164 = vector.extract_strided_slice %157 {offsets = [0, 24], sizes = [16, 8], strides = [1, 1]} : vector<16x96xf32> to vector<16x8xf32>
    %165 = vector.shape_cast %164 : vector<16x8xf32> to vector<2x8x8xf32>
    %166 = tpu.concatenate %159, %161, %163, %165 in 0 : vector<2x8x8xf32>, vector<2x8x8xf32>, vector<2x8x8xf32>, vector<2x8x8xf32> -> vector<8x8x8xf32>
    %167 = arith.truncf %166 : vector<8x8x8xf32> to vector<8x8x8xbf16>
    %168 = vector.extract_strided_slice %157 {offsets = [0, 32], sizes = [16, 8], strides = [1, 1]} : vector<16x96xf32> to vector<16x8xf32>
    %169 = vector.shape_cast %168 : vector<16x8xf32> to vector<2x8x8xf32>
    %170 = vector.extract_strided_slice %157 {offsets = [0, 40], sizes = [16, 8], strides = [1, 1]} : vector<16x96xf32> to vector<16x8xf32>
    %171 = vector.shape_cast %170 : vector<16x8xf32> to vector<2x8x8xf32>
    %172 = vector.extract_strided_slice %157 {offsets = [0, 48], sizes = [16, 8], strides = [1, 1]} : vector<16x96xf32> to vector<16x8xf32>
    %173 = vector.shape_cast %172 : vector<16x8xf32> to vector<2x8x8xf32>
    %174 = vector.extract_strided_slice %157 {offsets = [0, 56], sizes = [16, 8], strides = [1, 1]} : vector<16x96xf32> to vector<16x8xf32>
    %175 = vector.shape_cast %174 : vector<16x8xf32> to vector<2x8x8xf32>
    %176 = tpu.concatenate %169, %171, %173, %175 in 0 : vector<2x8x8xf32>, vector<2x8x8xf32>, vector<2x8x8xf32>, vector<2x8x8xf32> -> vector<8x8x8xf32>
    %177 = arith.truncf %176 : vector<8x8x8xf32> to vector<8x8x8xbf16>
    %178 = vector.extract_strided_slice %157 {offsets = [0, 64], sizes = [16, 8], strides = [1, 1]} : vector<16x96xf32> to vector<16x8xf32>
    %179 = vector.shape_cast %178 : vector<16x8xf32> to vector<2x8x8xf32>
    %180 = vector.extract_strided_slice %157 {offsets = [0, 72], sizes = [16, 8], strides = [1, 1]} : vector<16x96xf32> to vector<16x8xf32>
    %181 = vector.shape_cast %180 : vector<16x8xf32> to vector<2x8x8xf32>
    %182 = vector.extract_strided_slice %157 {offsets = [0, 80], sizes = [16, 8], strides = [1, 1]} : vector<16x96xf32> to vector<16x8xf32>
    %183 = vector.shape_cast %182 : vector<16x8xf32> to vector<2x8x8xf32>
    %184 = vector.extract_strided_slice %157 {offsets = [0, 88], sizes = [16, 8], strides = [1, 1]} : vector<16x96xf32> to vector<16x8xf32>
    %185 = vector.shape_cast %184 : vector<16x8xf32> to vector<2x8x8xf32>
    %186 = tpu.concatenate %179, %181, %183, %185 in 0 : vector<2x8x8xf32>, vector<2x8x8xf32>, vector<2x8x8xf32>, vector<2x8x8xf32> -> vector<8x8x8xf32>
    %187 = arith.truncf %186 : vector<8x8x8xf32> to vector<8x8x8xbf16>
    "tpu.trace_start"() <{level = 10 : i32, message = "btd,bsd->bts"}> : () -> ()
    %cst_66 = arith.constant dense<0.000000e+00> : vector<8x8x8xf32>
    %188 = tpu.matmul %167, %177, %cst_66 {dimension_numbers = #tpu.dot_dimension_numbers<[2], [2], [1], [1], [0, 0, 0, 1, 1, 1], [0], [0]>} : vector<8x8x8xbf16>, vector<8x8x8xbf16>, vector<8x8x8xf32> -> vector<8x8x8xf32>
    "tpu.trace_stop"() : () -> ()
    %cst_67 = arith.constant dense<0xFF800000> : vector<8x8xf32>
    %189 = vector.multi_reduction <maximumf>, %188, %cst_67 [2] : vector<8x8x8xf32> to vector<8x8xf32>
    %190 = vector.shape_cast %189 : vector<8x8xf32> to vector<8x8x1xf32>
    %191 = vector.broadcast %190 : vector<8x8x1xf32> to vector<8x8x8xf32>
    %192 = arith.subf %188, %191 : vector<8x8x8xf32>
    %193 = math.exp %192 : vector<8x8x8xf32>
    %cst_68 = arith.constant dense<0.000000e+00> : vector<8x8xf32>
    %194 = vector.multi_reduction <add>, %193, %cst_68 [2] : vector<8x8x8xf32> to vector<8x8xf32>
    %195 = vector.shape_cast %194 : vector<8x8xf32> to vector<8x8x1xf32>
    %196 = tpu.reciprocal %195 {approx = true} : vector<8x8x1xf32> -> vector<8x8x1xf32>
    %197 = vector.broadcast %196 : vector<8x8x1xf32> to vector<8x8x8xf32>
    %198 = arith.mulf %193, %197 : vector<8x8x8xf32>
    %199 = arith.truncf %198 : vector<8x8x8xf32> to vector<8x8x8xbf16>
    "tpu.trace_start"() <{level = 10 : i32, message = "bts,bsd->btd"}> : () -> ()
    %cst_69 = arith.constant dense<0.000000e+00> : vector<8x8x8xf32>
    %200 = tpu.matmul %199, %187, %cst_69 {dimension_numbers = #tpu.dot_dimension_numbers<[2], [1], [1], [2], [0, 0, 0, 1, 1, 2], [0], [0]>} : vector<8x8x8xbf16>, vector<8x8x8xbf16>, vector<8x8x8xf32> -> vector<8x8x8xf32>
    "tpu.trace_stop"() : () -> ()
    %201 = vector.extract_strided_slice %200 {offsets = [0, 0, 0], sizes = [2, 8, 8], strides = [1, 1, 1]} : vector<8x8x8xf32> to vector<2x8x8xf32>
    %202 = vector.shape_cast %201 : vector<2x8x8xf32> to vector<16x8xf32>
    %203 = vector.extract_strided_slice %200 {offsets = [2, 0, 0], sizes = [2, 8, 8], strides = [1, 1, 1]} : vector<8x8x8xf32> to vector<2x8x8xf32>
    %204 = vector.shape_cast %203 : vector<2x8x8xf32> to vector<16x8xf32>
    %205 = vector.extract_strided_slice %200 {offsets = [4, 0, 0], sizes = [2, 8, 8], strides = [1, 1, 1]} : vector<8x8x8xf32> to vector<2x8x8xf32>
    %206 = vector.shape_cast %205 : vector<2x8x8xf32> to vector<16x8xf32>
    %207 = vector.extract_strided_slice %200 {offsets = [6, 0, 0], sizes = [2, 8, 8], strides = [1, 1, 1]} : vector<8x8x8xf32> to vector<2x8x8xf32>
    %208 = vector.shape_cast %207 : vector<2x8x8xf32> to vector<16x8xf32>
    %209 = tpu.concatenate %202, %204, %206, %208 in 1 : vector<16x8xf32>, vector<16x8xf32>, vector<16x8xf32>, vector<16x8xf32> -> vector<16x32xf32>
    %210 = arith.truncf %209 : vector<16x32xf32> to vector<16x32xbf16>
    %c1_70 = arith.constant 1 : index
    %c0_71 = arith.constant 0 : index
    %c0_72 = arith.constant 0 : index
    %211 = vector.load %arg7[%c1_70, %c0_71, %c0_72] : memref<2x32x32xbf16, #tpu.memory_space<vmem>>, vector<1x32x32xbf16>
    %212 = vector.shape_cast %211 : vector<1x32x32xbf16> to vector<32x32xbf16>
    %cst_73 = arith.constant dense<0.000000e+00> : vector<16x32xf32>
    %213 = tpu.matmul %210, %212, %cst_73 {dimension_numbers = #tpu.dot_dimension_numbers<[1], [0], [0], [1], [0, 0, 1, 1], [], []>} : vector<16x32xbf16>, vector<32x32xbf16>, vector<16x32xf32> -> vector<16x32xf32>
    %c1_74 = arith.constant 1 : index
    %c0_75 = arith.constant 0 : index
    %c0_76 = arith.constant 0 : index
    %214 = vector.load %arg8[%c1_74, %c0_75, %c0_76] : memref<2x1x32xf32, #tpu.memory_space<vmem>>, vector<1x1x32xf32>
    %215 = vector.shape_cast %214 : vector<1x1x32xf32> to vector<1x32xf32>
    %216 = vector.broadcast %215 : vector<1x32xf32> to vector<16x32xf32>
    %217 = arith.addf %213, %216 : vector<16x32xf32>
    %218 = arith.addf %149, %217 : vector<16x32xf32>
    %c1_77 = arith.constant 1 : index
    %c0_78 = arith.constant 0 : index
    %c0_79 = arith.constant 0 : index
    %219 = vector.load %arg9[%c1_77, %c0_78, %c0_79] : memref<2x1x32xf32, #tpu.memory_space<vmem>>, vector<1x1x32xf32>
    %220 = vector.shape_cast %219 : vector<1x1x32xf32> to vector<1x32xf32>
    %c1_80 = arith.constant 1 : index
    %c0_81 = arith.constant 0 : index
    %c0_82 = arith.constant 0 : index
    %221 = vector.load %arg10[%c1_80, %c0_81, %c0_82] : memref<2x1x32xf32, #tpu.memory_space<vmem>>, vector<1x1x32xf32>
    %222 = vector.shape_cast %221 : vector<1x1x32xf32> to vector<1x32xf32>
    %cst_83 = arith.constant dense<0.000000e+00> : vector<16xf32>
    %223 = vector.multi_reduction <add>, %218, %cst_83 [1] : vector<16x32xf32> to vector<16xf32>
    %224 = vector.shape_cast %223 : vector<16xf32> to vector<16x1xf32>
    %cst_84 = arith.constant 3.200000e+01 : f32
    %225 = vector.broadcast %cst_84 : f32 to vector<16x1xf32>
    %226 = arith.divf %224, %225 : vector<16x1xf32>
    %227 = vector.broadcast %226 : vector<16x1xf32> to vector<16x32xf32>
    %228 = arith.subf %218, %227 : vector<16x32xf32>
    %229 = arith.mulf %228, %228 : vector<16x32xf32>
    %cst_85 = arith.constant dense<0.000000e+00> : vector<16xf32>
    %230 = vector.multi_reduction <add>, %229, %cst_85 [1] : vector<16x32xf32> to vector<16xf32>
    %231 = vector.shape_cast %230 : vector<16xf32> to vector<16x1xf32>
    %cst_86 = arith.constant 3.200000e+01 : f32
    %232 = vector.broadcast %cst_86 : f32 to vector<16x1xf32>
    %233 = arith.divf %231, %232 : vector<16x1xf32>
    %234 = vector.broadcast %226 : vector<16x1xf32> to vector<16x32xf32>
    %235 = arith.subf %218, %234 : vector<16x32xf32>
    %cst_87 = arith.constant 9.99999974E-6 : f32
    %236 = vector.broadcast %cst_87 : f32 to vector<16x1xf32>
    %237 = arith.addf %233, %236 : vector<16x1xf32>
    %238 = math.rsqrt %237 : vector<16x1xf32>
    %239 = vector.broadcast %238 : vector<16x1xf32> to vector<16x32xf32>
    %240 = arith.mulf %235, %239 : vector<16x32xf32>
    %241 = vector.broadcast %220 : vector<1x32xf32> to vector<16x32xf32>
    %242 = arith.mulf %240, %241 : vector<16x32xf32>
    %243 = vector.broadcast %222 : vector<1x32xf32> to vector<16x32xf32>
    %244 = arith.addf %242, %243 : vector<16x32xf32>
    %245 = arith.truncf %244 : vector<16x32xf32> to vector<16x32xbf16>
    %c1_88 = arith.constant 1 : index
    %c0_89 = arith.constant 0 : index
    %c0_90 = arith.constant 0 : index
    %246 = vector.load %arg11[%c1_88, %c0_89, %c0_90] : memref<2x32x128xbf16, #tpu.memory_space<vmem>>, vector<1x32x128xbf16>
    %247 = vector.shape_cast %246 : vector<1x32x128xbf16> to vector<32x128xbf16>
    %cst_91 = arith.constant dense<0.000000e+00> : vector<16x128xf32>
    %248 = tpu.matmul %245, %247, %cst_91 {dimension_numbers = #tpu.dot_dimension_numbers<[1], [0], [0], [1], [0, 0, 1, 1], [], []>} : vector<16x32xbf16>, vector<32x128xbf16>, vector<16x128xf32> -> vector<16x128xf32>
    %c1_92 = arith.constant 1 : index
    %c0_93 = arith.constant 0 : index
    %c0_94 = arith.constant 0 : index
    %249 = vector.load %arg12[%c1_92, %c0_93, %c0_94] : memref<2x1x128xf32, #tpu.memory_space<vmem>>, vector<1x1x128xf32>
    %250 = vector.shape_cast %249 : vector<1x1x128xf32> to vector<1x128xf32>
    %251 = vector.broadcast %250 : vector<1x128xf32> to vector<16x128xf32>
    %252 = arith.addf %248, %251 : vector<16x128xf32>
    %cst_95 = arith.constant 0.000000e+00 : f32
    %253 = vector.broadcast %cst_95 : f32 to vector<16x128xf32>
    %254 = arith.maximumf %252, %253 : vector<16x128xf32>
    %255 = arith.truncf %254 : vector<16x128xf32> to vector<16x128xbf16>
    %c1_96 = arith.constant 1 : index
    %c0_97 = arith.constant 0 : index
    %c0_98 = arith.constant 0 : index
    %256 = vector.load %arg13[%c1_96, %c0_97, %c0_98] : memref<2x128x32xbf16, #tpu.memory_space<vmem>>, vector<1x128x32xbf16>
    %257 = vector.shape_cast %256 : vector<1x128x32xbf16> to vector<128x32xbf16>
    %cst_99 = arith.constant dense<0.000000e+00> : vector<16x32xf32>
    %258 = tpu.matmul %255, %257, %cst_99 {dimension_numbers = #tpu.dot_dimension_numbers<[1], [0], [0], [1], [0, 0, 1, 1], [], []>} : vector<16x128xbf16>, vector<128x32xbf16>, vector<16x32xf32> -> vector<16x32xf32>
    %c1_100 = arith.constant 1 : index
    %c0_101 = arith.constant 0 : index
    %c0_102 = arith.constant 0 : index
    %259 = vector.load %arg14[%c1_100, %c0_101, %c0_102] : memref<2x1x32xf32, #tpu.memory_space<vmem>>, vector<1x1x32xf32>
    %260 = vector.shape_cast %259 : vector<1x1x32xf32> to vector<1x32xf32>
    %261 = vector.broadcast %260 : vector<1x32xf32> to vector<16x32xf32>
    %262 = arith.addf %258, %261 : vector<16x32xf32>
    %263 = arith.addf %244, %262 : vector<16x32xf32>
    %c1_103 = arith.constant 1 : index
    %c0_104 = arith.constant 0 : index
    %c0_105 = arith.constant 0 : index
    %264 = vector.load %arg15[%c1_103, %c0_104, %c0_105] : memref<2x1x32xf32, #tpu.memory_space<vmem>>, vector<1x1x32xf32>
    %265 = vector.shape_cast %264 : vector<1x1x32xf32> to vector<1x32xf32>
    %c1_106 = arith.constant 1 : index
    %c0_107 = arith.constant 0 : index
    %c0_108 = arith.constant 0 : index
    %266 = vector.load %arg16[%c1_106, %c0_107, %c0_108] : memref<2x1x32xf32, #tpu.memory_space<vmem>>, vector<1x1x32xf32>
    %267 = vector.shape_cast %266 : vector<1x1x32xf32> to vector<1x32xf32>
    %cst_109 = arith.constant dense<0.000000e+00> : vector<16xf32>
    %268 = vector.multi_reduction <add>, %263, %cst_109 [1] : vector<16x32xf32> to vector<16xf32>
    %269 = vector.shape_cast %268 : vector<16xf32> to vector<16x1xf32>
    %cst_110 = arith.constant 3.200000e+01 : f32
    %270 = vector.broadcast %cst_110 : f32 to vector<16x1xf32>
    %271 = arith.divf %269, %270 : vector<16x1xf32>
    %272 = vector.broadcast %271 : vector<16x1xf32> to vector<16x32xf32>
    %273 = arith.subf %263, %272 : vector<16x32xf32>
    %274 = arith.mulf %273, %273 : vector<16x32xf32>
    %cst_111 = arith.constant dense<0.000000e+00> : vector<16xf32>
    %275 = vector.multi_reduction <add>, %274, %cst_111 [1] : vector<16x32xf32> to vector<16xf32>
    %276 = vector.shape_cast %275 : vector<16xf32> to vector<16x1xf32>
    %cst_112 = arith.constant 3.200000e+01 : f32
    %277 = vector.broadcast %cst_112 : f32 to vector<16x1xf32>
    %278 = arith.divf %276, %277 : vector<16x1xf32>
    %279 = vector.broadcast %271 : vector<16x1xf32> to vector<16x32xf32>
    %280 = arith.subf %263, %279 : vector<16x32xf32>
    %cst_113 = arith.constant 9.99999974E-6 : f32
    %281 = vector.broadcast %cst_113 : f32 to vector<16x1xf32>
    %282 = arith.addf %278, %281 : vector<16x1xf32>
    %283 = math.rsqrt %282 : vector<16x1xf32>
    %284 = vector.broadcast %283 : vector<16x1xf32> to vector<16x32xf32>
    %285 = arith.mulf %280, %284 : vector<16x32xf32>
    %286 = vector.broadcast %265 : vector<1x32xf32> to vector<16x32xf32>
    %287 = arith.mulf %285, %286 : vector<16x32xf32>
    %288 = vector.broadcast %267 : vector<1x32xf32> to vector<16x32xf32>
    %289 = arith.addf %287, %288 : vector<16x32xf32>
    %c0_114 = arith.constant 0 : index
    %c0_115 = arith.constant 0 : index
    %290 = vector.load %arg3[%c0_114, %c0_115] : memref<2x16xbf16, #tpu.memory_space<vmem>>, vector<2x16xbf16>
    %291 = arith.truncf %289 : vector<16x32xf32> to vector<16x32xbf16>
    %cst_116 = arith.constant dense<0.000000e+00> : vector<2x32xf32>
    %292 = tpu.matmul %290, %291, %cst_116 {dimension_numbers = #tpu.dot_dimension_numbers<[1], [0], [0], [1], [0, 0, 1, 1], [], []>} : vector<2x16xbf16>, vector<16x32xbf16>, vector<2x32xf32> -> vector<2x32xf32>
    %293 = arith.truncf %292 : vector<2x32xf32> to vector<2x32xbf16>
    %c0_117 = arith.constant 0 : index
    %c0_118 = arith.constant 0 : index
    %294 = vector.load %arg17[%c0_117, %c0_118] : memref<32x128xbf16, #tpu.memory_space<vmem>>, vector<32x128xbf16>
    %cst_119 = arith.constant dense<0.000000e+00> : vector<2x128xf32>
    %295 = tpu.matmul %293, %294, %cst_119 {dimension_numbers = #tpu.dot_dimension_numbers<[1], [0], [0], [1], [0, 0, 1, 1], [], []>} : vector<2x32xbf16>, vector<32x128xbf16>, vector<2x128xf32> -> vector<2x128xf32>
    %c0_120 = arith.constant 0 : index
    %c0_121 = arith.constant 0 : index
    %296 = vector.load %arg18[%c0_120, %c0_121] : memref<1x128xf32, #tpu.memory_space<vmem>>, vector<1x128xf32>
    %297 = vector.broadcast %296 : vector<1x128xf32> to vector<2x128xf32>
    %298 = arith.addf %295, %297 : vector<2x128xf32>
    %c0_122 = arith.constant 0 : index
    %c0_123 = arith.constant 0 : index
    %299 = vector.load %arg19[%c0_122, %c0_123] : memref<2x128xf32, #tpu.memory_space<vmem>>, vector<2x128xf32>
    tpu.vector_store %arg19[%c0_122, %c0_123], %298 {strides = array<i32>} : memref<2x128xf32, #tpu.memory_space<vmem>>, vector<2x128xf32>,
    return
  }
  func.func @transform_0(%arg0: i32) -> (i32, i32) {
    %c0_i32 = arith.constant 0 : i32
    %c0_i32_0 = arith.constant 0 : i32
    return %arg0, %c0_i32 : i32, i32
  }
  func.func @transform_1(%arg0: i32) -> (i32, i32) {
    %c0_i32 = arith.constant 0 : i32
    %c0_i32_0 = arith.constant 0 : i32
    %c0_i32_1 = arith.constant 0 : i32
    return %c0_i32, %c0_i32_0 : i32, i32
  }
  func.func @transform_2(%arg0: i32) -> (i32, i32) {
    %c0_i32 = arith.constant 0 : i32
    %c0_i32_0 = arith.constant 0 : i32
    %c0_i32_1 = arith.constant 0 : i32
    return %c0_i32, %c0_i32_0 : i32, i32
  }
  func.func @transform_3(%arg0: i32) -> (i32, i32) {
    %c0_i32 = arith.constant 0 : i32
    %c0_i32_0 = arith.constant 0 : i32
    %c0_i32_1 = arith.constant 0 : i32
    return %c0_i32, %c0_i32_0 : i32, i32
  }
  func.func @transform_4(%arg0: i32) -> (i32, i32, i32) {
    %c0_i32 = arith.constant 0 : i32
    %c0_i32_0 = arith.constant 0 : i32
    %c0_i32_1 = arith.constant 0 : i32
    %c0_i32_2 = arith.constant 0 : i32
    return %c0_i32, %c0_i32_0, %c0_i32_1 : i32, i32, i32
  }
  func.func @transform_5(%arg0: i32) -> (i32, i32, i32) {
    %c0_i32 = arith.constant 0 : i32
    %c0_i32_0 = arith.constant 0 : i32
    %c0_i32_1 = arith.constant 0 : i32
    %c0_i32_2 = arith.constant 0 : i32
    return %c0_i32, %c0_i32_0, %c0_i32_1 : i32, i32, i32
  }
  func.func @transform_6(%arg0: i32) -> (i32, i32, i32) {
    %c0_i32 = arith.constant 0 : i32
    %c0_i32_0 = arith.constant 0 : i32
    %c0_i32_1 = arith.constant 0 : i32
    %c0_i32_2 = arith.constant 0 : i32
    return %c0_i32, %c0_i32_0, %c0_i32_1 : i32, i32, i32
  }
  func.func @transform_7(%arg0: i32) -> (i32, i32, i32) {
    %c0_i32 = arith.constant 0 : i32
    %c0_i32_0 = arith.constant 0 : i32
    %c0_i32_1 = arith.constant 0 : i32
    %c0_i32_2 = arith.constant 0 : i32
    return %c0_i32, %c0_i32_0, %c0_i32_1 : i32, i32, i32
  }
  func.func @transform_8(%arg0: i32) -> (i32, i32, i32) {
    %c0_i32 = arith.constant 0 : i32
    %c0_i32_0 = arith.constant 0 : i32
    %c0_i32_1 = arith.constant 0 : i32
    %c0_i32_2 = arith.constant 0 : i32
    return %c0_i32, %c0_i32_0, %c0_i32_1 : i32, i32, i32
  }
  func.func @transform_9(%arg0: i32) -> (i32, i32, i32) {
    %c0_i32 = arith.constant 0 : i32
    %c0_i32_0 = arith.constant 0 : i32
    %c0_i32_1 = arith.constant 0 : i32
    %c0_i32_2 = arith.constant 0 : i32
    return %c0_i32, %c0_i32_0, %c0_i32_1 : i32, i32, i32
  }
  func.func @transform_10(%arg0: i32) -> (i32, i32, i32) {
    %c0_i32 = arith.constant 0 : i32
    %c0_i32_0 = arith.constant 0 : i32
    %c0_i32_1 = arith.constant 0 : i32
    %c0_i32_2 = arith.constant 0 : i32
    return %c0_i32, %c0_i32_0, %c0_i32_1 : i32, i32, i32
  }
  func.func @transform_11(%arg0: i32) -> (i32, i32, i32) {
    %c0_i32 = arith.constant 0 : i32
    %c0_i32_0 = arith.constant 0 : i32
    %c0_i32_1 = arith.constant 0 : i32
    %c0_i32_2 = arith.constant 0 : i32
    return %c0_i32, %c0_i32_0, %c0_i32_1 : i32, i32, i32
  }
  func.func @transform_12(%arg0: i32) -> (i32, i32, i32) {
    %c0_i32 = arith.constant 0 : i32
    %c0_i32_0 = arith.constant 0 : i32
    %c0_i32_1 = arith.constant 0 : i32
    %c0_i32_2 = arith.constant 0 : i32
    return %c0_i32, %c0_i32_0, %c0_i32_1 : i32, i32, i32
  }
  func.func @transform_13(%arg0: i32) -> (i32, i32, i32) {
    %c0_i32 = arith.constant 0 : i32
    %c0_i32_0 = arith.constant 0 : i32
    %c0_i32_1 = arith.constant 0 : i32
    %c0_i32_2 = arith.constant 0 : i32
    return %c0_i32, %c0_i32_0, %c0_i32_1 : i32, i32, i32
  }
  func.func @transform_14(%arg0: i32) -> (i32, i32, i32) {
    %c0_i32 = arith.constant 0 : i32
    %c0_i32_0 = arith.constant 0 : i32
    %c0_i32_1 = arith.constant 0 : i32
    %c0_i32_2 = arith.constant 0 : i32
    return %c0_i32, %c0_i32_0, %c0_i32_1 : i32, i32, i32
  }
  func.func @transform_15(%arg0: i32) -> (i32, i32, i32) {
    %c0_i32 = arith.constant 0 : i32
    %c0_i32_0 = arith.constant 0 : i32
    %c0_i32_1 = arith.constant 0 : i32
    %c0_i32_2 = arith.constant 0 : i32
    return %c0_i32, %c0_i32_0, %c0_i32_1 : i32, i32, i32
  }
  func.func @transform_16(%arg0: i32) -> (i32, i32) {
    %c0_i32 = arith.constant 0 : i32
    %c0_i32_0 = arith.constant 0 : i32
    %c0_i32_1 = arith.constant 0 : i32
    return %c0_i32, %c0_i32_0 : i32, i32
  }
  func.func @transform_17(%arg0: i32) -> (i32, i32) {
    %c0_i32 = arith.constant 0 : i32
    %c0_i32_0 = arith.constant 0 : i32
    %c0_i32_1 = arith.constant 0 : i32
    return %c0_i32, %c0_i32_0 : i32, i32
  }
  func.func @transform_18(%arg0: i32) -> (i32, i32) {
    %c0_i32 = arith.constant 0 : i32
    %c0_i32_0 = arith.constant 0 : i32
    return %arg0, %c0_i32 : i32, i32
  }
}

</mosaic_0001>

<bundles_post_ra>
// kernel: tpu_custom_call.1
= control target key start
LH: loop header
LB: loop body
LE: loop exit
PB: predicated region body
PF: predicated region fallthrough
CT: control target
= control target key end

     0   :  { %s2807_s0 = inlined_call_operand.vmem [shape: f32[16,4], index: 0, kind: input, shape index: {}]   ;;  %s2808_s1 = inlined_call_operand.vmem [shape: f32[8,32], index: 1, kind: input, shape index: {}]   ;;  %s2809_s2 = inlined_call_operand.vmem [shape: bf16[2,16], index: 2, kind: input, shape index: {}]   ;;  %s2810_s3 = inlined_call_operand.vmem [shape: bf16[4,32], index: 3, kind: input, shape index: {}]   ;;  %s2811_s4 = inlined_call_operand.vmem [shape: bf16[2,32,96], index: 4, kind: input, shape index: {}]   ;;  %s2812_s5 = inlined_call_operand.vmem [shape: f32[2,1,96], index: 5, kind: input, shape index: {}]   ;;  %s2813_s6 = inlined_call_operand.vmem [shape: bf16[2,32,32], index: 6, kind: input, shape index: {}]   ;;  %s2814_s7 = inlined_call_operand.vmem [shape: f32[2,1,32], index: 7, kind: input, shape index: {}]   ;;  %s2815_s8 = inlined_call_operand.vmem [shape: f32[2,1,32], index: 8, kind: input, shape index: {}]   ;;  %s2816_s9 = inlined_call_operand.vmem [shape: f32[2,1,32], index: 9, kind: input, shape index: {}]   ;;  %s2817_s10 = inlined_call_operand.vmem [shape: bf16[2,32,128], index: 10, kind: input, shape index: {}]   ;;  %s2818_s11 = inlined_call_operand.vmem [shape: f32[2,1,128], index: 11, kind: input, shape index: {}]   ;;  %s2819_s12 = inlined_call_operand.vmem [shape: bf16[2,128,32], index: 12, kind: input, shape index: {}]   ;;  %s2820_s13 = inlined_call_operand.vmem [shape: f32[2,1,32], index: 13, kind: input, shape index: {}]   ;;  %s2821_s14 = inlined_call_operand.vmem [shape: f32[2,1,32], index: 14, kind: input, shape index: {}]   ;;  %s2822_s15 = inlined_call_operand.vmem [shape: f32[2,1,32], index: 15, kind: input, shape index: {}]   ;;  %s2823_s16 = inlined_call_operand.vmem [shape: bf16[32,128], index: 16, kind: input, shape index: {}]   ;;  %s2824_s17 = inlined_call_operand.vmem [shape: f32[1,128], index: 17, kind: input, shape index: {}]   ;;  %s2825_s18 = inlined_call_operand.hbm [shape: f32[2,128], index: 18, kind: output, shape index: {}]  }
   0x1   :  { %2828 = sst [smem:[#allocation5_spill]] %s2807_s0 }
   0x2   :  { %2829 = sst [smem:[#allocation6_spill]] %s2808_s1 }
   0x3   :  { %2830 = sst [smem:[#allocation7_spill]] %s2809_s2 }
   0x4   :  { %v64_v0 = vld [vmem:[%s2810_s3] sm:$0x3]  ;;  %vm69_vm0 = vcmask 1041408   ;;  %s2831_s0 = sld [smem:[#allocation5_spill]]  ;;  %vm65_vm1 = vcmask 31744  }
   0x5   :  { %v71_v3 = vsel %vm69_vm0, %v64_v0, 0 }
   0x6   :  { %80 = vmatpush.bf16.msra.mxu0 %v71_v3 }
   0xa   :  { %v61_v1 = vld [vmem:[%s2831_s0] sm:$0xff]  ;;  %v62_v2 = vld [vmem:[%s2831_s0 + $0x8] sm:$0xff] }
   0xb   :  { %v63_v4 = vpack.c.bf16 %v62_v2, %v61_v1 }
   0xd   :  { %1844 = vmatmul.msk.bf16.vlgmr.msra.gmra.mxu0 %vm65_vm1, %v63_v4 }
   0xe   :  { %23 = vsyncpa [#allocation3], 0  ;;  %v2042_v5 = vld [vmem:[%s2811_s4 + $0x8] sm:$0xff]  ;;  %v2041_v6 = vld [vmem:[%s2811_s4] sm:$0xff]  ;;  %s2832_s24 = sld [smem:[#allocation6_spill]]  ;;  %vm111_vm2 = vcmask 261120  }
   0xf   :  { %121 = vmatpush.bf16.msrb.mxu0 %v2042_v5  ;;  %v2126_v14 = vld [vmem:[%s2812_s5] ss:$0 sm:$0xff]  ;;  %s2251_s27 = smov 104   ;;  %s2252_s28 = smov 120   ;;  %vm162_vm3 = vcmask 64512   ;;  %vm451_vm4 = vcmask 1043456  }
  0x10   :  { %s2253_s29 = smov 96   ;;  %s2254_s30 = smov 112   ;;  %vm641_vm5 = vcmask 130048   ;;  %vm644_vm6 = vcmask 195584  }
  0x11   :  { %s2255_s0 = smov 64   ;;  %s2256_s19 = smov 8  }
  0x12   :  { %s2827_s1 = smov 24   ;;  %s2258_s20 = smov 16  }
  0x13   :  { %122 = vmatpush.bf16.msrb.mxu0 %v2041_v6  ;;  %s2260_s21 = smov [#allocation2]  }
  0x14   :  { %v87_v8 = vld [vmem:[%s2832_s24] sm:$0xff]  ;;  %s2834_s24 = sld [smem:[#allocation7_spill]] }
  0x8a   :  { %v82_v7 = vpop.f32.mrf.mxu0 }
  0x8b   :  { %v2374_v10 = vadd.f32 %v87_v8, %v82_v7 }
  0x92   :  { %v84_v9 = vpop.f32.mrf.mxu0 }
  0x93   :  { %v2376_v11 = vadd.f32 %v87_v8, %v84_v9 }
  0x95   :  { %v90_v12 = vpack.c.bf16 %v2376_v11, %v2374_v10 }
  0x97   :  { %1853 = vmatmul.msk.bf16.vlgmr.msrb.gmra.mxu0 %vm111_vm2, %v90_v12 }
 0x114   :  { %v124_v13 = vpop.f32.mrf.mxu0 }
 0x115   :  { %v125_v15 = vadd.f32 %v2126_v14, %v124_v13 }
 0x117   :  { %v149_v20 = vpack.c.bf16 %v125_v15, %v125_v15 }
 0x119   :  { %v158_v23 = vunpack.c.l.b16 %v149_v20 }
 0x11b   :  { %v159_v24 = vpack.c.b16 %v158_v23, %v158_v23 }
 0x11c   :  { %v126_v16 = vpop.f32.mrf.mxu0 }
 0x11d   :  { %v127_v17 = vadd.f32 %v2126_v14, %v126_v16 }
 0x11f   :  { %v2091_v18 = vpack.i.bf16 %v127_v17, %v125_v15  ;;  %v150_v19 = vpack.c.bf16 %v127_v17, %v127_v17 }
 0x121   :  { %2092 = vrot.lane.b32.xlu1 %v2091_v18, %s2251_s27  ;;  %2082 = vrot.lane.b32.xlu0 %v2091_v18, %s2252_s28  ;;  %v183_v21 = vunpack.c.l.b16 %v150_v19 }
 0x123   :  { %v184_v22 = vpack.c.b16 %v183_v21, %v183_v21 }
 0x125   :  { %185 = vrot.lane.b32.xlu2 %v184_v22, %s2253_s29 }
 0x129   :  { %2087 = vrot.lane.b32.xlu0 %v2091_v18, %s2254_s30  ;;  %160 = vrot.lane.b32.xlu1 %v159_v24, %s2253_s29 }
 0x17f   :  { %v186_v25 = vpop.permute.xlu2 %185 }
 0x180   :  { %v191_v26 = vsel %vm162_vm3, %v186_v25, 0 }
 0x181   :  { %200 = vmatpush.bf16.xpose.msra.mxu3 %v191_v26 }
 0x188   :  { %1855 = vmatmul.msk.bf16.vlgmr.msra.gmra.mxu3 %vm162_vm3, %v150_v19 }
 0x193   :  { %v2093_v27 = vpop.permute.xlu1 %2092  ;;  %v2083_v28 = vpop.permute.xlu0 %2082 }
 0x194   :  { %v2085_v29 = vunpack.i.h.bf16 %v2083_v28  ;;  %v2084_v30 = vunpack.i.l.bf16 %v2083_v28  ;;  %v2094_v31 = vunpack.i.l.bf16 %v2093_v27  ;;  %v2095_v47 = vunpack.i.h.bf16 %v2093_v27 }
 0x196   :  { %v152_v32 = vpack.c.bf16 %v2085_v29, %v2085_v29  ;;  %v151_v33 = vpack.c.bf16 %v2084_v30, %v2084_v30  ;;  %v155_v36 = vpack.c.bf16 %v2094_v31, %v2094_v31  ;;  %v156_v53 = vpack.c.bf16 %v2095_v47, %v2095_v47 }
 0x198   :  { %v231_v34 = vunpack.c.l.b16 %v152_v32  ;;  %v207_v35 = vunpack.c.l.b16 %v151_v33  ;;  %v303_v44 = vunpack.c.l.b16 %v155_v36  ;;  %v327_v54 = vunpack.c.l.b16 %v156_v53 }
 0x19a   :  { %v2391_v37 = vpack.c.b16 %v231_v34, %v231_v34  ;;  %v208_v38 = vpack.c.b16 %v207_v35, %v207_v35  ;;  %v2397_v50 = vpack.c.b16 %v303_v44, %v303_v44  ;;  %v2410_v55 = vpack.c.b16 %v327_v54, %v327_v54 }
 0x19b   :  { %v2088_v39 = vpop.permute.xlu0 %2087  ;;  %v161_v40 = vpop.permute.xlu1 %160 }
 0x19c   :  { %v2090_v41 = vunpack.i.h.bf16 %v2088_v39  ;;  %v2089_v42 = vunpack.i.l.bf16 %v2088_v39  ;;  %233 = vrot.lane.b32.xlu0 %v2391_v37, %s2253_s29  ;;  %209 = vrot.lane.b32.xlu2 %v208_v38, %s2253_s29  ;;  %v167_v43 = vsel %vm162_vm3, %v161_v40, 0 }
 0x19d   :  { %176 = vmatpush.bf16.xpose.msra.mxu2 %v167_v43 }
 0x19e   :  { %v154_v45 = vpack.c.bf16 %v2090_v41, %v2090_v41  ;;  %v153_v46 = vpack.c.bf16 %v2089_v42, %v2089_v42 }
 0x1a0   :  { %v279_v48 = vunpack.c.l.b16 %v154_v45  ;;  %v255_v49 = vunpack.c.l.b16 %v153_v46 }
 0x1a2   :  { %v2399_v51 = vpack.c.b16 %v279_v48, %v279_v48  ;;  %v2401_v52 = vpack.c.b16 %v255_v49, %v255_v49 }
 0x1a4   :  { %305 = vrot.lane.b32.xlu0 %v2397_v50, %s2253_s29  ;;  %281 = vrot.lane.b32.xlu2 %v2399_v51, %s2253_s29 }
 0x1a5   :  { %257 = vrot.lane.b32.xlu1 %v2401_v52, %s2253_s29  ;;  %1854 = vmatmul.msk.bf16.vlgmr.msra.gmra.mxu2 %vm162_vm3, %v149_v20 }
 0x1ac   :  { %468 = vrot.lane.b32.xlu2 %v184_v22, %s2255_s0 }
 0x1ad   :  { %329 = vrot.lane.b32.xlu1 %v2410_v55, %s2253_s29 }
 0x1b5   :  { %446 = vrot.lane.b32.xlu1 %v159_v24, %s2255_s0 }
 0x1f6   :  { %v210_v56 = vpop.permute.xlu2 %209 }
 0x1f7   :  { %v215_v57 = vsel %vm162_vm3, %v210_v56, 0 }
 0x1f8   :  { %224 = vmatpush.bf16.xpose.msra.mxu0 %v215_v57 }
 0x1fe   :  { %v282_v58 = vpop.permute.xlu2 %281 }
 0x1ff   :  { %1856 = vmatmul.msk.bf16.vlgmr.msra.gmra.mxu0 %vm162_vm3, %v151_v33  ;;  %v287_v59 = vsel %vm162_vm3, %v282_v58, 0 }
 0x200   :  { %296 = vmatpush.bf16.xpose.msrb.mxu3 %v287_v59 }
 0x206   :  { %v469_v60 = vpop.permute.xlu2 %468 }
 0x207   :  { %v474_v61 = vsel %vm451_vm4, %v469_v60, 0  ;;  %1859 = vmatmul.msk.bf16.vlgmr.msrb.gmra.mxu3 %vm162_vm3, %v154_v45 }
 0x208   :  { %483 = vmatpush.bf16.msra.mxu3 %v474_v61 }
 0x20b   :  { %v2421_v62 = vpop.f32.mrf.mxu3 }
 0x20c   :  { %v353_v63 = vsel %vm162_vm3, %v2421_v62, -inf }
 0x20d   :  { %354 = vmax.xlane.f32.xlu0 %v353_v63 }
 0x20e   :  { %v234_v0 = vpop.permute.xlu0 %233 }
 0x20f   :  { %v239_v1 = vsel %vm162_vm3, %v234_v0, 0 }
 0x210   :  { %248 = vmatpush.bf16.xpose.msra.mxu1 %v239_v1 }
 0x213   :  { %v204_v2 = vpop.f32.mrf.mxu3 }
 0x216   :  { %v306_v3 = vpop.permute.xlu0 %305 }
 0x217   :  { %v311_v4 = vsel %vm162_vm3, %v306_v3, 0  ;;  %v258_v5 = vpop.permute.xlu1 %257  ;;  %1857 = vmatmul.msk.bf16.vlgmr.msra.gmra.mxu1 %vm162_vm3, %v152_v32 }
 0x218   :  { %v263_v6 = vsel %vm162_vm3, %v258_v5, 0  ;;  %320 = vmatpush.bf16.xpose.msrb.mxu0 %v311_v4 }
 0x219   :  { %272 = vmatpush.bf16.xpose.msrb.mxu2 %v263_v6 }
 0x21f   :  { %v330_v7 = vpop.permute.xlu1 %329  ;;  %1860 = vmatmul.msk.bf16.vlgmr.msrb.gmra.mxu0 %vm162_vm3, %v155_v36 }
 0x220   :  { %1858 = vmatmul.msk.bf16.vlgmr.msrb.gmra.mxu2 %vm162_vm3, %v153_v46  ;;  %v335_v8 = vsel %vm162_vm3, %v330_v7, 0 }
 0x221   :  { %344 = vmatpush.bf16.xpose.msrb.mxu1 %v335_v8  ;;  %489 = vrot.lane.b32.xlu0 %v208_v38, %s2255_s0 }
 0x227   :  { %v447_v9 = vpop.permute.xlu1 %446 }
 0x228   :  { %v453_v12 = vsel %vm451_vm4, %v447_v9, 0  ;;  %v178_v13 = vpop.f32.mrf.mxu2  ;;  %1861 = vmatmul.msk.bf16.vlgmr.msrb.gmra.mxu1 %vm162_vm3, %v156_v53 }
 0x229   :  { %462 = vmatpush.bf16.msra.mxu2 %v453_v12  ;;  %v350_v14 = vsel %vm162_vm3, %v178_v13, -inf }
 0x22a   :  { %351 = vmax.xlane.f32.xlu2 %v350_v14 }
 0x230   :  { %v180_v15 = vpop.f32.mrf.mxu2 }
 0x27c   :  { %v226_v16 = vpop.f32.mrf.mxu0 }
 0x27d   :  { %v356_v17 = vsel %vm162_vm3, %v226_v16, -inf }
 0x27e   :  { %357 = vmax.xlane.f32.xlu1 %v356_v17 }
 0x280   :  { %v355_v20 = vpop.xlane.xlu0 %354 }
 0x281   :  { %v375_v41 = vsub.f32 %v2421_v62, %v355_v20 }
 0x283   :  { %v384_v42 = vmul.f32 1.442695, %v375_v41 }
 0x284   :  { %v228_v18 = vpop.f32.mrf.mxu0 }
 0x28a   :  { %v298_v19 = vpop.f32.mrf.mxu3 }
 0x28b   :  { %v365_v21 = vsel %vm162_vm3, %v298_v19, -inf }
 0x28c   :  { %366 = vmax.xlane.f32.xlu0 %v365_v21 }
 0x292   :  { %v300_v22 = vpop.f32.mrf.mxu3 }
 0x293   :  { %v490_v23 = vpop.permute.xlu0 %489 }
 0x294   :  { %v495_v24 = vsel %vm451_vm4, %v490_v23, 0  ;;  %v250_v25 = vpop.f32.mrf.mxu1 }
 0x295   :  { %504 = vmatpush.bf16.msra.mxu0 %v495_v24 }
 0x297   :  { %510 = vrot.lane.b32.xlu1 %v2391_v37, %s2255_s0  ;;  %v359_v37 = vsel %vm162_vm3, %v250_v25, -inf }
 0x29c   :  { %v252_v26 = vpop.f32.mrf.mxu1  ;;  %v2441_v27 = vpop.f32.mrf.mxu0 }
 0x29d   :  { %v352_v28 = vpop.xlane.xlu2 %351  ;;  %v368_v43 = vsel %vm162_vm3, %v2441_v27, -inf }
 0x29e   :  { %v374_v29 = vsub.f32 %v178_v13, %v352_v28 }
 0x2a0   :  { %v382_v30 = vmul.f32 1.442695, %v374_v29 }
 0x2a2   :  { %2143 = vpow2.f32 %v382_v30 }
 0x2a3   :  { %v274_v31 = vpop.f32.mrf.mxu2  ;;  %2145 = vpow2.f32 %v384_v42 }
 0x2a4   :  { %v324_v32 = vpop.f32.mrf.mxu0  ;;  %v362_v33 = vsel %vm162_vm3, %v274_v31, -inf }
 0x2a5   :  { %363 = vmax.xlane.f32.xlu2 %v362_v33  ;;  %v346_v34 = vpop.f32.mrf.mxu1 }
 0x2a6   :  { %v371_v40 = vsel %vm162_vm3, %v346_v34, -inf }
 0x2a8   :  { %v2144_v35 = vpop.eup %2143 }
 0x2a9   :  { %v398_v36 = vsel %vm162_vm3, %v2144_v35, 0.0  ;;  %v2146_v44 = vpop.eup %2145 }
 0x2aa   :  { %399 = vadd.xlane.f32.xlu0 %v398_v36  ;;  %v401_v45 = vsel %vm162_vm3, %v2146_v44, 0.0 }
 0x2ab   :  { %v276_v38 = vpop.f32.mrf.mxu2 }
 0x2ad   :  { %360 = vmax.xlane.f32.xlu2 %v359_v37  ;;  %v348_v39 = vpop.f32.mrf.mxu1 }
 0x2b5   :  { %372 = vmax.xlane.f32.xlu2 %v371_v40 }
 0x2c1   :  { %369 = vmax.xlane.f32.xlu1 %v368_v43 }
 0x2c9   :  { %402 = vadd.xlane.f32.xlu1 %v401_v45 }
 0x2cd   :  { %531 = vrot.lane.b32.xlu2 %v2401_v52, %s2255_s0 }
 0x2f1   :  { %v358_v46 = vpop.xlane.xlu1 %357 }
 0x2f2   :  { %v376_v47 = vsub.f32 %v226_v16, %v358_v46 }
 0x2f4   :  { %v386_v48 = vmul.f32 1.442695, %v376_v47 }
 0x2f6   :  { %2147 = vpow2.f32 %v386_v48 }
 0x2fc   :  { %v2148_v49 = vpop.eup %2147 }
 0x2fd   :  { %v404_v53 = vsel %vm162_vm3, %v2148_v49, 0.0 }
 0x2fe   :  { %405 = vadd.xlane.f32.xlu2 %v404_v53 }
 0x2ff   :  { %v367_v54 = vpop.xlane.xlu0 %366 }
 0x300   :  { %v379_v56 = vsub.f32 %v298_v19, %v367_v54 }
 0x302   :  { %v392_v57 = vmul.f32 1.442695, %v379_v56 }
 0x304   :  { %2149 = vpow2.f32 %v392_v57 }
 0x309   :  { %v511_v58 = vpop.permute.xlu1 %510 }
 0x30a   :  { %v2454_v59 = vpop.eup %2149  ;;  %v516_v60 = vsel %vm451_vm4, %v511_v58, 0 }
 0x30b   :  { %525 = vmatpush.bf16.msra.mxu1 %v516_v60  ;;  %v413_v52 = vsel %vm162_vm3, %v2454_v59, 0.0 }
 0x30c   :  { %414 = vadd.xlane.f32.xlu2 %v413_v52 }
 0x318   :  { %v364_v61 = vpop.xlane.xlu2 %363 }
 0x319   :  { %v378_v62 = vsub.f32 %v274_v31, %v364_v61 }
 0x31b   :  { %v390_v63 = vmul.f32 1.442695, %v378_v62 }
 0x31d   :  { %2151 = vpow2.f32 %v390_v63  ;;  %v400_v0 = vpop.xlane.xlu0 %399 }
 0x31e   :  { %2153 = vrcp.f32 %v400_v0 }
 0x320   :  { %v361_v1 = vpop.xlane.xlu2 %360 }
 0x321   :  { %v377_v2 = vsub.f32 %v250_v25, %v361_v1 }
 0x323   :  { %v2152_v3 = vpop.eup %2151  ;;  %v388_v4 = vmul.f32 1.442695, %v377_v2 }
 0x324   :  { %v2154_v5 = vpop.eup %2153  ;;  %v410_v6 = vsel %vm162_vm3, %v2152_v3, 0.0  ;;  %594 = vrot.lane.b32.xlu2 %v2410_v55, %s2255_s0 }
 0x325   :  { %v430_v7 = vmul.f32 %v2154_v5, %v2144_v35  ;;  %2155 = vpow2.f32 %v388_v4  ;;  %411 = vadd.xlane.f32.xlu0 %v410_v6 }
 0x327   :  { %v438_v8 = vpack.c.bf16 %v430_v7, %v430_v7 }
 0x328   :  { %v373_v9 = vpop.xlane.xlu2 %372 }
 0x329   :  { %v381_v12 = vsub.f32 %v346_v34, %v373_v9  ;;  %1862 = vmatmul.msk.bf16.vlgmr.msra.gmra.mxu2 %vm162_vm3, %v438_v8 }
 0x32b   :  { %v2156_v13 = vpop.eup %2155  ;;  %v396_v14 = vmul.f32 1.442695, %v381_v12 }
 0x32c   :  { %v407_v15 = vsel %vm162_vm3, %v2156_v13, 0.0 }
 0x32d   :  { %2157 = vpow2.f32 %v396_v14  ;;  %408 = vadd.xlane.f32.xlu0 %v407_v15 }
 0x330   :  { %v532_v16 = vpop.permute.xlu2 %531 }
 0x331   :  { %v537_v17 = vsel %vm451_vm4, %v532_v16, 0  ;;  %v2044_v16 = vld [vmem:[%s2813_s6 + $0x8] sm:$0xff] }
 0x332   :  { %546 = vmatpush.bf16.msrb.mxu2 %v537_v17  ;;  %v2043_v17 = vld [vmem:[%s2813_s6] sm:$0xff] }
 0x333   :  { %v2158_v18 = vpop.eup %2157 }
 0x334   :  { %v419_v55 = vsel %vm162_vm3, %v2158_v18, 0.0  ;;  %v370_v19 = vpop.xlane.xlu1 %369 }
 0x335   :  { %420 = vadd.xlane.f32.xlu0 %v419_v55  ;;  %v380_v20 = vsub.f32 %v2441_v27, %v370_v19 }
 0x336   :  { %677 = vmatpush.bf16.msra.mxu2 %v2044_v16 }
 0x337   :  { %v394_v21 = vmul.f32 1.442695, %v380_v20 }
 0x339   :  { %2159 = vpow2.f32 %v394_v21 }
 0x33a   :  { %678 = vmatpush.bf16.msra.mxu2 %v2043_v17 }
 0x33c   :  { %v403_v22 = vpop.xlane.xlu1 %402 }
 0x33d   :  { %2161 = vrcp.f32 %v403_v22 }
 0x33f   :  { %v2160_v23 = vpop.eup %2159 }
 0x340   :  { %v416_v24 = vsel %vm162_vm3, %v2160_v23, 0.0 }
 0x341   :  { %417 = vadd.xlane.f32.xlu1 %v416_v24 }
 0x343   :  { %v2162_v25 = vpop.eup %2161 }
 0x344   :  { %v431_v26 = vmul.f32 %v2162_v25, %v2146_v44 }
 0x346   :  { %v439_v28 = vpack.c.bf16 %v431_v26, %v431_v26 }
 0x348   :  { %1863 = vmatmul.msk.bf16.vlgmr.msra.gmra.mxu3 %vm162_vm3, %v439_v28 }
 0x349   :  { %573 = vrot.lane.b32.xlu0 %v2397_v50, %s2255_s0 }
 0x35a   :  { %552 = vrot.lane.b32.xlu1 %v2399_v51, %s2255_s0 }
 0x371   :  { %v406_v27 = vpop.xlane.xlu2 %405 }
 0x372   :  { %2163 = vrcp.f32 %v406_v27 }
 0x378   :  { %v2164_v29 = vpop.eup %2163 }
 0x379   :  { %v432_v30 = vmul.f32 %v2164_v29, %v2148_v49 }
 0x37b   :  { %v440_v31 = vpack.c.bf16 %v432_v30, %v432_v30 }
 0x37d   :  { %1864 = vmatmul.msk.bf16.vlgmr.msra.gmra.mxu0 %vm162_vm3, %v440_v31 }
 0x37f   :  { %v415_v32 = vpop.xlane.xlu2 %414 }
 0x387   :  { %v595_v33 = vpop.permute.xlu2 %594 }
 0x388   :  { %v600_v34 = vsel %vm451_vm4, %v595_v33, 0  ;;  %v2127_v33 = vld [vmem:[%s2814_s7] ss:$0 sm:$0xff] }
 0x389   :  { %609 = vmatpush.bf16.msrb.mxu1 %v600_v34 }
 0x398   :  { %v412_v35 = vpop.xlane.xlu0 %411 }
 0x399   :  { %2165 = vrcp.f32 %v412_v35 }
 0x39f   :  { %v2166_v36 = vpop.eup %2165 }
 0x3a0   :  { %v434_v38 = vmul.f32 %v2166_v36, %v2152_v3  ;;  %v409_v50 = vpop.xlane.xlu0 %408 }
 0x3a1   :  { %2167 = vrcp.f32 %v409_v50 }
 0x3a2   :  { %v442_v37 = vpack.c.bf16 %v434_v38, %v434_v38 }
 0x3a4   :  { %1866 = vmatmul.msk.bf16.vlgmr.msrb.gmra.mxu2 %vm162_vm3, %v442_v37 }
 0x3a7   :  { %v2168_v51 = vpop.eup %2167 }
 0x3a8   :  { %v433_v39 = vmul.f32 %v2168_v51, %v2156_v13  ;;  %v421_v41 = vpop.xlane.xlu0 %420 }
 0x3a9   :  { %2169 = vrcp.f32 %v421_v41 }
 0x3aa   :  { %v441_v40 = vpack.c.bf16 %v433_v39, %v433_v39 }
 0x3ac   :  { %v2476_v42 = vpop.f32.mrf.mxu2  ;;  %1865 = vmatmul.msk.bf16.vlgmr.msra.gmra.mxu1 %vm162_vm3, %v441_v40  ;;  %v2259_v40 = vmov 32.0  }
 0x3af   :  { %v2170_v43 = vpop.eup %2169 }
 0x3b0   :  { %v437_v46 = vmul.f32 %v2170_v43, %v2158_v18 }
 0x3b2   :  { %v445_v47 = vpack.c.bf16 %v437_v46, %v437_v46 }
 0x3b4   :  { %v466_v44 = vpop.f32.mrf.mxu2  ;;  %v418_v45 = vpop.xlane.xlu1 %417 }
 0x3b5   :  { %2171 = vrcp.f32 %v418_v45 }
 0x3b6   :  { %2173 = vrcp.f32 %v415_v32 }
 0x3b7   :  { %2175 = vrcp.f32 %v2259_v40  ;;  %v2131_v40 = vld [vmem:[%s2820_s13] ss:$0 sm:$0xff] }
 0x3bb   :  { %v2172_v48 = vpop.eup %2171  ;;  %v574_v49 = vpop.permute.xlu0 %573 }
 0x3bc   :  { %v436_v53 = vmul.f32 %v2172_v48, %v2160_v23  ;;  %v579_v54 = vsel %vm451_vm4, %v574_v49, 0  ;;  %1869 = vmatmul.msk.bf16.vlgmr.msrb.gmra.mxu1 %vm162_vm3, %v445_v47  ;;  %v2174_v57 = vpop.eup %2173 }
 0x3bd   :  { %588 = vmatpush.bf16.msrb.mxu0 %v579_v54  ;;  %v435_v58 = vmul.f32 %v2174_v57, %v2454_v59  ;;  %v2176_v41 = vpop.eup %2175 }
 0x3be   :  { %v444_v56 = vpack.c.bf16 %v436_v53, %v436_v53  ;;  %vm700_vm7 = vweird.f32 %v2176_v41 }
 0x3bf   :  { %v443_v62 = vpack.c.bf16 %v435_v58, %v435_v58 }
 0x3c0   :  { %1868 = vmatmul.msk.bf16.vlgmr.msrb.gmra.mxu0 %vm162_vm3, %v444_v56 }
 0x3cb   :  { %v485_v60 = vpop.f32.mrf.mxu3 }
 0x3cc   :  { %v553_v52 = vpop.permute.xlu1 %552 }
 0x3cd   :  { %v558_v61 = vsel %vm451_vm4, %v553_v52, 0 }
 0x3ce   :  { %567 = vmatpush.bf16.msrb.mxu3 %v558_v61 }
 0x3d1   :  { %1867 = vmatmul.msk.bf16.vlgmr.msrb.gmra.mxu3 %vm162_vm3, %v443_v62 }
 0x3d3   :  { %v487_v63 = vpop.f32.mrf.mxu3 }
 0x3d4   :  { %v2045_v63 = vld [vmem:[%s2817_s10] sm:$0xff] }
 0x3fa   :  { %v506_v0 = vpop.f32.mrf.mxu0 }
 0x402   :  { %v508_v1 = vpop.f32.mrf.mxu0 }
 0x427   :  { %v548_v2 = vpop.f32.mrf.mxu2 }
 0x429   :  { %v527_v3 = vpop.f32.mrf.mxu1 }
 0x42a   :  { %v2096_v4 = vpack.i.bf16 %v527_v3, %v506_v0  ;;  %v2054_v0 = vld [vmem:[%s2819_s12 + $0x38] sm:$0xff]  ;;  %v2053_v3 = vld [vmem:[%s2819_s12 + $0x30] sm:$0xff] }
 0x42b   :  { %859 = vmatpush.bf16.msra.mxu0 %v2054_v0 }
 0x42c   :  { %2097 = vrot.lane.b32.xlu0 %v2096_v4, %s2256_s19 }
 0x42f   :  { %v550_v5 = vpop.f32.mrf.mxu2  ;;  %860 = vmatpush.bf16.msra.mxu0 %v2053_v3 }
 0x431   :  { %v529_v6 = vpop.f32.mrf.mxu1 }
 0x439   :  { %v611_v59 = vpop.f32.mrf.mxu1 }
 0x43d   :  { %v590_v7 = vpop.f32.mrf.mxu0 }
 0x43e   :  { %v2106_v8 = vpack.i.bf16 %v611_v59, %v590_v7  ;;  %v2052_v59 = vld [vmem:[%s2819_s12 + $0x28] sm:$0xff] }
 0x43f   :  { %861 = vmatpush.bf16.msra.mxu0 %v2052_v59 }
 0x440   :  { %2107 = vrot.lane.b32.xlu2 %v2106_v8, %s2827_s1 }
 0x441   :  { %v613_v9 = vpop.f32.mrf.mxu1 }
 0x442   :  { %v2051_v9 = vld [vmem:[%s2819_s12 + $0x20] sm:$0xff] }
 0x443   :  { %862 = vmatpush.bf16.msra.mxu0 %v2051_v9 }
 0x445   :  { %v592_v12 = vpop.f32.mrf.mxu0 }
 0x454   :  { %v569_v13 = vpop.f32.mrf.mxu3 }
 0x455   :  { %v2101_v14 = vpack.i.bf16 %v569_v13, %v548_v2 }
 0x457   :  { %2102 = vrot.lane.b32.xlu1 %v2101_v14, %s2258_s20 }
 0x45c   :  { %v571_v15 = vpop.f32.mrf.mxu3 }
 0x49a   :  { %v2108_v20 = vpop.permute.xlu2 %2107 }
 0x49b   :  { %v2110_v24 = vunpack.i.h.bf16 %v2108_v20  ;;  %v2109_v25 = vunpack.i.l.bf16 %v2108_v20 }
 0x49e   :  { %v2098_v18 = vpop.permute.xlu0 %2097 }
 0x49f   :  { %v2100_v55 = vunpack.i.h.bf16 %v2098_v18  ;;  %v2099_v19 = vunpack.i.l.bf16 %v2098_v18 }
 0x4a1   :  { %v639_v26 = vsel %vm162_vm3, %v2476_v42, %v2099_v19  ;;  %v640_v28 = vsel %vm162_vm3, %v485_v60, %v2100_v55  ;;  %v696_v42 = vmul.f32 32.0, %v2176_v41  ;;  %v2046_v60 = vld [vmem:[%s2817_s10 + $0x8] sm:$0xff]  ;;  %v2128_v19 = vld [vmem:[%s2815_s8] ss:$0 sm:$0xff] }
 0x4a2   :  { %780 = vmatpush.bf16.msra.mxu3 %v2046_v60 }
 0x4a3   :  { %v697_v43 = vsub.f32 1.0, %v696_v42 }
 0x4a5   :  { %v698_v44 = vmul.f32 %v2176_v41, %v697_v43 }
 0x4a6   :  { %781 = vmatpush.bf16.msra.mxu3 %v2045_v63 }
 0x4a7   :  { %v699_v45 = vadd.f32 %v2176_v41, %v698_v44 }
 0x4a9   :  { %v2509_v46 = vsel %vm700_vm7, %v2176_v41, %v699_v45 }
 0x4c9   :  { %v2103_v21 = vpop.permute.xlu1 %2102 }
 0x4ca   :  { %v2105_v22 = vunpack.i.h.bf16 %v2103_v21  ;;  %v2104_v23 = vunpack.i.l.bf16 %v2103_v21 }
 0x4cc   :  { %v643_v27 = vsel %vm641_vm5, %v640_v28, %v2105_v22  ;;  %v642_v29 = vsel %vm641_vm5, %v639_v26, %v2104_v23  ;;  %v2129_v23 = vld [vmem:[%s2816_s9] ss:$0 sm:$0xff] }
 0x4cd   :  { %v646_v30 = vsel %vm644_vm6, %v643_v27, %v2110_v24  ;;  %v645_v31 = vsel %vm644_vm6, %v642_v29, %v2109_v25 }
 0x4ce   :  { %v647_v32 = vpack.c.bf16 %v646_v30, %v645_v31  ;;  %v2050_v30 = vld [vmem:[%s2819_s12 + $0x18] sm:$0xff]  ;;  %v2049_v31 = vld [vmem:[%s2819_s12 + $0x10] sm:$0xff] }
 0x4cf   :  { %863 = vmatpush.bf16.msra.mxu0 %v2050_v30 }
 0x4d0   :  { %1878 = vmatmul.msk.bf16.vlgmr.msra.gmra.mxu2 %vm111_vm2, %v647_v32  ;;  %v2048_v32 = vld [vmem:[%s2819_s12 + $0x8] sm:$0xff] }
 0x4d3   :  { %864 = vmatpush.bf16.msra.mxu0 %v2049_v31 }
 0x4d7   :  { %865 = vmatpush.bf16.msra.mxu0 %v2048_v32 }
 0x553   :  { %v680_v34 = vpop.f32.mrf.mxu2 }
 0x554   :  { %v681_v35 = vadd.f32 %v2127_v33, %v680_v34 }
 0x556   :  { %v685_v36 = vadd.f32 %v681_v35, %v2374_v10  ;;  %v2130_v35 = vld [vmem:[%s2818_s11] ss:$0 sm:$0xff] }
 0x558   :  { %v689_v38 = vsel %vm111_vm2, %v685_v36, 0.0 }
 0x559   :  { %690 = vadd.xlane.f32.xlu0 %v689_v38 }
 0x55b   :  { %v682_v50 = vpop.f32.mrf.mxu2 }
 0x55c   :  { %v683_v37 = vadd.f32 %v2127_v33, %v682_v50  ;;  %v2047_v33 = vld [vmem:[%s2819_s12] sm:$0xff] }
 0x55d   :  { %866 = vmatpush.bf16.msra.mxu0 %v2047_v33 }
 0x55e   :  { %v686_v51 = vadd.f32 %v683_v37, %v2376_v11 }
 0x560   :  { %v692_v39 = vsel %vm111_vm2, %v686_v51, 0.0 }
 0x561   :  { %693 = vadd.xlane.f32.xlu1 %v692_v39 }
 0x5cc   :  { %v691_v10 = vpop.xlane.xlu0 %690 }
 0x5cd   :  { %v702_v47 = vmul.f32 %v2509_v46, %v691_v10 }
 0x5cf   :  { %v704_v48 = vsub.f32 %v685_v36, %v702_v47 }
 0x5d1   :  { %v706_v49 = vmul.f32 %v704_v48, %v704_v48 }
 0x5d3   :  { %v708_v11 = vsel %vm111_vm2, %v706_v49, 0.0 }
 0x5d4   :  { %v694_v53 = vpop.xlane.xlu1 %693  ;;  %709 = vadd.xlane.f32.xlu2 %v708_v11 }
 0x5d5   :  { %v703_v54 = vmul.f32 %v2509_v46, %v694_v53 }
 0x5d7   :  { %v705_v56 = vsub.f32 %v686_v51, %v703_v54 }
 0x5d9   :  { %v707_v57 = vmul.f32 %v705_v56, %v705_v56 }
 0x5db   :  { %v711_v58 = vsel %vm111_vm2, %v707_v57, 0.0 }
 0x5dc   :  { %712 = vadd.xlane.f32.xlu0 %v711_v58 }
 0x647   :  { %v710_v52 = vpop.xlane.xlu2 %709 }
 0x648   :  { %v714_v61 = vmul.f32 %v710_v52, %v2509_v46 }
 0x64a   :  { %v716_v62 = vadd.f32 1e-05, %v714_v61 }
 0x64c   :  { %2177 = vrsqrt.f32 %v716_v62  ;;  %vm724_vm9 = vweird.f32 %v716_v62 }
 0x64f   :  { %v713_v1 = vpop.xlane.xlu0 %712 }
 0x650   :  { %v715_v2 = vmul.f32 %v713_v1, %v2509_v46 }
 0x652   :  { %v2178_v4 = vpop.eup %2177  ;;  %v717_v5 = vadd.f32 1e-05, %v715_v2  ;;  %v2055_v2 = vld [vmem:[%s2811_s4 + $0x10] sm:$0xff] }
 0x653   :  { %v719_v6 = vmul.f32 %v2178_v4, %v716_v62  ;;  %vm725_vm8 = vweird.f32 %v2178_v4  ;;  %v2056_v62 = vld [vmem:[%s2811_s4 + $0x18] sm:$0xff] }
 0x654   :  { %2179 = vrsqrt.f32 %v717_v5  ;;  %vm726_vm10 = vmor %vm724_vm9, %vm725_vm8  ;;  %vm734_vm12 = vweird.f32 %v717_v5  ;;  %963 = vmatpush.bf16.msra.mxu1 %v2056_v62 }
 0x655   :  { %v720_v7 = vmul.f32 %v2178_v4, %v719_v6 }
 0x657   :  { %v721_v8 = vmul.f32 0.5, %v720_v7 }
 0x658   :  { %964 = vmatpush.bf16.msra.mxu1 %v2055_v2 }
 0x659   :  { %v722_v12 = vsub.f32 1.5, %v721_v8 }
 0x65a   :  { %v2180_v13 = vpop.eup %2179 }
 0x65b   :  { %v723_v14 = vmul.f32 %v2178_v4, %v722_v12  ;;  %v729_v15 = vmul.f32 %v2180_v13, %v717_v5  ;;  %vm735_vm11 = vweird.f32 %v2180_v13 }
 0x65c   :  { %vm736_vm13 = vmor %vm734_vm12, %vm735_vm11 }
 0x65d   :  { %v730_v16 = vmul.f32 %v2180_v13, %v729_v15  ;;  %v727_v17 = vsel %vm726_vm10, %v2178_v4, %v723_v14 }
 0x65e   :  { %v738_v20 = vmul.f32 %v727_v17, %v704_v48 }
 0x65f   :  { %v731_v18 = vmul.f32 0.5, %v730_v16 }
 0x660   :  { %v743_v24 = vmul.f32 %v2128_v19, %v738_v20 }
 0x661   :  { %v732_v55 = vsub.f32 1.5, %v731_v18 }
 0x662   :  { %v748_v28 = vadd.f32 %v2129_v23, %v743_v24 }
 0x663   :  { %v733_v21 = vmul.f32 %v2180_v13, %v732_v55  ;;  %v2132_v55 = vld [vmem:[%s2821_s14] ss:$0 sm:$0xff] }
 0x665   :  { %v737_v22 = vsel %vm736_vm13, %v2180_v13, %v733_v21 }
 0x666   :  { %v739_v25 = vmul.f32 %v737_v22, %v705_v56  ;;  %v2133_v22 = vld [vmem:[%s2822_s15] ss:$0 sm:$0xff] }
 0x668   :  { %v744_v26 = vmul.f32 %v2128_v19, %v739_v25 }
 0x66a   :  { %v749_v27 = vadd.f32 %v2129_v23, %v744_v26 }
 0x66c   :  { %v750_v29 = vpack.c.bf16 %v749_v27, %v748_v28 }
 0x66e   :  { %1887 = vmatmul.msk.bf16.vlgmr.msra.gmra.mxu3 %vm111_vm2, %v750_v29  ;;  %v2134_v29 = vld [vmem:[%s2812_s5 + $0x1] ss:$0 sm:$0xff]  ;;  %s2833_s5 = smov 24  }
 0x6f1   :  { %v783_v34 = vpop.f32.mrf.mxu3 }
 0x6f2   :  { %v784_v36 = vadd.f32 %v2130_v35, %v783_v34 }
 0x6f4   :  { %v788_v37 = vmax.f32 %v784_v36, 0.0 }
 0x6f9   :  { %v785_v38 = vpop.f32.mrf.mxu3 }
 0x6fa   :  { %v786_v50 = vadd.f32 %v2130_v35, %v785_v38 }
 0x6fc   :  { %v789_v51 = vmax.f32 %v786_v50, 0.0 }
 0x6fe   :  { %v790_v39 = vpack.c.bf16 %v789_v51, %v788_v37 }
 0x700   :  { %867 = vmatmul.bf16.vlgmr.msra.gmra.mxu0 %v790_v39 }
 0x77d   :  { %v868_v41 = vpop.f32.mrf.mxu0 }
 0x77e   :  { %v869_v42 = vadd.f32 %v2131_v40, %v868_v41 }
 0x780   :  { %v873_v43 = vadd.f32 %v869_v42, %v748_v28 }
 0x782   :  { %v877_v44 = vsel %vm111_vm2, %v873_v43, 0.0 }
 0x783   :  { %878 = vadd.xlane.f32.xlu1 %v877_v44 }
 0x785   :  { %v870_v45 = vpop.f32.mrf.mxu0 }
 0x786   :  { %v871_v10 = vadd.f32 %v2131_v40, %v870_v45 }
 0x788   :  { %v874_v47 = vadd.f32 %v871_v10, %v749_v27 }
 0x78a   :  { %v880_v48 = vsel %vm111_vm2, %v874_v47, 0.0 }
 0x78b   :  { %881 = vadd.xlane.f32.xlu2 %v880_v48 }
 0x7f6   :  { %v879_v49 = vpop.xlane.xlu1 %878 }
 0x7f7   :  { %v883_v11 = vmul.f32 %v879_v49, %v2509_v46 }
 0x7f9   :  { %v885_v53 = vsub.f32 %v873_v43, %v883_v11 }
 0x7fb   :  { %v887_v54 = vmul.f32 %v885_v53, %v885_v53 }
 0x7fd   :  { %v889_v56 = vsel %vm111_vm2, %v887_v54, 0.0 }
 0x7fe   :  { %v882_v57 = vpop.xlane.xlu2 %881  ;;  %890 = vadd.xlane.f32.xlu0 %v889_v56 }
 0x7ff   :  { %v884_v58 = vmul.f32 %v882_v57, %v2509_v46 }
 0x801   :  { %v886_v60 = vsub.f32 %v874_v47, %v884_v58 }
 0x803   :  { %v888_v52 = vmul.f32 %v886_v60, %v886_v60 }
 0x805   :  { %v892_v61 = vsel %vm111_vm2, %v888_v52, 0.0 }
 0x806   :  { %893 = vadd.xlane.f32.xlu1 %v892_v61 }
 0x871   :  { %v891_v63 = vpop.xlane.xlu0 %890 }
 0x872   :  { %v895_v0 = vmul.f32 %v891_v63, %v2509_v46 }
 0x874   :  { %v897_v1 = vadd.f32 1e-05, %v895_v0 }
 0x876   :  { %2181 = vrsqrt.f32 %v897_v1  ;;  %vm905_vm15 = vweird.f32 %v897_v1 }
 0x879   :  { %v894_v3 = vpop.xlane.xlu1 %893 }
 0x87a   :  { %v896_v4 = vmul.f32 %v894_v3, %v2509_v46 }
 0x87c   :  { %v2182_v5 = vpop.eup %2181  ;;  %v898_v6 = vadd.f32 1e-05, %v896_v4 }
 0x87d   :  { %v900_v59 = vmul.f32 %v2182_v5, %v897_v1  ;;  %vm906_vm14 = vweird.f32 %v2182_v5 }
 0x87e   :  { %2183 = vrsqrt.f32 %v898_v6  ;;  %vm907_vm0 = vmor %vm905_vm15, %vm906_vm14  ;;  %vm915_vm7 = vweird.f32 %v898_v6 }
 0x87f   :  { %v901_v7 = vmul.f32 %v2182_v5, %v900_v59 }
 0x881   :  { %v902_v8 = vmul.f32 0.5, %v901_v7 }
 0x883   :  { %v903_v9 = vsub.f32 1.5, %v902_v8 }
 0x884   :  { %v2184_v12 = vpop.eup %2183 }
 0x885   :  { %v904_v13 = vmul.f32 %v2182_v5, %v903_v9  ;;  %v910_v14 = vmul.f32 %v2184_v12, %v898_v6  ;;  %vm916_vm1 = vweird.f32 %v2184_v12 }
 0x886   :  { %vm917_vm8 = vmor %vm915_vm7, %vm916_vm1 }
 0x887   :  { %v911_v15 = vmul.f32 %v2184_v12, %v910_v14  ;;  %v908_v16 = vsel %vm907_vm0, %v2182_v5, %v904_v13 }
 0x888   :  { %v919_v19 = vmul.f32 %v908_v16, %v885_v53 }
 0x889   :  { %v912_v17 = vmul.f32 0.5, %v911_v15 }
 0x88a   :  { %v924_v23 = vmul.f32 %v2132_v55, %v919_v19 }
 0x88b   :  { %v913_v18 = vsub.f32 1.5, %v912_v17 }
 0x88c   :  { %v2580_v26 = vadd.f32 %v2133_v22, %v924_v23 }
 0x88d   :  { %v914_v20 = vmul.f32 %v2184_v12, %v913_v18 }
 0x88f   :  { %v918_v21 = vsel %vm917_vm8, %v2184_v12, %v914_v20 }
 0x890   :  { %v920_v24 = vmul.f32 %v918_v21, %v886_v60 }
 0x892   :  { %v925_v25 = vmul.f32 %v2132_v55, %v920_v24 }
 0x894   :  { %v2582_v28 = vadd.f32 %v2133_v22, %v925_v25 }
 0x896   :  { %v931_v27 = vpack.c.bf16 %v2582_v28, %v2580_v26 }
 0x898   :  { %1933 = vmatmul.msk.bf16.vlgmr.msra.gmra.mxu1 %vm111_vm2, %v931_v27 }
 0x915   :  { %v966_v30 = vpop.f32.mrf.mxu1 }
 0x916   :  { %v967_v31 = vadd.f32 %v2134_v29, %v966_v30 }
 0x918   :  { %979 = vrot.lane.b32.xlu1 %v967_v31, %s2254_s30  ;;  %973 = vrot.lane.b32.xlu0 %v967_v31, %s2252_s28  ;;  %v991_v34 = vpack.c.bf16 %v967_v31, %v967_v31 }
 0x91a   :  { %v1000_v35 = vunpack.c.l.b16 %v991_v34 }
 0x91c   :  { %v2595_v38 = vpack.c.b16 %v1000_v35, %v1000_v35 }
 0x91d   :  { %v968_v32 = vpop.f32.mrf.mxu1 }
 0x91e   :  { %v969_v33 = vadd.f32 %v2134_v29, %v968_v32 }
 0x920   :  { %975 = vrot.lane.b32.xlu2 %v969_v33, %s2252_s28  ;;  %985 = vrot.lane.b32.xlu1 %v967_v31, %s2251_s27  ;;  %v992_v36 = vpack.c.bf16 %v969_v33, %v969_v33 }
 0x921   :  { %987 = vrot.lane.b32.xlu0 %v969_v33, %s2251_s27 }
 0x922   :  { %v1024_v50 = vunpack.c.l.b16 %v992_v36 }
 0x924   :  { %v2600_v37 = vpack.c.b16 %v1024_v50, %v1024_v50 }
 0x928   :  { %981 = vrot.lane.b32.xlu2 %v969_v33, %s2254_s30 }
 0x929   :  { %1002 = vrot.lane.b32.xlu0 %v2595_v38, %s2253_s29 }
 0x930   :  { %1026 = vrot.lane.b32.xlu2 %v2600_v37, %s2253_s29 }
 0x97a   :  { %v976_v51 = vpop.permute.xlu2 %975 }
 0x97b   :  { %v994_v39 = vpack.c.bf16 %v976_v51, %v976_v51 }
 0x97d   :  { %v1072_v40 = vunpack.c.l.b16 %v994_v39 }
 0x97f   :  { %v1073_v41 = vpack.c.b16 %v1072_v40, %v1072_v40 }
 0x981   :  { %1074 = vrot.lane.b32.xlu1 %v1073_v41, %s2253_s29 }
 0x982   :  { %v982_v42 = vpop.permute.xlu2 %981 }
 0x983   :  { %v996_v54 = vpack.c.bf16 %v982_v42, %v982_v42 }
 0x985   :  { %v1120_v52 = vunpack.c.l.b16 %v996_v54 }
 0x987   :  { %v2617_v1 = vpack.c.b16 %v1120_v52, %v1120_v52 }
 0x98a   :  { %v1027_v43 = vpop.permute.xlu2 %1026  ;;  %v980_v44 = vpop.permute.xlu1 %979 }
 0x98b   :  { %v1032_v45 = vsel %vm162_vm3, %v1027_v43, 0  ;;  %v995_v10 = vpack.c.bf16 %v980_v44, %v980_v44  ;;  %v974_v47 = vpop.permute.xlu0 %973 }
 0x98c   :  { %v993_v48 = vpack.c.bf16 %v974_v47, %v974_v47  ;;  %1041 = vmatpush.bf16.xpose.msrb.mxu3 %v1032_v45 }
 0x98d   :  { %v1096_v49 = vunpack.c.l.b16 %v995_v10 }
 0x98e   :  { %v1048_v11 = vunpack.c.l.b16 %v993_v48 }
 0x98f   :  { %v2606_v53 = vpack.c.b16 %v1096_v49, %v1096_v49 }
 0x990   :  { %v2608_v56 = vpack.c.b16 %v1048_v11, %v1048_v11 }
 0x991   :  { %1098 = vrot.lane.b32.xlu2 %v2606_v53, %s2253_s29 }
 0x992   :  { %1050 = vrot.lane.b32.xlu0 %v2608_v56, %s2253_s29  ;;  %v986_v57 = vpop.permute.xlu1 %985 }
 0x993   :  { %v997_v58 = vpack.c.bf16 %v986_v57, %v986_v57  ;;  %v988_v60 = vpop.permute.xlu0 %987  ;;  %1935 = vmatmul.msk.bf16.vlgmr.msrb.gmra.mxu3 %vm162_vm3, %v992_v36 }
 0x994   :  { %v998_v61 = vpack.c.bf16 %v988_v60, %v988_v60 }
 0x995   :  { %v1144_v62 = vunpack.c.l.b16 %v997_v58 }
 0x996   :  { %v1168_v63 = vunpack.c.l.b16 %v998_v61 }
 0x997   :  { %v2615_v0 = vpack.c.b16 %v1144_v62, %v1144_v62 }
 0x998   :  { %v2619_v2 = vpack.c.b16 %v1168_v63, %v1168_v63 }
 0x999   :  { %1146 = vrot.lane.b32.xlu2 %v2615_v0, %s2253_s29 }
 0x99a   :  { %1170 = vrot.lane.b32.xlu1 %v2619_v2, %s2253_s29  ;;  %1122 = vrot.lane.b32.xlu0 %v2617_v1, %s2253_s29  ;;  %s1835_s29 = sshll.u32 %s2825_s18, 4  ;;  %s1836_s29 = int_to_ptr.hbm [resolvable:$true] %s1835_s29 }
 0x99b   :  { %v1003_v3 = vpop.permute.xlu0 %1002 }
 0x99c   :  { %v1008_v4 = vsel %vm162_vm3, %v1003_v3, 0 }
 0x99d   :  { %1017 = vmatpush.bf16.xpose.msrb.mxu2 %v1008_v4 }
 0x9a2   :  { %1350 = vrot.lane.b32.xlu0 %v1073_v41, %s2255_s0 }
 0x9a4   :  { %1934 = vmatmul.msk.bf16.vlgmr.msrb.gmra.mxu2 %vm162_vm3, %v991_v34 }
 0x9eb   :  { %v1099_v5 = vpop.permute.xlu2 %1098 }
 0x9ec   :  { %v1104_v6 = vsel %vm162_vm3, %v1099_v5, 0 }
 0x9ed   :  { %1113 = vmatpush.bf16.xpose.msra.mxu3 %v1104_v6 }
 0x9f3   :  { %v1075_v59 = vpop.permute.xlu1 %1074  ;;  %v1147_v8 = vpop.permute.xlu2 %1146 }
 0x9f4   :  { %v1080_v7 = vsel %vm162_vm3, %v1075_v59, 0  ;;  %1938 = vmatmul.msk.bf16.vlgmr.msra.gmra.mxu3 %vm162_vm3, %v995_v10  ;;  %v1152_v13 = vsel %vm162_vm3, %v1147_v8, 0 }
 0x9f5   :  { %1089 = vmatpush.bf16.xpose.msra.mxu2 %v1080_v7 }
 0x9fc   :  { %1937 = vmatmul.msk.bf16.vlgmr.msra.gmra.mxu2 %vm162_vm3, %v994_v39 }
 0xa04   :  { %v1051_v9 = vpop.permute.xlu0 %1050 }
 0xa05   :  { %v1056_v12 = vsel %vm162_vm3, %v1051_v9, 0 }
 0xa06   :  { %1065 = vmatpush.bf16.xpose.msrb.mxu1 %v1056_v12 }
 0xa0c   :  { %v1171_v14 = vpop.permute.xlu1 %1170  ;;  %v1123_v15 = vpop.permute.xlu0 %1122 }
 0xa0d   :  { %v1176_v16 = vsel %vm162_vm3, %v1171_v14, 0  ;;  %v1128_v17 = vsel %vm162_vm3, %v1123_v15, 0  ;;  %1936 = vmatmul.msk.bf16.vlgmr.msrb.gmra.mxu1 %vm162_vm3, %v993_v48 }
 0xa0e   :  { %1161 = vmatpush.bf16.xpose.msra.mxu1 %v1152_v13  ;;  %1137 = vmatpush.bf16.xpose.msrb.mxu0 %v1128_v17 }
 0xa0f   :  { %1185 = vmatpush.bf16.xpose.msrb.mxu2 %v1176_v16 }
 0xa14   :  { %v1351_v18 = vpop.permute.xlu0 %1350 }
 0xa15   :  { %v1356_v55 = vsel %vm451_vm4, %v1351_v18, 0  ;;  %1939 = vmatmul.msk.bf16.vlgmr.msrb.gmra.mxu0 %vm162_vm3, %v996_v54 }
 0xa16   :  { %1941 = vmatmul.msk.bf16.vlgmr.msrb.gmra.mxu2 %vm162_vm3, %v998_v61  ;;  %v1043_v19 = vpop.f32.mrf.mxu3 }
 0xa17   :  { %1365 = vmatpush.bf16.msra.mxu2 %v1356_v55  ;;  %v1194_v20 = vsel %vm162_vm3, %v1043_v19, -inf }
 0xa18   :  { %1195 = vmax.xlane.f32.xlu2 %v1194_v20 }
 0xa1d   :  { %1940 = vmatmul.msk.bf16.vlgmr.msra.gmra.mxu1 %vm162_vm3, %v997_v58 }
 0xa1e   :  { %v1045_v21 = vpop.f32.mrf.mxu3 }
 0xa27   :  { %v1019_v22 = vpop.f32.mrf.mxu2 }
 0xa28   :  { %v1191_v23 = vsel %vm162_vm3, %v1019_v22, -inf }
 0xa29   :  { %1192 = vmax.xlane.f32.xlu1 %v1191_v23 }
 0xa2f   :  { %v1021_v24 = vpop.f32.mrf.mxu2 }
 0xa30   :  { %1308 = vrot.lane.b32.xlu2 %v2600_v37, %s2255_s0 }
 0xa77   :  { %v1115_v25 = vpop.f32.mrf.mxu3 }
 0xa78   :  { %v1203_v27 = vsel %vm162_vm3, %v1115_v25, -inf }
 0xa79   :  { %1204 = vmax.xlane.f32.xlu0 %v1203_v27 }
 0xa7f   :  { %v1091_v29 = vpop.f32.mrf.mxu2  ;;  %v1117_v30 = vpop.f32.mrf.mxu3 }
 0xa80   :  { %v1200_v31 = vsel %vm162_vm3, %v1091_v29, -inf }
 0xa81   :  { %1201 = vmax.xlane.f32.xlu0 %v1200_v31 }
 0xa87   :  { %v1093_v32 = vpop.f32.mrf.mxu2 }
 0xa8a   :  { %v1067_v33 = vpop.f32.mrf.mxu1 }
 0xa8b   :  { %v1196_v34 = vpop.xlane.xlu2 %1195  ;;  %v1197_v35 = vsel %vm162_vm3, %v1067_v33, -inf }
 0xa8c   :  { %1198 = vmax.xlane.f32.xlu1 %v1197_v35  ;;  %v1216_v11 = vsub.f32 %v1043_v19, %v1196_v34 }
 0xa8e   :  { %v1225_v54 = vmul.f32 1.442695, %v1216_v11 }
 0xa92   :  { %v1069_v36 = vpop.f32.mrf.mxu1  ;;  %v2650_v50 = vpop.f32.mrf.mxu0 }
 0xa93   :  { %v1309_v51 = vpop.permute.xlu2 %1308 }
 0xa94   :  { %v1314_v37 = vsel %vm451_vm4, %v1309_v51, 0 }
 0xa95   :  { %1329 = vrot.lane.b32.xlu0 %v2608_v56, %s2255_s0  ;;  %1323 = vmatpush.bf16.msra.mxu0 %v1314_v37 }
 0xa99   :  { %v2655_v39 = vpop.f32.mrf.mxu2 }
 0xa9a   :  { %v1141_v40 = vpop.f32.mrf.mxu0  ;;  %v1163_v41 = vpop.f32.mrf.mxu1  ;;  %v1212_v49 = vsel %vm162_vm3, %v2655_v39, -inf }
 0xa9b   :  { %v1209_v56 = vsel %vm162_vm3, %v1163_v41, -inf }
 0xa9c   :  { %v1193_v42 = vpop.xlane.xlu1 %1192 }
 0xa9d   :  { %v1215_v43 = vsub.f32 %v1019_v22, %v1193_v42 }
 0xa9f   :  { %v1223_v44 = vmul.f32 1.442695, %v1215_v43 }
 0xaa1   :  { %v1189_v45 = vpop.f32.mrf.mxu2  ;;  %2185 = vpow2.f32 %v1223_v44 }
 0xaa2   :  { %v1165_v10 = vpop.f32.mrf.mxu1  ;;  %2187 = vpow2.f32 %v1225_v54 }
 0xaa5   :  { %1287 = vrot.lane.b32.xlu1 %v2595_v38, %s2255_s0  ;;  %v1206_v38 = vsel %vm162_vm3, %v2650_v50, -inf }
 0xaa7   :  { %v2186_v47 = vpop.eup %2185 }
 0xaa8   :  { %v1239_v48 = vsel %vm162_vm3, %v2186_v47, 0.0  ;;  %v2188_v57 = vpop.eup %2187 }
 0xaa9   :  { %1240 = vadd.xlane.f32.xlu2 %v1239_v48  ;;  %v1242_v58 = vsel %vm162_vm3, %v2188_v57, 0.0 }
 0xab1   :  { %1213 = vmax.xlane.f32.xlu2 %v1212_v49 }
 0xabf   :  { %1210 = vmax.xlane.f32.xlu0 %v1209_v56 }
 0xac7   :  { %1243 = vadd.xlane.f32.xlu0 %v1242_v58 }
 0xacf   :  { %1207 = vmax.xlane.f32.xlu1 %v1206_v38 }
 0xaec   :  { %v1205_v60 = vpop.xlane.xlu0 %1204 }
 0xaed   :  { %v1219_v52 = vsub.f32 %v1115_v25, %v1205_v60 }
 0xaef   :  { %v1231_v61 = vmul.f32 1.442695, %v1219_v52 }
 0xaf1   :  { %2189 = vpow2.f32 %v1231_v61 }
 0xaf4   :  { %v1202_v62 = vpop.xlane.xlu0 %1201 }
 0xaf5   :  { %v1218_v63 = vsub.f32 %v1091_v29, %v1202_v62 }
 0xaf7   :  { %v2666_v3 = vpop.eup %2189  ;;  %v1229_v4 = vmul.f32 1.442695, %v1218_v63 }
 0xaf8   :  { %v1251_v5 = vsel %vm162_vm3, %v2666_v3, 0.0 }
 0xaf9   :  { %2191 = vpow2.f32 %v1229_v4  ;;  %1252 = vadd.xlane.f32.xlu1 %v1251_v5 }
 0xaff   :  { %v2192_v6 = vpop.eup %2191  ;;  %v1199_v59 = vpop.xlane.xlu1 %1198 }
 0xb00   :  { %v1217_v7 = vsub.f32 %v1067_v33, %v1199_v59  ;;  %v1248_v8 = vsel %vm162_vm3, %v2192_v6, 0.0 }
 0xb01   :  { %1249 = vadd.xlane.f32.xlu1 %v1248_v8 }
 0xb02   :  { %v1227_v9 = vmul.f32 1.442695, %v1217_v7 }
 0xb04   :  { %2193 = vpow2.f32 %v1227_v9 }
 0xb07   :  { %v1330_v12 = vpop.permute.xlu0 %1329 }
 0xb08   :  { %v1335_v13 = vsel %vm451_vm4, %v1330_v12, 0 }
 0xb09   :  { %1344 = vmatpush.bf16.msrb.mxu1 %v1335_v13 }
 0xb0a   :  { %v2194_v14 = vpop.eup %2193 }
 0xb0b   :  { %v1245_v15 = vsel %vm162_vm3, %v2194_v14, 0.0 }
 0xb0c   :  { %1246 = vadd.xlane.f32.xlu2 %v1245_v15 }
 0xb17   :  { %v1288_v16 = vpop.permute.xlu1 %1287 }
 0xb18   :  { %v1293_v17 = vsel %vm451_vm4, %v1288_v16, 0 }
 0xb19   :  { %1302 = vmatpush.bf16.msrb.mxu3 %v1293_v17 }
 0xb1a   :  { %1371 = vrot.lane.b32.xlu1 %v2606_v53, %s2255_s0 }
 0xb1c   :  { %v1241_v18 = vpop.xlane.xlu2 %1240 }
 0xb1d   :  { %2195 = vrcp.f32 %v1241_v18 }
 0xb23   :  { %v2196_v55 = vpop.eup %2195 }
 0xb24   :  { %v1271_v19 = vmul.f32 %v2196_v55, %v2186_v47  ;;  %v1214_v21 = vpop.xlane.xlu2 %1213 }
 0xb25   :  { %v1222_v24 = vsub.f32 %v2655_v39, %v1214_v21 }
 0xb26   :  { %v1279_v20 = vpack.c.bf16 %v1271_v19, %v1271_v19 }
 0xb27   :  { %v1237_v27 = vmul.f32 1.442695, %v1222_v24 }
 0xb28   :  { %1942 = vmatmul.msk.bf16.vlgmr.msrb.gmra.mxu3 %vm162_vm3, %v1279_v20 }
 0xb32   :  { %v1211_v22 = vpop.xlane.xlu0 %1210 }
 0xb33   :  { %v1221_v23 = vsub.f32 %v1163_v41, %v1211_v22 }
 0xb35   :  { %v1235_v25 = vmul.f32 1.442695, %v1221_v23 }
 0xb37   :  { %2197 = vpow2.f32 %v1235_v25 }
 0xb3a   :  { %v1244_v29 = vpop.xlane.xlu0 %1243 }
 0xb3b   :  { %2199 = vrcp.f32 %v1244_v29 }
 0xb3c   :  { %2201 = vpow2.f32 %v1237_v27 }
 0xb3d   :  { %v2678_v30 = vpop.eup %2197 }
 0xb3e   :  { %v1257_v53 = vsel %vm162_vm3, %v2678_v30, 0.0 }
 0xb3f   :  { %1258 = vadd.xlane.f32.xlu2 %v1257_v53 }
 0xb41   :  { %v2200_v31 = vpop.eup %2199 }
 0xb42   :  { %v1272_v32 = vmul.f32 %v2200_v31, %v2188_v57  ;;  %v1208_v33 = vpop.xlane.xlu1 %1207  ;;  %v2202_v34 = vpop.eup %2201  ;;  %v2058_v31 = vld [vmem:[%s2813_s6 + $0x18] sm:$0xff] }
 0xb43   :  { %v1220_v35 = vsub.f32 %v2650_v50, %v1208_v33  ;;  %v1260_v37 = vsel %vm162_vm3, %v2202_v34, 0.0 }
 0xb44   :  { %v1280_v36 = vpack.c.bf16 %v1272_v32, %v1272_v32  ;;  %v2057_v32 = vld [vmem:[%s2813_s6 + $0x10] sm:$0xff] }
 0xb45   :  { %v1233_v51 = vmul.f32 1.442695, %v1220_v35 }
 0xb46   :  { %1943 = vmatmul.msk.bf16.vlgmr.msra.gmra.mxu0 %vm162_vm3, %v1280_v36 }
 0xb47   :  { %2203 = vpow2.f32 %v1233_v51  ;;  %1261 = vadd.xlane.f32.xlu2 %v1260_v37 }
 0xb4d   :  { %v2204_v39 = vpop.eup %2203 }
 0xb4e   :  { %v1254_v40 = vsel %vm162_vm3, %v2204_v39, 0.0 }
 0xb4f   :  { %1255 = vadd.xlane.f32.xlu0 %v1254_v40 }
 0xb5f   :  { %1392 = vrot.lane.b32.xlu2 %v2617_v1, %s2255_s0 }
 0xb63   :  { %1434 = vrot.lane.b32.xlu0 %v2619_v2, %s2255_s0 }
 0xb6b   :  { %1413 = vrot.lane.b32.xlu0 %v2615_v0, %s2255_s0 }
 0xb6c   :  { %v1253_v50 = vpop.xlane.xlu1 %1252 }
 0xb74   :  { %v1250_v41 = vpop.xlane.xlu1 %1249 }
 0xb75   :  { %2205 = vrcp.f32 %v1250_v41 }
 0xb7b   :  { %v2206_v42 = vpop.eup %2205 }
 0xb7c   :  { %v1274_v43 = vmul.f32 %v2206_v42, %v2192_v6 }
 0xb7e   :  { %v1282_v44 = vpack.c.bf16 %v1274_v43, %v1274_v43 }
 0xb7f   :  { %v1247_v45 = vpop.xlane.xlu2 %1246 }
 0xb80   :  { %2207 = vrcp.f32 %v1247_v45  ;;  %1945 = vmatmul.msk.bf16.vlgmr.msra.gmra.mxu2 %vm162_vm3, %v1282_v44 }
 0xb81   :  { %2209 = vrcp.f32 %v1253_v50 }
 0xb86   :  { %v2208_v10 = vpop.eup %2207 }
 0xb87   :  { %v1273_v47 = vmul.f32 %v2208_v10, %v2194_v14  ;;  %v2210_v1 = vpop.eup %2209 }
 0xb88   :  { %v1275_v2 = vmul.f32 %v2210_v1, %v2666_v3  ;;  %v2135_v1 = vld [vmem:[%s2814_s7 + $0x1] ss:$0 sm:$0xff] }
 0xb89   :  { %v1281_v48 = vpack.c.bf16 %v1273_v47, %v1273_v47 }
 0xb8a   :  { %v1283_v11 = vpack.c.bf16 %v1275_v2, %v1275_v2 }
 0xb8b   :  { %1944 = vmatmul.msk.bf16.vlgmr.msrb.gmra.mxu1 %vm162_vm3, %v1281_v48 }
 0xb8c   :  { %v1372_v0 = vpop.permute.xlu1 %1371 }
 0xb8d   :  { %v1377_v49 = vsel %vm451_vm4, %v1372_v0, 0 }
 0xb8e   :  { %1386 = vmatpush.bf16.msra.mxu3 %v1377_v49 }
 0xb91   :  { %1946 = vmatmul.msk.bf16.vlgmr.msra.gmra.mxu3 %vm162_vm3, %v1283_v11 }
 0xb92   :  { %1517 = vmatpush.bf16.msrb.mxu3 %v2058_v31 }
 0xb96   :  { %1518 = vmatpush.bf16.msrb.mxu3 %v2057_v32 }
 0xbab   :  { %v1304_v54 = vpop.f32.mrf.mxu3 }
 0xbb2   :  { %v1259_v56 = vpop.xlane.xlu2 %1258 }
 0xbb3   :  { %v1306_v57 = vpop.f32.mrf.mxu3 }
 0xbba   :  { %v1262_v58 = vpop.xlane.xlu2 %1261 }
 0xbc2   :  { %v1256_v38 = vpop.xlane.xlu0 %1255  ;;  %v1393_v60 = vpop.permute.xlu2 %1392 }
 0xbc3   :  { %2211 = vrcp.f32 %v1256_v38  ;;  %v1398_v52 = vsel %vm451_vm4, %v1393_v60, 0  ;;  %v1325_v61 = vpop.f32.mrf.mxu0 }
 0xbc4   :  { %1407 = vmatpush.bf16.msrb.mxu0 %v1398_v52  ;;  %2213 = vrcp.f32 %v1262_v58 }
 0xbc5   :  { %2215 = vrcp.f32 %v1259_v56 }
 0xbc9   :  { %v2212_v62 = vpop.eup %2211 }
 0xbca   :  { %v1276_v63 = vmul.f32 %v2212_v62, %v2204_v39  ;;  %v2214_v5 = vpop.eup %2213 }
 0xbcb   :  { %v1327_v3 = vpop.f32.mrf.mxu0  ;;  %v1278_v6 = vmul.f32 %v2214_v5, %v2202_v34  ;;  %v2216_v9 = vpop.eup %2215 }
 0xbcc   :  { %v1284_v4 = vpack.c.bf16 %v1276_v63, %v1276_v63  ;;  %v1277_v12 = vmul.f32 %v2216_v9, %v2678_v30 }
 0xbcd   :  { %v1286_v8 = vpack.c.bf16 %v1278_v6, %v1278_v6 }
 0xbce   :  { %1947 = vmatmul.msk.bf16.vlgmr.msrb.gmra.mxu0 %vm162_vm3, %v1284_v4  ;;  %v1285_v15 = vpack.c.bf16 %v1277_v12, %v1277_v12 }
 0xbd5   :  { %v1435_v59 = vpop.permute.xlu0 %1434 }
 0xbd6   :  { %v1440_v7 = vsel %vm451_vm4, %v1435_v59, 0  ;;  %v2059_v59 = vld [vmem:[%s2817_s10 + $0x10] sm:$0xff] }
 0xbd7   :  { %1449 = vmatpush.bf16.msrb.mxu2 %v1440_v7 }
 0xbda   :  { %1949 = vmatmul.msk.bf16.vlgmr.msrb.gmra.mxu2 %vm162_vm3, %v1286_v8  ;;  %v2068_v8 = vld [vmem:[%s2819_s12 + $0x78] sm:$0xff] }
 0xbdd   :  { %v1414_v13 = vpop.permute.xlu0 %1413 }
 0xbde   :  { %v1419_v14 = vsel %vm451_vm4, %v1414_v13, 0  ;;  %v2067_v13 = vld [vmem:[%s2819_s12 + $0x70] sm:$0xff] }
 0xbdf   :  { %1428 = vmatpush.bf16.msra.mxu1 %v1419_v14 }
 0xbe2   :  { %1948 = vmatmul.msk.bf16.vlgmr.msra.gmra.mxu1 %vm162_vm3, %v1285_v15 }
 0xbe3   :  { %1698 = vmatpush.bf16.msrb.mxu1 %v2068_v8 }
 0xbe7   :  { %1699 = vmatpush.bf16.msrb.mxu1 %v2067_v13  ;;  %v2070_v13 = vld [vmem:[%s2823_s16 + $0x8] sm:$0xff] }
 0xbe8   :  { %1820 = vmatpush.bf16.msra.mxu3 %v2070_v13 }
 0xc03   :  { %v1367_v16 = vpop.f32.mrf.mxu2 }
 0xc08   :  { %v1346_v17 = vpop.f32.mrf.mxu1 }
 0xc09   :  { %v2111_v18 = vpack.i.bf16 %v1367_v16, %v1346_v17  ;;  %v2066_v17 = vld [vmem:[%s2819_s12 + $0x68] sm:$0xff] }
 0xc0a   :  { %1700 = vmatpush.bf16.msrb.mxu1 %v2066_v17 }
 0xc0b   :  { %2112 = vrot.lane.b32.xlu1 %v2111_v18, %s2256_s19  ;;  %v1369_v55 = vpop.f32.mrf.mxu2 }
 0xc10   :  { %v1348_v19 = vpop.f32.mrf.mxu1 }
 0xc11   :  { %v2065_v19 = vld [vmem:[%s2819_s12 + $0x60] sm:$0xff] }
 0xc12   :  { %1701 = vmatpush.bf16.msrb.mxu1 %v2065_v19 }
 0xc14   :  { %v1388_v20 = vpop.f32.mrf.mxu3 }
 0xc1c   :  { %v1390_v21 = vpop.f32.mrf.mxu3 }
 0xc4b   :  { %v1409_v22 = vpop.f32.mrf.mxu0 }
 0xc4c   :  { %v2116_v23 = vpack.i.bf16 %v1409_v22, %v1388_v20 }
 0xc4e   :  { %2117 = vrot.lane.b32.xlu2 %v2116_v23, %s2258_s20 }
 0xc53   :  { %v1411_v24 = vpop.f32.mrf.mxu0 }
 0xc5d   :  { %v1451_v25 = vpop.f32.mrf.mxu2 }
 0xc5f   :  { %v1430_v27 = vpop.f32.mrf.mxu1 }
 0xc60   :  { %v2121_v29 = vpack.i.bf16 %v1451_v25, %v1430_v27 }
 0xc62   :  { %2122 = vrot.lane.b32.xlu0 %v2121_v29, %s2833_s5  ;;  %s1833_s5 = sshll.u32 %s2260_s21, 4  ;;  %s1834_s5 = int_to_ptr.vmem [resolvable:$true] %s1833_s5 }
 0xc65   :  { %v1453_v30 = vpop.f32.mrf.mxu2 }
 0xc66   :  { %v2136_v30 = vld [vmem:[%s2815_s8 + $0x1] ss:$0 sm:$0xff] }
 0xc67   :  { %v1432_v53 = vpop.f32.mrf.mxu1 }
 0xc7d   :  { %v2113_v33 = vpop.permute.xlu1 %2112 }
 0xc7e   :  { %v2115_v35 = vunpack.i.h.bf16 %v2113_v33  ;;  %v2114_v36 = vunpack.i.l.bf16 %v2113_v33  ;;  %v2137_v33 = vld [vmem:[%s2816_s9 + $0x1] ss:$0 sm:$0xff] }
 0xc80   :  { %v1479_v40 = vsel %vm162_vm3, %v1304_v54, %v2114_v36  ;;  %v1480_v50 = vsel %vm162_vm3, %v1325_v61, %v2115_v35 }
 0xca8   :  { %v2118_v34 = vpop.permute.xlu2 %2117 }
 0xca9   :  { %v2120_v51 = vunpack.i.h.bf16 %v2118_v34  ;;  %v2119_v37 = vunpack.i.l.bf16 %v2118_v34 }
 0xcab   :  { %v1482_v43 = vsel %vm641_vm5, %v1480_v50, %v2120_v51  ;;  %v1481_v44 = vsel %vm641_vm5, %v1479_v40, %v2119_v37  ;;  %v2064_v40 = vld [vmem:[%s2819_s12 + $0x58] sm:$0xff]  ;;  %v2063_v50 = vld [vmem:[%s2819_s12 + $0x50] sm:$0xff] }
 0xcac   :  { %1702 = vmatpush.bf16.msrb.mxu1 %v2064_v40 }
 0xcb0   :  { %1703 = vmatpush.bf16.msrb.mxu1 %v2063_v50 }
 0xcd4   :  { %v2123_v39 = vpop.permute.xlu0 %2122 }
 0xcd5   :  { %v2125_v41 = vunpack.i.h.bf16 %v2123_v39  ;;  %v2124_v42 = vunpack.i.l.bf16 %v2123_v39 }
 0xcd7   :  { %v1484_v45 = vsel %vm644_vm6, %v1482_v43, %v2125_v41  ;;  %v1483_v10 = vsel %vm644_vm6, %v1481_v44, %v2124_v42  ;;  %v2062_v41 = vld [vmem:[%s2819_s12 + $0x48] sm:$0xff]  ;;  %v2061_v42 = vld [vmem:[%s2819_s12 + $0x40] sm:$0xff] }
 0xcd8   :  { %v1485_v47 = vpack.c.bf16 %v1484_v45, %v1483_v10  ;;  %1704 = vmatpush.bf16.msrb.mxu1 %v2062_v41  ;;  %v2138_v44 = vld [vmem:[%s2818_s11 + $0x1] ss:$0 sm:$0xff]  ;;  %v2142_v41 = vld [vmem:[%s2824_s17] ss:$0 sm:$0xff] }
 0xcda   :  { %1963 = vmatmul.msk.bf16.vlgmr.msrb.gmra.mxu3 %vm111_vm2, %v1485_v47 }
 0xcdc   :  { %1705 = vmatpush.bf16.msrb.mxu1 %v2061_v42 }
 0xd5d   :  { %v1520_v48 = vpop.f32.mrf.mxu3 }
 0xd5e   :  { %v1521_v2 = vadd.f32 %v2135_v1, %v1520_v48 }
 0xd60   :  { %v1525_v0 = vadd.f32 %v1521_v2, %v2580_v26 }
 0xd62   :  { %v1531_v49 = vsel %vm111_vm2, %v1525_v0, 0.0 }
 0xd63   :  { %1532 = vadd.xlane.f32.xlu1 %v1531_v49 }
 0xd65   :  { %v1522_v11 = vpop.f32.mrf.mxu3 }
 0xd66   :  { %v1523_v54 = vadd.f32 %v2135_v1, %v1522_v11 }
 0xd68   :  { %v1526_v56 = vadd.f32 %v1523_v54, %v2582_v28  ;;  %v2060_v28 = vld [vmem:[%s2817_s10 + $0x18] sm:$0xff] }
 0xd69   :  { %1617 = vmatpush.bf16.msra.mxu0 %v2060_v28 }
 0xd6a   :  { %v1534_v57 = vsel %vm111_vm2, %v1526_v56, 0.0 }
 0xd6b   :  { %1535 = vadd.xlane.f32.xlu2 %v1534_v57 }
 0xd6d   :  { %1618 = vmatpush.bf16.msra.mxu0 %v2059_v59 }
 0xdd6   :  { %v1533_v58 = vpop.xlane.xlu1 %1532 }
 0xdd7   :  { %v1537_v38 = vmul.f32 %v1533_v58, %v2509_v46 }
 0xdd9   :  { %v1539_v60 = vsub.f32 %v1525_v0, %v1537_v38  ;;  %v2139_v0 = vld [vmem:[%s2820_s13 + $0x1] ss:$0 sm:$0xff] }
 0xddb   :  { %v1541_v52 = vmul.f32 %v1539_v60, %v1539_v60 }
 0xddd   :  { %v1543_v61 = vsel %vm111_vm2, %v1541_v52, 0.0 }
 0xdde   :  { %v1536_v62 = vpop.xlane.xlu2 %1535  ;;  %1544 = vadd.xlane.f32.xlu0 %v1543_v61 }
 0xddf   :  { %v1538_v26 = vmul.f32 %v1536_v62, %v2509_v46 }
 0xde1   :  { %v1540_v63 = vsub.f32 %v1526_v56, %v1538_v26 }
 0xde3   :  { %v1542_v3 = vmul.f32 %v1540_v63, %v1540_v63 }
 0xde5   :  { %v1546_v4 = vsel %vm111_vm2, %v1542_v3, 0.0 }
 0xde6   :  { %1547 = vadd.xlane.f32.xlu1 %v1546_v4 }
 0xe51   :  { %v1545_v5 = vpop.xlane.xlu0 %1544 }
 0xe52   :  { %v1549_v6 = vmul.f32 %v1545_v5, %v2509_v46 }
 0xe54   :  { %v1551_v7 = vadd.f32 1e-05, %v1549_v6 }
 0xe56   :  { %2217 = vrsqrt.f32 %v1551_v7  ;;  %vm1559_vm4 = vweird.f32 %v1551_v7 }
 0xe59   :  { %v1548_v9 = vpop.xlane.xlu1 %1547 }
 0xe5a   :  { %v1550_v12 = vmul.f32 %v1548_v9, %v2509_v46 }
 0xe5c   :  { %v2218_v14 = vpop.eup %2217  ;;  %v1552_v15 = vadd.f32 1e-05, %v1550_v12 }
 0xe5d   :  { %v1554_v16 = vmul.f32 %v2218_v14, %v1551_v7  ;;  %vm1560_vm3 = vweird.f32 %v2218_v14 }
 0xe5e   :  { %2219 = vrsqrt.f32 %v1552_v15  ;;  %vm1561_vm6 = vmor %vm1559_vm4, %vm1560_vm3  ;;  %vm1569_vm10 = vweird.f32 %v1552_v15 }
 0xe5f   :  { %v1555_v18 = vmul.f32 %v2218_v14, %v1554_v16 }
 0xe61   :  { %v1556_v55 = vmul.f32 0.5, %v1555_v18 }
 0xe63   :  { %v1557_v20 = vsub.f32 1.5, %v1556_v55 }
 0xe64   :  { %v2220_v21 = vpop.eup %2219 }
 0xe65   :  { %v1558_v22 = vmul.f32 %v2218_v14, %v1557_v20  ;;  %v1564_v23 = vmul.f32 %v2220_v21, %v1552_v15  ;;  %vm1570_vm9 = vweird.f32 %v2220_v21 }
 0xe66   :  { %vm1571_vm11 = vmor %vm1569_vm10, %vm1570_vm9 }
 0xe67   :  { %v1565_v24 = vmul.f32 %v2220_v21, %v1564_v23  ;;  %v1562_v25 = vsel %vm1561_vm6, %v2218_v14, %v1558_v22 }
 0xe68   :  { %v1573_v53 = vmul.f32 %v1562_v25, %v1539_v60 }
 0xe69   :  { %v1566_v27 = vmul.f32 0.5, %v1565_v24 }
 0xe6a   :  { %v1578_v34 = vmul.f32 %v2136_v30, %v1573_v53 }
 0xe6b   :  { %v1567_v29 = vsub.f32 1.5, %v1566_v27  ;;  %v2140_v27 = vld [vmem:[%s2821_s14 + $0x1] ss:$0 sm:$0xff] }
 0xe6c   :  { %v1583_v51 = vadd.f32 %v2137_v33, %v1578_v34 }
 0xe6d   :  { %v1568_v31 = vmul.f32 %v2220_v21, %v1567_v29 }
 0xe6f   :  { %v1572_v32 = vsel %vm1571_vm11, %v2220_v21, %v1568_v31 }
 0xe70   :  { %v1574_v35 = vmul.f32 %v1572_v32, %v1540_v63  ;;  %v2141_v32 = vld [vmem:[%s2822_s15 + $0x1] ss:$0 sm:$0xff] }
 0xe72   :  { %v1579_v36 = vmul.f32 %v2136_v30, %v1574_v35 }
 0xe74   :  { %v1584_v37 = vadd.f32 %v2137_v33, %v1579_v36 }
 0xe76   :  { %v1585_v39 = vpack.c.bf16 %v1584_v37, %v1583_v51 }
 0xe78   :  { %1979 = vmatmul.msk.bf16.vlgmr.msra.gmra.mxu0 %vm111_vm2, %v1585_v39 }
 0xef5   :  { %v1620_v43 = vpop.f32.mrf.mxu0 }
 0xef6   :  { %v1621_v45 = vadd.f32 %v2138_v44, %v1620_v43 }
 0xef8   :  { %v1625_v1 = vmax.f32 %v1621_v45, 0.0 }
 0xefd   :  { %v1622_v10 = vpop.f32.mrf.mxu0 }
 0xefe   :  { %v1623_v47 = vadd.f32 %v2138_v44, %v1622_v10 }
 0xf00   :  { %v1626_v48 = vmax.f32 %v1623_v47, 0.0 }
 0xf02   :  { %v1627_v2 = vpack.c.bf16 %v1626_v48, %v1625_v1 }
 0xf04   :  { %1706 = vmatmul.bf16.vlgmr.msrb.gmra.mxu1 %v1627_v2 }
 0xf81   :  { %v1707_v49 = vpop.f32.mrf.mxu1 }
 0xf82   :  { %v1708_v11 = vadd.f32 %v2139_v0, %v1707_v49 }
 0xf84   :  { %v1712_v54 = vadd.f32 %v1708_v11, %v1583_v51  ;;  %v1772_v51 = vld [vmem:[%s2834_s24] sm:$0x1] }
 0xf86   :  { %v1718_v56 = vsel %vm111_vm2, %v1712_v54, 0.0 }
 0xf87   :  { %1719 = vadd.xlane.f32.xlu2 %v1718_v56 }
 0xf89   :  { %v1709_v57 = vpop.f32.mrf.mxu1 }
 0xf8a   :  { %v1710_v58 = vadd.f32 %v2139_v0, %v1709_v57 }
 0xf8c   :  { %v1713_v38 = vadd.f32 %v1710_v58, %v1584_v37  ;;  %v2069_v37 = vld [vmem:[%s2823_s16] sm:$0xff] }
 0xf8d   :  { %1821 = vmatpush.bf16.msra.mxu3 %v2069_v37 }
 0xf8e   :  { %v1721_v60 = vsel %vm111_vm2, %v1713_v38, 0.0 }
 0xf8f   :  { %1722 = vadd.xlane.f32.xlu0 %v1721_v60 }
 0xffa   :  { %v1720_v52 = vpop.xlane.xlu2 %1719 }
 0xffb   :  { %v1724_v61 = vmul.f32 %v1720_v52, %v2509_v46 }
 0xffd   :  { %v1726_v62 = vsub.f32 %v1712_v54, %v1724_v61 }
 0xfff   :  { %v1728_v26 = vmul.f32 %v1726_v62, %v1726_v62 }
0x1001   :  { %v1730_v63 = vsel %vm111_vm2, %v1728_v26, 0.0 }
0x1002   :  { %v1723_v3 = vpop.xlane.xlu0 %1722  ;;  %1731 = vadd.xlane.f32.xlu1 %v1730_v63 }
0x1003   :  { %v1725_v4 = vmul.f32 %v1723_v3, %v2509_v46 }
0x1005   :  { %v1727_v28 = vsub.f32 %v1713_v38, %v1725_v4 }
0x1007   :  { %v1729_v5 = vmul.f32 %v1727_v28, %v1727_v28 }
0x1009   :  { %v1733_v6 = vsel %vm111_vm2, %v1729_v5, 0.0 }
0x100a   :  { %1734 = vadd.xlane.f32.xlu2 %v1733_v6 }
0x1075   :  { %v1732_v59 = vpop.xlane.xlu1 %1731 }
0x1076   :  { %v1736_v7 = vmul.f32 %v1732_v59, %v2509_v46 }
0x1078   :  { %v1738_v8 = vadd.f32 1e-05, %v1736_v7 }
0x107a   :  { %2221 = vrsqrt.f32 %v1738_v8  ;;  %vm1746_vm13 = vweird.f32 %v1738_v8 }
0x107d   :  { %v1735_v9 = vpop.xlane.xlu2 %1734 }
0x107e   :  { %v1737_v12 = vmul.f32 %v1735_v9, %v2509_v46 }
0x1080   :  { %v2222_v14 = vpop.eup %2221  ;;  %v1739_v15 = vadd.f32 1e-05, %v1737_v12 }
0x1081   :  { %v1741_v16 = vmul.f32 %v2222_v14, %v1738_v8  ;;  %vm1747_vm12 = vweird.f32 %v2222_v14 }
0x1082   :  { %2223 = vrsqrt.f32 %v1739_v15  ;;  %vm1748_vm14 = vmor %vm1746_vm13, %vm1747_vm12  ;;  %vm1756_vm0 = vweird.f32 %v1739_v15 }
0x1083   :  { %v1742_v17 = vmul.f32 %v2222_v14, %v1741_v16 }
0x1085   :  { %v1743_v18 = vmul.f32 0.5, %v1742_v17 }
0x1087   :  { %v1744_v55 = vsub.f32 1.5, %v1743_v18 }
0x1088   :  { %v2224_v19 = vpop.eup %2223 }
0x1089   :  { %v1745_v20 = vmul.f32 %v2222_v14, %v1744_v55  ;;  %v1751_v21 = vmul.f32 %v2224_v19, %v1739_v15  ;;  %vm1757_vm15 = vweird.f32 %v2224_v19 }
0x108a   :  { %vm1758_vm1 = vmor %vm1756_vm0, %vm1757_vm15 }
0x108b   :  { %v1752_v22 = vmul.f32 %v2224_v19, %v1751_v21  ;;  %v1749_v46 = vsel %vm1748_vm14, %v2222_v14, %v1745_v20 }
0x108c   :  { %v1760_v25 = vmul.f32 %v1749_v46, %v1726_v62 }
0x108d   :  { %v1753_v23 = vmul.f32 0.5, %v1752_v22 }
0x108e   :  { %v1765_v31 = vmul.f32 %v2140_v27, %v1760_v25 }
0x108f   :  { %v1754_v24 = vsub.f32 1.5, %v1753_v23 }
0x1090   :  { %v1770_v34 = vadd.f32 %v2141_v32, %v1765_v31 }
0x1091   :  { %v1755_v29 = vmul.f32 %v2224_v19, %v1754_v24 }
0x1093   :  { %v1759_v30 = vsel %vm1758_vm1, %v2224_v19, %v1755_v29 }
0x1094   :  { %v1761_v53 = vmul.f32 %v1759_v30, %v1727_v28 }
0x1096   :  { %v1766_v33 = vmul.f32 %v2140_v27, %v1761_v53 }
0x1098   :  { %v1771_v35 = vadd.f32 %v2141_v32, %v1766_v33 }
0x109a   :  { %v1773_v36 = vpack.c.bf16 %v1771_v35, %v1770_v34 }
0x109c   :  { %1784 = vmatpush.bf16.msra.mxu2 %v1773_v36 }
0x109f   :  { %2031 = vmatmul.msk.bf16.vlgmr.msra.gmra.mxu2 %vm641_vm5, %v1772_v51 }
0x1122   :  { %v1786_v39 = vpop.f32.mrf.mxu2 }
0x1123   :  { %v1790_v40 = vpack.c.bf16 %v1786_v39, %v1786_v39 }
0x1125   :  { %2040 = vmatmul.msk.bf16.vlgmr.msra.gmra.mxu3 %vm111_vm2, %v1790_v40 }
0x112a   :  { %v1788_v50 = vpop.f32.mrf.mxu2 }
0x11a8   :  { %v1823_v42 = vpop.f32.mrf.mxu3 }
0x11a9   :  { %v1824_v43 = vadd.f32 %v2142_v41, %v1823_v42 }
0x11ab   :  { %1827 = vst [vmem:[#allocation2] sm:$0x3] %v1824_v43 }
0x11ac   :  { %1838 = dma.vmem_to_hbm [thread:$0]  %s1834_s5, 32, %s1836_s29, [#allocation3]  }
0x11b0   :  { %v1825_v44 = vpop.f32.mrf.mxu3 }
0x11b1   :  { %2249 = dma.done.wait [#allocation3], 32  }
0x11b2   :  { %2250 = vsyncadd [#allocation3], 4294967264 }
0x11b3   :  { %1843 = vsyncpa [#allocation3], 1 }

// kernel: tpu_custom_call.1
= control target key start
LH: loop header
LB: loop body
LE: loop exit
PB: predicated region body
PF: predicated region fallthrough
CT: control target
= control target key end

     0   :  { %s2807_s0 = inlined_call_operand.vmem [shape: f32[16,4], index: 0, kind: input, shape index: {}]   ;;  %s2808_s1 = inlined_call_operand.vmem [shape: f32[8,32], index: 1, kind: input, shape index: {}]   ;;  %s2809_s2 = inlined_call_operand.vmem [shape: bf16[2,16], index: 2, kind: input, shape index: {}]   ;;  %s2810_s3 = inlined_call_operand.vmem [shape: bf16[4,32], index: 3, kind: input, shape index: {}]   ;;  %s2811_s4 = inlined_call_operand.vmem [shape: bf16[2,32,96], index: 4, kind: input, shape index: {}]   ;;  %s2812_s5 = inlined_call_operand.vmem [shape: f32[2,1,96], index: 5, kind: input, shape index: {}]   ;;  %s2813_s6 = inlined_call_operand.vmem [shape: bf16[2,32,32], index: 6, kind: input, shape index: {}]   ;;  %s2814_s7 = inlined_call_operand.vmem [shape: f32[2,1,32], index: 7, kind: input, shape index: {}]   ;;  %s2815_s8 = inlined_call_operand.vmem [shape: f32[2,1,32], index: 8, kind: input, shape index: {}]   ;;  %s2816_s9 = inlined_call_operand.vmem [shape: f32[2,1,32], index: 9, kind: input, shape index: {}]   ;;  %s2817_s10 = inlined_call_operand.vmem [shape: bf16[2,32,128], index: 10, kind: input, shape index: {}]   ;;  %s2818_s11 = inlined_call_operand.vmem [shape: f32[2,1,128], index: 11, kind: input, shape index: {}]   ;;  %s2819_s12 = inlined_call_operand.vmem [shape: bf16[2,128,32], index: 12, kind: input, shape index: {}]   ;;  %s2820_s13 = inlined_call_operand.vmem [shape: f32[2,1,32], index: 13, kind: input, shape index: {}]   ;;  %s2821_s14 = inlined_call_operand.vmem [shape: f32[2,1,32], index: 14, kind: input, shape index: {}]   ;;  %s2822_s15 = inlined_call_operand.vmem [shape: f32[2,1,32], index: 15, kind: input, shape index: {}]   ;;  %s2823_s16 = inlined_call_operand.vmem [shape: bf16[32,128], index: 16, kind: input, shape index: {}]   ;;  %s2824_s17 = inlined_call_operand.vmem [shape: f32[1,128], index: 17, kind: input, shape index: {}]   ;;  %s2825_s18 = inlined_call_operand.hbm [shape: f32[2,128], index: 18, kind: output, shape index: {}]  }
   0x1   :  { %2828 = sst [smem:[#allocation5_spill]] %s2807_s0 }
   0x2   :  { %2829 = sst [smem:[#allocation6_spill]] %s2808_s1 }
   0x3   :  { %2830 = sst [smem:[#allocation7_spill]] %s2809_s2 }
   0x4   :  { %v64_v0 = vld [vmem:[%s2810_s3] sm:$0x3]  ;;  %vm69_vm0 = vcmask 1041408   ;;  %s2831_s0 = sld [smem:[#allocation5_spill]]  ;;  %vm65_vm1 = vcmask 31744  }
   0x5   :  { %v71_v3 = vsel %vm69_vm0, %v64_v0, 0 }
   0x6   :  { %80 = vmatpush.bf16.msra.mxu0 %v71_v3 }
   0xa   :  { %v61_v1 = vld [vmem:[%s2831_s0] sm:$0xff]  ;;  %v62_v2 = vld [vmem:[%s2831_s0 + $0x8] sm:$0xff] }
   0xb   :  { %v63_v4 = vpack.c.bf16 %v62_v2, %v61_v1 }
   0xd   :  { %1844 = vmatmul.msk.bf16.vlgmr.msra.gmra.mxu0 %vm65_vm1, %v63_v4 }
   0xe   :  { %23 = vsyncpa [#allocation3], 0  ;;  %v2042_v5 = vld [vmem:[%s2811_s4 + $0x8] sm:$0xff]  ;;  %v2041_v6 = vld [vmem:[%s2811_s4] sm:$0xff]  ;;  %s2832_s24 = sld [smem:[#allocation6_spill]]  ;;  %vm111_vm2 = vcmask 261120  }
   0xf   :  { %121 = vmatpush.bf16.msrb.mxu0 %v2042_v5  ;;  %v2126_v14 = vld [vmem:[%s2812_s5] ss:$0 sm:$0xff]  ;;  %s2251_s27 = smov 104   ;;  %s2252_s28 = smov 120   ;;  %vm162_vm3 = vcmask 64512   ;;  %vm451_vm4 = vcmask 1043456  }
  0x10   :  { %s2253_s29 = smov 96   ;;  %s2254_s30 = smov 112   ;;  %vm641_vm5 = vcmask 130048   ;;  %vm644_vm6 = vcmask 195584  }
  0x11   :  { %s2255_s0 = smov 64   ;;  %s2256_s19 = smov 8  }
  0x12   :  { %s2827_s1 = smov 24   ;;  %s2258_s20 = smov 16  }
  0x13   :  { %122 = vmatpush.bf16.msrb.mxu0 %v2041_v6  ;;  %s2260_s21 = smov [#allocation2]  }
  0x14   :  { %v87_v8 = vld [vmem:[%s2832_s24] sm:$0xff]  ;;  %s2834_s24 = sld [smem:[#allocation7_spill]] }
  0x8a   :  { %v82_v7 = vpop.f32.mrf.mxu0 }
  0x8b   :  { %v2374_v10 = vadd.f32 %v87_v8, %v82_v7 }
  0x92   :  { %v84_v9 = vpop.f32.mrf.mxu0 }
  0x93   :  { %v2376_v11 = vadd.f32 %v87_v8, %v84_v9 }
  0x95   :  { %v90_v12 = vpack.c.bf16 %v2376_v11, %v2374_v10 }
  0x97   :  { %1853 = vmatmul.msk.bf16.vlgmr.msrb.gmra.mxu0 %vm111_vm2, %v90_v12 }
 0x114   :  { %v124_v13 = vpop.f32.mrf.mxu0 }
 0x115   :  { %v125_v15 = vadd.f32 %v2126_v14, %v124_v13 }
 0x117   :  { %v149_v20 = vpack.c.bf16 %v125_v15, %v125_v15 }
 0x119   :  { %v158_v23 = vunpack.c.l.b16 %v149_v20 }
 0x11b   :  { %v159_v24 = vpack.c.b16 %v158_v23, %v158_v23 }
 0x11c   :  { %v126_v16 = vpop.f32.mrf.mxu0 }
 0x11d   :  { %v127_v17 = vadd.f32 %v2126_v14, %v126_v16 }
 0x11f   :  { %v2091_v18 = vpack.i.bf16 %v127_v17, %v125_v15  ;;  %v150_v19 = vpack.c.bf16 %v127_v17, %v127_v17 }
 0x121   :  { %2092 = vrot.lane.b32.xlu1 %v2091_v18, %s2251_s27  ;;  %2082 = vrot.lane.b32.xlu0 %v2091_v18, %s2252_s28  ;;  %v183_v21 = vunpack.c.l.b16 %v150_v19 }
 0x123   :  { %v184_v22 = vpack.c.b16 %v183_v21, %v183_v21 }
 0x125   :  { %185 = vrot.lane.b32.xlu2 %v184_v22, %s2253_s29 }
 0x129   :  { %2087 = vrot.lane.b32.xlu0 %v2091_v18, %s2254_s30  ;;  %160 = vrot.lane.b32.xlu1 %v159_v24, %s2253_s29 }
 0x17f   :  { %v186_v25 = vpop.permute.xlu2 %185 }
 0x180   :  { %v191_v26 = vsel %vm162_vm3, %v186_v25, 0 }
 0x181   :  { %200 = vmatpush.bf16.xpose.msra.mxu3 %v191_v26 }
 0x188   :  { %1855 = vmatmul.msk.bf16.vlgmr.msra.gmra.mxu3 %vm162_vm3, %v150_v19 }
 0x193   :  { %v2093_v27 = vpop.permute.xlu1 %2092  ;;  %v2083_v28 = vpop.permute.xlu0 %2082 }
 0x194   :  { %v2085_v29 = vunpack.i.h.bf16 %v2083_v28  ;;  %v2084_v30 = vunpack.i.l.bf16 %v2083_v28  ;;  %v2094_v31 = vunpack.i.l.bf16 %v2093_v27  ;;  %v2095_v47 = vunpack.i.h.bf16 %v2093_v27 }
 0x196   :  { %v152_v32 = vpack.c.bf16 %v2085_v29, %v2085_v29  ;;  %v151_v33 = vpack.c.bf16 %v2084_v30, %v2084_v30  ;;  %v155_v36 = vpack.c.bf16 %v2094_v31, %v2094_v31  ;;  %v156_v53 = vpack.c.bf16 %v2095_v47, %v2095_v47 }
 0x198   :  { %v231_v34 = vunpack.c.l.b16 %v152_v32  ;;  %v207_v35 = vunpack.c.l.b16 %v151_v33  ;;  %v303_v44 = vunpack.c.l.b16 %v155_v36  ;;  %v327_v54 = vunpack.c.l.b16 %v156_v53 }
 0x19a   :  { %v2391_v37 = vpack.c.b16 %v231_v34, %v231_v34  ;;  %v208_v38 = vpack.c.b16 %v207_v35, %v207_v35  ;;  %v2397_v50 = vpack.c.b16 %v303_v44, %v303_v44  ;;  %v2410_v55 = vpack.c.b16 %v327_v54, %v327_v54 }
 0x19b   :  { %v2088_v39 = vpop.permute.xlu0 %2087  ;;  %v161_v40 = vpop.permute.xlu1 %160 }
 0x19c   :  { %v2090_v41 = vunpack.i.h.bf16 %v2088_v39  ;;  %v2089_v42 = vunpack.i.l.bf16 %v2088_v39  ;;  %233 = vrot.lane.b32.xlu0 %v2391_v37, %s2253_s29  ;;  %209 = vrot.lane.b32.xlu2 %v208_v38, %s2253_s29  ;;  %v167_v43 = vsel %vm162_vm3, %v161_v40, 0 }
 0x19d   :  { %176 = vmatpush.bf16.xpose.msra.mxu2 %v167_v43 }
 0x19e   :  { %v154_v45 = vpack.c.bf16 %v2090_v41, %v2090_v41  ;;  %v153_v46 = vpack.c.bf16 %v2089_v42, %v2089_v42 }
 0x1a0   :  { %v279_v48 = vunpack.c.l.b16 %v154_v45  ;;  %v255_v49 = vunpack.c.l.b16 %v153_v46 }
 0x1a2   :  { %v2399_v51 = vpack.c.b16 %v279_v48, %v279_v48  ;;  %v2401_v52 = vpack.c.b16 %v255_v49, %v255_v49 }
 0x1a4   :  { %305 = vrot.lane.b32.xlu0 %v2397_v50, %s2253_s29  ;;  %281 = vrot.lane.b32.xlu2 %v2399_v51, %s2253_s29 }
 0x1a5   :  { %257 = vrot.lane.b32.xlu1 %v2401_v52, %s2253_s29  ;;  %1854 = vmatmul.msk.bf16.vlgmr.msra.gmra.mxu2 %vm162_vm3, %v149_v20 }
 0x1ac   :  { %468 = vrot.lane.b32.xlu2 %v184_v22, %s2255_s0 }
 0x1ad   :  { %329 = vrot.lane.b32.xlu1 %v2410_v55, %s2253_s29 }
 0x1b5   :  { %446 = vrot.lane.b32.xlu1 %v159_v24, %s2255_s0 }
 0x1f6   :  { %v210_v56 = vpop.permute.xlu2 %209 }
 0x1f7   :  { %v215_v57 = vsel %vm162_vm3, %v210_v56, 0 }
 0x1f8   :  { %224 = vmatpush.bf16.xpose.msra.mxu0 %v215_v57 }
 0x1fe   :  { %v282_v58 = vpop.permute.xlu2 %281 }
 0x1ff   :  { %1856 = vmatmul.msk.bf16.vlgmr.msra.gmra.mxu0 %vm162_vm3, %v151_v33  ;;  %v287_v59 = vsel %vm162_vm3, %v282_v58, 0 }
 0x200   :  { %296 = vmatpush.bf16.xpose.msrb.mxu3 %v287_v59 }
 0x206   :  { %v469_v60 = vpop.permute.xlu2 %468 }
 0x207   :  { %v474_v61 = vsel %vm451_vm4, %v469_v60, 0  ;;  %1859 = vmatmul.msk.bf16.vlgmr.msrb.gmra.mxu3 %vm162_vm3, %v154_v45 }
 0x208   :  { %483 = vmatpush.bf16.msra.mxu3 %v474_v61 }
 0x20b   :  { %v2421_v62 = vpop.f32.mrf.mxu3 }
 0x20c   :  { %v353_v63 = vsel %vm162_vm3, %v2421_v62, -inf }
 0x20d   :  { %354 = vmax.xlane.f32.xlu0 %v353_v63 }
 0x20e   :  { %v234_v0 = vpop.permute.xlu0 %233 }
 0x20f   :  { %v239_v1 = vsel %vm162_vm3, %v234_v0, 0 }
 0x210   :  { %248 = vmatpush.bf16.xpose.msra.mxu1 %v239_v1 }
 0x213   :  { %v204_v2 = vpop.f32.mrf.mxu3 }
 0x216   :  { %v306_v3 = vpop.permute.xlu0 %305 }
 0x217   :  { %v311_v4 = vsel %vm162_vm3, %v306_v3, 0  ;;  %v258_v5 = vpop.permute.xlu1 %257  ;;  %1857 = vmatmul.msk.bf16.vlgmr.msra.gmra.mxu1 %vm162_vm3, %v152_v32 }
 0x218   :  { %v263_v6 = vsel %vm162_vm3, %v258_v5, 0  ;;  %320 = vmatpush.bf16.xpose.msrb.mxu0 %v311_v4 }
 0x219   :  { %272 = vmatpush.bf16.xpose.msrb.mxu2 %v263_v6 }
 0x21f   :  { %v330_v7 = vpop.permute.xlu1 %329  ;;  %1860 = vmatmul.msk.bf16.vlgmr.msrb.gmra.mxu0 %vm162_vm3, %v155_v36 }
 0x220   :  { %1858 = vmatmul.msk.bf16.vlgmr.msrb.gmra.mxu2 %vm162_vm3, %v153_v46  ;;  %v335_v8 = vsel %vm162_vm3, %v330_v7, 0 }
 0x221   :  { %344 = vmatpush.bf16.xpose.msrb.mxu1 %v335_v8  ;;  %489 = vrot.lane.b32.xlu0 %v208_v38, %s2255_s0 }
 0x227   :  { %v447_v9 = vpop.permute.xlu1 %446 }
 0x228   :  { %v453_v12 = vsel %vm451_vm4, %v447_v9, 0  ;;  %v178_v13 = vpop.f32.mrf.mxu2  ;;  %1861 = vmatmul.msk.bf16.vlgmr.msrb.gmra.mxu1 %vm162_vm3, %v156_v53 }
 0x229   :  { %462 = vmatpush.bf16.msra.mxu2 %v453_v12  ;;  %v350_v14 = vsel %vm162_vm3, %v178_v13, -inf }
 0x22a   :  { %351 = vmax.xlane.f32.xlu2 %v350_v14 }
 0x230   :  { %v180_v15 = vpop.f32.mrf.mxu2 }
 0x27c   :  { %v226_v16 = vpop.f32.mrf.mxu0 }
 0x27d   :  { %v356_v17 = vsel %vm162_vm3, %v226_v16, -inf }
 0x27e   :  { %357 = vmax.xlane.f32.xlu1 %v356_v17 }
 0x280   :  { %v355_v20 = vpop.xlane.xlu0 %354 }
 0x281   :  { %v375_v41 = vsub.f32 %v2421_v62, %v355_v20 }
 0x283   :  { %v384_v42 = vmul.f32 1.442695, %v375_v41 }
 0x284   :  { %v228_v18 = vpop.f32.mrf.mxu0 }
 0x28a   :  { %v298_v19 = vpop.f32.mrf.mxu3 }
 0x28b   :  { %v365_v21 = vsel %vm162_vm3, %v298_v19, -inf }
 0x28c   :  { %366 = vmax.xlane.f32.xlu0 %v365_v21 }
 0x292   :  { %v300_v22 = vpop.f32.mrf.mxu3 }
 0x293   :  { %v490_v23 = vpop.permute.xlu0 %489 }
 0x294   :  { %v495_v24 = vsel %vm451_vm4, %v490_v23, 0  ;;  %v250_v25 = vpop.f32.mrf.mxu1 }
 0x295   :  { %504 = vmatpush.bf16.msra.mxu0 %v495_v24 }
 0x297   :  { %510 = vrot.lane.b32.xlu1 %v2391_v37, %s2255_s0  ;;  %v359_v37 = vsel %vm162_vm3, %v250_v25, -inf }
 0x29c   :  { %v252_v26 = vpop.f32.mrf.mxu1  ;;  %v2441_v27 = vpop.f32.mrf.mxu0 }
 0x29d   :  { %v352_v28 = vpop.xlane.xlu2 %351  ;;  %v368_v43 = vsel %vm162_vm3, %v2441_v27, -inf }
 0x29e   :  { %v374_v29 = vsub.f32 %v178_v13, %v352_v28 }
 0x2a0   :  { %v382_v30 = vmul.f32 1.442695, %v374_v29 }
 0x2a2   :  { %2143 = vpow2.f32 %v382_v30 }
 0x2a3   :  { %v274_v31 = vpop.f32.mrf.mxu2  ;;  %2145 = vpow2.f32 %v384_v42 }
 0x2a4   :  { %v324_v32 = vpop.f32.mrf.mxu0  ;;  %v362_v33 = vsel %vm162_vm3, %v274_v31, -inf }
 0x2a5   :  { %363 = vmax.xlane.f32.xlu2 %v362_v33  ;;  %v346_v34 = vpop.f32.mrf.mxu1 }
 0x2a6   :  { %v371_v40 = vsel %vm162_vm3, %v346_v34, -inf }
 0x2a8   :  { %v2144_v35 = vpop.eup %2143 }
 0x2a9   :  { %v398_v36 = vsel %vm162_vm3, %v2144_v35, 0.0  ;;  %v2146_v44 = vpop.eup %2145 }
 0x2aa   :  { %399 = vadd.xlane.f32.xlu0 %v398_v36  ;;  %v401_v45 = vsel %vm162_vm3, %v2146_v44, 0.0 }
 0x2ab   :  { %v276_v38 = vpop.f32.mrf.mxu2 }
 0x2ad   :  { %360 = vmax.xlane.f32.xlu2 %v359_v37  ;;  %v348_v39 = vpop.f32.mrf.mxu1 }
 0x2b5   :  { %372 = vmax.xlane.f32.xlu2 %v371_v40 }
 0x2c1   :  { %369 = vmax.xlane.f32.xlu1 %v368_v43 }
 0x2c9   :  { %402 = vadd.xlane.f32.xlu1 %v401_v45 }
 0x2cd   :  { %531 = vrot.lane.b32.xlu2 %v2401_v52, %s2255_s0 }
 0x2f1   :  { %v358_v46 = vpop.xlane.xlu1 %357 }
 0x2f2   :  { %v376_v47 = vsub.f32 %v226_v16, %v358_v46 }
 0x2f4   :  { %v386_v48 = vmul.f32 1.442695, %v376_v47 }
 0x2f6   :  { %2147 = vpow2.f32 %v386_v48 }
 0x2fc   :  { %v2148_v49 = vpop.eup %2147 }
 0x2fd   :  { %v404_v53 = vsel %vm162_vm3, %v2148_v49, 0.0 }
 0x2fe   :  { %405 = vadd.xlane.f32.xlu2 %v404_v53 }
 0x2ff   :  { %v367_v54 = vpop.xlane.xlu0 %366 }
 0x300   :  { %v379_v56 = vsub.f32 %v298_v19, %v367_v54 }
 0x302   :  { %v392_v57 = vmul.f32 1.442695, %v379_v56 }
 0x304   :  { %2149 = vpow2.f32 %v392_v57 }
 0x309   :  { %v511_v58 = vpop.permute.xlu1 %510 }
 0x30a   :  { %v2454_v59 = vpop.eup %2149  ;;  %v516_v60 = vsel %vm451_vm4, %v511_v58, 0 }
 0x30b   :  { %525 = vmatpush.bf16.msra.mxu1 %v516_v60  ;;  %v413_v52 = vsel %vm162_vm3, %v2454_v59, 0.0 }
 0x30c   :  { %414 = vadd.xlane.f32.xlu2 %v413_v52 }
 0x318   :  { %v364_v61 = vpop.xlane.xlu2 %363 }
 0x319   :  { %v378_v62 = vsub.f32 %v274_v31, %v364_v61 }
 0x31b   :  { %v390_v63 = vmul.f32 1.442695, %v378_v62 }
 0x31d   :  { %2151 = vpow2.f32 %v390_v63  ;;  %v400_v0 = vpop.xlane.xlu0 %399 }
 0x31e   :  { %2153 = vrcp.f32 %v400_v0 }
 0x320   :  { %v361_v1 = vpop.xlane.xlu2 %360 }
 0x321   :  { %v377_v2 = vsub.f32 %v250_v25, %v361_v1 }
 0x323   :  { %v2152_v3 = vpop.eup %2151  ;;  %v388_v4 = vmul.f32 1.442695, %v377_v2 }
 0x324   :  { %v2154_v5 = vpop.eup %2153  ;;  %v410_v6 = vsel %vm162_vm3, %v2152_v3, 0.0  ;;  %594 = vrot.lane.b32.xlu2 %v2410_v55, %s2255_s0 }
 0x325   :  { %v430_v7 = vmul.f32 %v2154_v5, %v2144_v35  ;;  %2155 = vpow2.f32 %v388_v4  ;;  %411 = vadd.xlane.f32.xlu0 %v410_v6 }
 0x327   :  { %v438_v8 = vpack.c.bf16 %v430_v7, %v430_v7 }
 0x328   :  { %v373_v9 = vpop.xlane.xlu2 %372 }
 0x329   :  { %v381_v12 = vsub.f32 %v346_v34, %v373_v9  ;;  %1862 = vmatmul.msk.bf16.vlgmr.msra.gmra.mxu2 %vm162_vm3, %v438_v8 }
 0x32b   :  { %v2156_v13 = vpop.eup %2155  ;;  %v396_v14 = vmul.f32 1.442695, %v381_v12 }
 0x32c   :  { %v407_v15 = vsel %vm162_vm3, %v2156_v13, 0.0 }
 0x32d   :  { %2157 = vpow2.f32 %v396_v14  ;;  %408 = vadd.xlane.f32.xlu0 %v407_v15 }
 0x330   :  { %v532_v16 = vpop.permute.xlu2 %531 }
 0x331   :  { %v537_v17 = vsel %vm451_vm4, %v532_v16, 0  ;;  %v2044_v16 = vld [vmem:[%s2813_s6 + $0x8] sm:$0xff] }
 0x332   :  { %546 = vmatpush.bf16.msrb.mxu2 %v537_v17  ;;  %v2043_v17 = vld [vmem:[%s2813_s6] sm:$0xff] }
 0x333   :  { %v2158_v18 = vpop.eup %2157 }
 0x334   :  { %v419_v55 = vsel %vm162_vm3, %v2158_v18, 0.0  ;;  %v370_v19 = vpop.xlane.xlu1 %369 }
 0x335   :  { %420 = vadd.xlane.f32.xlu0 %v419_v55  ;;  %v380_v20 = vsub.f32 %v2441_v27, %v370_v19 }
 0x336   :  { %677 = vmatpush.bf16.msra.mxu2 %v2044_v16 }
 0x337   :  { %v394_v21 = vmul.f32 1.442695, %v380_v20 }
 0x339   :  { %2159 = vpow2.f32 %v394_v21 }
 0x33a   :  { %678 = vmatpush.bf16.msra.mxu2 %v2043_v17 }
 0x33c   :  { %v403_v22 = vpop.xlane.xlu1 %402 }
 0x33d   :  { %2161 = vrcp.f32 %v403_v22 }
 0x33f   :  { %v2160_v23 = vpop.eup %2159 }
 0x340   :  { %v416_v24 = vsel %vm162_vm3, %v2160_v23, 0.0 }
 0x341   :  { %417 = vadd.xlane.f32.xlu1 %v416_v24 }
 0x343   :  { %v2162_v25 = vpop.eup %2161 }
 0x344   :  { %v431_v26 = vmul.f32 %v2162_v25, %v2146_v44 }
 0x346   :  { %v439_v28 = vpack.c.bf16 %v431_v26, %v431_v26 }
 0x348   :  { %1863 = vmatmul.msk.bf16.vlgmr.msra.gmra.mxu3 %vm162_vm3, %v439_v28 }
 0x349   :  { %573 = vrot.lane.b32.xlu0 %v2397_v50, %s2255_s0 }
 0x35a   :  { %552 = vrot.lane.b32.xlu1 %v2399_v51, %s2255_s0 }
 0x371   :  { %v406_v27 = vpop.xlane.xlu2 %405 }
 0x372   :  { %2163 = vrcp.f32 %v406_v27 }
 0x378   :  { %v2164_v29 = vpop.eup %2163 }
 0x379   :  { %v432_v30 = vmul.f32 %v2164_v29, %v2148_v49 }
 0x37b   :  { %v440_v31 = vpack.c.bf16 %v432_v30, %v432_v30 }
 0x37d   :  { %1864 = vmatmul.msk.bf16.vlgmr.msra.gmra.mxu0 %vm162_vm3, %v440_v31 }
 0x37f   :  { %v415_v32 = vpop.xlane.xlu2 %414 }
 0x387   :  { %v595_v33 = vpop.permute.xlu2 %594 }
 0x388   :  { %v600_v34 = vsel %vm451_vm4, %v595_v33, 0  ;;  %v2127_v33 = vld [vmem:[%s2814_s7] ss:$0 sm:$0xff] }
 0x389   :  { %609 = vmatpush.bf16.msrb.mxu1 %v600_v34 }
 0x398   :  { %v412_v35 = vpop.xlane.xlu0 %411 }
 0x399   :  { %2165 = vrcp.f32 %v412_v35 }
 0x39f   :  { %v2166_v36 = vpop.eup %2165 }
 0x3a0   :  { %v434_v38 = vmul.f32 %v2166_v36, %v2152_v3  ;;  %v409_v50 = vpop.xlane.xlu0 %408 }
 0x3a1   :  { %2167 = vrcp.f32 %v409_v50 }
 0x3a2   :  { %v442_v37 = vpack.c.bf16 %v434_v38, %v434_v38 }
 0x3a4   :  { %1866 = vmatmul.msk.bf16.vlgmr.msrb.gmra.mxu2 %vm162_vm3, %v442_v37 }
 0x3a7   :  { %v2168_v51 = vpop.eup %2167 }
 0x3a8   :  { %v433_v39 = vmul.f32 %v2168_v51, %v2156_v13  ;;  %v421_v41 = vpop.xlane.xlu0 %420 }
 0x3a9   :  { %2169 = vrcp.f32 %v421_v41 }
 0x3aa   :  { %v441_v40 = vpack.c.bf16 %v433_v39, %v433_v39 }
 0x3ac   :  { %v2476_v42 = vpop.f32.mrf.mxu2  ;;  %1865 = vmatmul.msk.bf16.vlgmr.msra.gmra.mxu1 %vm162_vm3, %v441_v40  ;;  %v2259_v40 = vmov 32.0  }
 0x3af   :  { %v2170_v43 = vpop.eup %2169 }
 0x3b0   :  { %v437_v46 = vmul.f32 %v2170_v43, %v2158_v18 }
 0x3b2   :  { %v445_v47 = vpack.c.bf16 %v437_v46, %v437_v46 }
 0x3b4   :  { %v466_v44 = vpop.f32.mrf.mxu2  ;;  %v418_v45 = vpop.xlane.xlu1 %417 }
 0x3b5   :  { %2171 = vrcp.f32 %v418_v45 }
 0x3b6   :  { %2173 = vrcp.f32 %v415_v32 }
 0x3b7   :  { %2175 = vrcp.f32 %v2259_v40  ;;  %v2131_v40 = vld [vmem:[%s2820_s13] ss:$0 sm:$0xff] }
 0x3bb   :  { %v2172_v48 = vpop.eup %2171  ;;  %v574_v49 = vpop.permute.xlu0 %573 }
 0x3bc   :  { %v436_v53 = vmul.f32 %v2172_v48, %v2160_v23  ;;  %v579_v54 = vsel %vm451_vm4, %v574_v49, 0  ;;  %1869 = vmatmul.msk.bf16.vlgmr.msrb.gmra.mxu1 %vm162_vm3, %v445_v47  ;;  %v2174_v57 = vpop.eup %2173 }
 0x3bd   :  { %588 = vmatpush.bf16.msrb.mxu0 %v579_v54  ;;  %v435_v58 = vmul.f32 %v2174_v57, %v2454_v59  ;;  %v2176_v41 = vpop.eup %2175 }
 0x3be   :  { %v444_v56 = vpack.c.bf16 %v436_v53, %v436_v53  ;;  %vm700_vm7 = vweird.f32 %v2176_v41 }
 0x3bf   :  { %v443_v62 = vpack.c.bf16 %v435_v58, %v435_v58 }
 0x3c0   :  { %1868 = vmatmul.msk.bf16.vlgmr.msrb.gmra.mxu0 %vm162_vm3, %v444_v56 }
 0x3cb   :  { %v485_v60 = vpop.f32.mrf.mxu3 }
 0x3cc   :  { %v553_v52 = vpop.permute.xlu1 %552 }
 0x3cd   :  { %v558_v61 = vsel %vm451_vm4, %v553_v52, 0 }
 0x3ce   :  { %567 = vmatpush.bf16.msrb.mxu3 %v558_v61 }
 0x3d1   :  { %1867 = vmatmul.msk.bf16.vlgmr.msrb.gmra.mxu3 %vm162_vm3, %v443_v62 }
 0x3d3   :  { %v487_v63 = vpop.f32.mrf.mxu3 }
 0x3d4   :  { %v2045_v63 = vld [vmem:[%s2817_s10] sm:$0xff] }
 0x3fa   :  { %v506_v0 = vpop.f32.mrf.mxu0 }
 0x402   :  { %v508_v1 = vpop.f32.mrf.mxu0 }
 0x427   :  { %v548_v2 = vpop.f32.mrf.mxu2 }
 0x429   :  { %v527_v3 = vpop.f32.mrf.mxu1 }
 0x42a   :  { %v2096_v4 = vpack.i.bf16 %v527_v3, %v506_v0  ;;  %v2054_v0 = vld [vmem:[%s2819_s12 + $0x38] sm:$0xff]  ;;  %v2053_v3 = vld [vmem:[%s2819_s12 + $0x30] sm:$0xff] }
 0x42b   :  { %859 = vmatpush.bf16.msra.mxu0 %v2054_v0 }
 0x42c   :  { %2097 = vrot.lane.b32.xlu0 %v2096_v4, %s2256_s19 }
 0x42f   :  { %v550_v5 = vpop.f32.mrf.mxu2  ;;  %860 = vmatpush.bf16.msra.mxu0 %v2053_v3 }
 0x431   :  { %v529_v6 = vpop.f32.mrf.mxu1 }
 0x439   :  { %v611_v59 = vpop.f32.mrf.mxu1 }
 0x43d   :  { %v590_v7 = vpop.f32.mrf.mxu0 }
 0x43e   :  { %v2106_v8 = vpack.i.bf16 %v611_v59, %v590_v7  ;;  %v2052_v59 = vld [vmem:[%s2819_s12 + $0x28] sm:$0xff] }
 0x43f   :  { %861 = vmatpush.bf16.msra.mxu0 %v2052_v59 }
 0x440   :  { %2107 = vrot.lane.b32.xlu2 %v2106_v8, %s2827_s1 }
 0x441   :  { %v613_v9 = vpop.f32.mrf.mxu1 }
 0x442   :  { %v2051_v9 = vld [vmem:[%s2819_s12 + $0x20] sm:$0xff] }
 0x443   :  { %862 = vmatpush.bf16.msra.mxu0 %v2051_v9 }
 0x445   :  { %v592_v12 = vpop.f32.mrf.mxu0 }
 0x454   :  { %v569_v13 = vpop.f32.mrf.mxu3 }
 0x455   :  { %v2101_v14 = vpack.i.bf16 %v569_v13, %v548_v2 }
 0x457   :  { %2102 = vrot.lane.b32.xlu1 %v2101_v14, %s2258_s20 }
 0x45c   :  { %v571_v15 = vpop.f32.mrf.mxu3 }
 0x49a   :  { %v2108_v20 = vpop.permute.xlu2 %2107 }
 0x49b   :  { %v2110_v24 = vunpack.i.h.bf16 %v2108_v20  ;;  %v2109_v25 = vunpack.i.l.bf16 %v2108_v20 }
 0x49e   :  { %v2098_v18 = vpop.permute.xlu0 %2097 }
 0x49f   :  { %v2100_v55 = vunpack.i.h.bf16 %v2098_v18  ;;  %v2099_v19 = vunpack.i.l.bf16 %v2098_v18 }
 0x4a1   :  { %v639_v26 = vsel %vm162_vm3, %v2476_v42, %v2099_v19  ;;  %v640_v28 = vsel %vm162_vm3, %v485_v60, %v2100_v55  ;;  %v696_v42 = vmul.f32 32.0, %v2176_v41  ;;  %v2046_v60 = vld [vmem:[%s2817_s10 + $0x8] sm:$0xff]  ;;  %v2128_v19 = vld [vmem:[%s2815_s8] ss:$0 sm:$0xff] }
 0x4a2   :  { %780 = vmatpush.bf16.msra.mxu3 %v2046_v60 }
 0x4a3   :  { %v697_v43 = vsub.f32 1.0, %v696_v42 }
 0x4a5   :  { %v698_v44 = vmul.f32 %v2176_v41, %v697_v43 }
 0x4a6   :  { %781 = vmatpush.bf16.msra.mxu3 %v2045_v63 }
 0x4a7   :  { %v699_v45 = vadd.f32 %v2176_v41, %v698_v44 }
 0x4a9   :  { %v2509_v46 = vsel %vm700_vm7, %v2176_v41, %v699_v45 }
 0x4c9   :  { %v2103_v21 = vpop.permute.xlu1 %2102 }
 0x4ca   :  { %v2105_v22 = vunpack.i.h.bf16 %v2103_v21  ;;  %v2104_v23 = vunpack.i.l.bf16 %v2103_v21 }
 0x4cc   :  { %v643_v27 = vsel %vm641_vm5, %v640_v28, %v2105_v22  ;;  %v642_v29 = vsel %vm641_vm5, %v639_v26, %v2104_v23  ;;  %v2129_v23 = vld [vmem:[%s2816_s9] ss:$0 sm:$0xff] }
 0x4cd   :  { %v646_v30 = vsel %vm644_vm6, %v643_v27, %v2110_v24  ;;  %v645_v31 = vsel %vm644_vm6, %v642_v29, %v2109_v25 }
 0x4ce   :  { %v647_v32 = vpack.c.bf16 %v646_v30, %v645_v31  ;;  %v2050_v30 = vld [vmem:[%s2819_s12 + $0x18] sm:$0xff]  ;;  %v2049_v31 = vld [vmem:[%s2819_s12 + $0x10] sm:$0xff] }
 0x4cf   :  { %863 = vmatpush.bf16.msra.mxu0 %v2050_v30 }
 0x4d0   :  { %1878 = vmatmul.msk.bf16.vlgmr.msra.gmra.mxu2 %vm111_vm2, %v647_v32  ;;  %v2048_v32 = vld [vmem:[%s2819_s12 + $0x8] sm:$0xff] }
 0x4d3   :  { %864 = vmatpush.bf16.msra.mxu0 %v2049_v31 }
 0x4d7   :  { %865 = vmatpush.bf16.msra.mxu0 %v2048_v32 }
 0x553   :  { %v680_v34 = vpop.f32.mrf.mxu2 }
 0x554   :  { %v681_v35 = vadd.f32 %v2127_v33, %v680_v34 }
 0x556   :  { %v685_v36 = vadd.f32 %v681_v35, %v2374_v10  ;;  %v2130_v35 = vld [vmem:[%s2818_s11] ss:$0 sm:$0xff] }
 0x558   :  { %v689_v38 = vsel %vm111_vm2, %v685_v36, 0.0 }
 0x559   :  { %690 = vadd.xlane.f32.xlu0 %v689_v38 }
 0x55b   :  { %v682_v50 = vpop.f32.mrf.mxu2 }
 0x55c   :  { %v683_v37 = vadd.f32 %v2127_v33, %v682_v50  ;;  %v2047_v33 = vld [vmem:[%s2819_s12] sm:$0xff] }
 0x55d   :  { %866 = vmatpush.bf16.msra.mxu0 %v2047_v33 }
 0x55e   :  { %v686_v51 = vadd.f32 %v683_v37, %v2376_v11 }
 0x560   :  { %v692_v39 = vsel %vm111_vm2, %v686_v51, 0.0 }
 0x561   :  { %693 = vadd.xlane.f32.xlu1 %v692_v39 }
 0x5cc   :  { %v691_v10 = vpop.xlane.xlu0 %690 }
 0x5cd   :  { %v702_v47 = vmul.f32 %v2509_v46, %v691_v10 }
 0x5cf   :  { %v704_v48 = vsub.f32 %v685_v36, %v702_v47 }
 0x5d1   :  { %v706_v49 = vmul.f32 %v704_v48, %v704_v48 }
 0x5d3   :  { %v708_v11 = vsel %vm111_vm2, %v706_v49, 0.0 }
 0x5d4   :  { %v694_v53 = vpop.xlane.xlu1 %693  ;;  %709 = vadd.xlane.f32.xlu2 %v708_v11 }
 0x5d5   :  { %v703_v54 = vmul.f32 %v2509_v46, %v694_v53 }
 0x5d7   :  { %v705_v56 = vsub.f32 %v686_v51, %v703_v54 }
 0x5d9   :  { %v707_v57 = vmul.f32 %v705_v56, %v705_v56 }
 0x5db   :  { %v711_v58 = vsel %vm111_vm2, %v707_v57, 0.0 }
 0x5dc   :  { %712 = vadd.xlane.f32.xlu0 %v711_v58 }
 0x647   :  { %v710_v52 = vpop.xlane.xlu2 %709 }
 0x648   :  { %v714_v61 = vmul.f32 %v710_v52, %v2509_v46 }
 0x64a   :  { %v716_v62 = vadd.f32 1e-05, %v714_v61 }
 0x64c   :  { %2177 = vrsqrt.f32 %v716_v62  ;;  %vm724_vm9 = vweird.f32 %v716_v62 }
 0x64f   :  { %v713_v1 = vpop.xlane.xlu0 %712 }
 0x650   :  { %v715_v2 = vmul.f32 %v713_v1, %v2509_v46 }
 0x652   :  { %v2178_v4 = vpop.eup %2177  ;;  %v717_v5 = vadd.f32 1e-05, %v715_v2  ;;  %v2055_v2 = vld [vmem:[%s2811_s4 + $0x10] sm:$0xff] }
 0x653   :  { %v719_v6 = vmul.f32 %v2178_v4, %v716_v62  ;;  %vm725_vm8 = vweird.f32 %v2178_v4  ;;  %v2056_v62 = vld [vmem:[%s2811_s4 + $0x18] sm:$0xff] }
 0x654   :  { %2179 = vrsqrt.f32 %v717_v5  ;;  %vm726_vm10 = vmor %vm724_vm9, %vm725_vm8  ;;  %vm734_vm12 = vweird.f32 %v717_v5  ;;  %963 = vmatpush.bf16.msra.mxu1 %v2056_v62 }
 0x655   :  { %v720_v7 = vmul.f32 %v2178_v4, %v719_v6 }
 0x657   :  { %v721_v8 = vmul.f32 0.5, %v720_v7 }
 0x658   :  { %964 = vmatpush.bf16.msra.mxu1 %v2055_v2 }
 0x659   :  { %v722_v12 = vsub.f32 1.5, %v721_v8 }
 0x65a   :  { %v2180_v13 = vpop.eup %2179 }
 0x65b   :  { %v723_v14 = vmul.f32 %v2178_v4, %v722_v12  ;;  %v729_v15 = vmul.f32 %v2180_v13, %v717_v5  ;;  %vm735_vm11 = vweird.f32 %v2180_v13 }
 0x65c   :  { %vm736_vm13 = vmor %vm734_vm12, %vm735_vm11 }
 0x65d   :  { %v730_v16 = vmul.f32 %v2180_v13, %v729_v15  ;;  %v727_v17 = vsel %vm726_vm10, %v2178_v4, %v723_v14 }
 0x65e   :  { %v738_v20 = vmul.f32 %v727_v17, %v704_v48 }
 0x65f   :  { %v731_v18 = vmul.f32 0.5, %v730_v16 }
 0x660   :  { %v743_v24 = vmul.f32 %v2128_v19, %v738_v20 }
 0x661   :  { %v732_v55 = vsub.f32 1.5, %v731_v18 }
 0x662   :  { %v748_v28 = vadd.f32 %v2129_v23, %v743_v24 }
 0x663   :  { %v733_v21 = vmul.f32 %v2180_v13, %v732_v55  ;;  %v2132_v55 = vld [vmem:[%s2821_s14] ss:$0 sm:$0xff] }
 0x665   :  { %v737_v22 = vsel %vm736_vm13, %v2180_v13, %v733_v21 }
 0x666   :  { %v739_v25 = vmul.f32 %v737_v22, %v705_v56  ;;  %v2133_v22 = vld [vmem:[%s2822_s15] ss:$0 sm:$0xff] }
 0x668   :  { %v744_v26 = vmul.f32 %v2128_v19, %v739_v25 }
 0x66a   :  { %v749_v27 = vadd.f32 %v2129_v23, %v744_v26 }
 0x66c   :  { %v750_v29 = vpack.c.bf16 %v749_v27, %v748_v28 }
 0x66e   :  { %1887 = vmatmul.msk.bf16.vlgmr.msra.gmra.mxu3 %vm111_vm2, %v750_v29  ;;  %v2134_v29 = vld [vmem:[%s2812_s5 + $0x1] ss:$0 sm:$0xff]  ;;  %s2833_s5 = smov 24  }
 0x6f1   :  { %v783_v34 = vpop.f32.mrf.mxu3 }
 0x6f2   :  { %v784_v36 = vadd.f32 %v2130_v35, %v783_v34 }
 0x6f4   :  { %v788_v37 = vmax.f32 %v784_v36, 0.0 }
 0x6f9   :  { %v785_v38 = vpop.f32.mrf.mxu3 }
 0x6fa   :  { %v786_v50 = vadd.f32 %v2130_v35, %v785_v38 }
 0x6fc   :  { %v789_v51 = vmax.f32 %v786_v50, 0.0 }
 0x6fe   :  { %v790_v39 = vpack.c.bf16 %v789_v51, %v788_v37 }
 0x700   :  { %867 = vmatmul.bf16.vlgmr.msra.gmra.mxu0 %v790_v39 }
 0x77d   :  { %v868_v41 = vpop.f32.mrf.mxu0 }
 0x77e   :  { %v869_v42 = vadd.f32 %v2131_v40, %v868_v41 }
 0x780   :  { %v873_v43 = vadd.f32 %v869_v42, %v748_v28 }
 0x782   :  { %v877_v44 = vsel %vm111_vm2, %v873_v43, 0.0 }
 0x783   :  { %878 = vadd.xlane.f32.xlu1 %v877_v44 }
 0x785   :  { %v870_v45 = vpop.f32.mrf.mxu0 }
 0x786   :  { %v871_v10 = vadd.f32 %v2131_v40, %v870_v45 }
 0x788   :  { %v874_v47 = vadd.f32 %v871_v10, %v749_v27 }
 0x78a   :  { %v880_v48 = vsel %vm111_vm2, %v874_v47, 0.0 }
 0x78b   :  { %881 = vadd.xlane.f32.xlu2 %v880_v48 }
 0x7f6   :  { %v879_v49 = vpop.xlane.xlu1 %878 }
 0x7f7   :  { %v883_v11 = vmul.f32 %v879_v49, %v2509_v46 }
 0x7f9   :  { %v885_v53 = vsub.f32 %v873_v43, %v883_v11 }
 0x7fb   :  { %v887_v54 = vmul.f32 %v885_v53, %v885_v53 }
 0x7fd   :  { %v889_v56 = vsel %vm111_vm2, %v887_v54, 0.0 }
 0x7fe   :  { %v882_v57 = vpop.xlane.xlu2 %881  ;;  %890 = vadd.xlane.f32.xlu0 %v889_v56 }
 0x7ff   :  { %v884_v58 = vmul.f32 %v882_v57, %v2509_v46 }
 0x801   :  { %v886_v60 = vsub.f32 %v874_v47, %v884_v58 }
 0x803   :  { %v888_v52 = vmul.f32 %v886_v60, %v886_v60 }
 0x805   :  { %v892_v61 = vsel %vm111_vm2, %v888_v52, 0.0 }
 0x806   :  { %893 = vadd.xlane.f32.xlu1 %v892_v61 }
 0x871   :  { %v891_v63 = vpop.xlane.xlu0 %890 }
 0x872   :  { %v895_v0 = vmul.f32 %v891_v63, %v2509_v46 }
 0x874   :  { %v897_v1 = vadd.f32 1e-05, %v895_v0 }
 0x876   :  { %2181 = vrsqrt.f32 %v897_v1  ;;  %vm905_vm15 = vweird.f32 %v897_v1 }
 0x879   :  { %v894_v3 = vpop.xlane.xlu1 %893 }
 0x87a   :  { %v896_v4 = vmul.f32 %v894_v3, %v2509_v46 }
 0x87c   :  { %v2182_v5 = vpop.eup %2181  ;;  %v898_v6 = vadd.f32 1e-05, %v896_v4 }
 0x87d   :  { %v900_v59 = vmul.f32 %v2182_v5, %v897_v1  ;;  %vm906_vm14 = vweird.f32 %v2182_v5 }
 0x87e   :  { %2183 = vrsqrt.f32 %v898_v6  ;;  %vm907_vm0 = vmor %vm905_vm15, %vm906_vm14  ;;  %vm915_vm7 = vweird.f32 %v898_v6 }
 0x87f   :  { %v901_v7 = vmul.f32 %v2182_v5, %v900_v59 }
 0x881   :  { %v902_v8 = vmul.f32 0.5, %v901_v7 }
 0x883   :  { %v903_v9 = vsub.f32 1.5, %v902_v8 }
 0x884   :  { %v2184_v12 = vpop.eup %2183 }
 0x885   :  { %v904_v13 = vmul.f32 %v2182_v5, %v903_v9  ;;  %v910_v14 = vmul.f32 %v2184_v12, %v898_v6  ;;  %vm916_vm1 = vweird.f32 %v2184_v12 }
 0x886   :  { %vm917_vm8 = vmor %vm915_vm7, %vm916_vm1 }
 0x887   :  { %v911_v15 = vmul.f32 %v2184_v12, %v910_v14  ;;  %v908_v16 = vsel %vm907_vm0, %v2182_v5, %v904_v13 }
 0x888   :  { %v919_v19 = vmul.f32 %v908_v16, %v885_v53 }
 0x889   :  { %v912_v17 = vmul.f32 0.5, %v911_v15 }
 0x88a   :  { %v924_v23 = vmul.f32 %v2132_v55, %v919_v19 }
 0x88b   :  { %v913_v18 = vsub.f32 1.5, %v912_v17 }
 0x88c   :  { %v2580_v26 = vadd.f32 %v2133_v22, %v924_v23 }
 0x88d   :  { %v914_v20 = vmul.f32 %v2184_v12, %v913_v18 }
 0x88f   :  { %v918_v21 = vsel %vm917_vm8, %v2184_v12, %v914_v20 }
 0x890   :  { %v920_v24 = vmul.f32 %v918_v21, %v886_v60 }
 0x892   :  { %v925_v25 = vmul.f32 %v2132_v55, %v920_v24 }
 0x894   :  { %v2582_v28 = vadd.f32 %v2133_v22, %v925_v25 }
 0x896   :  { %v931_v27 = vpack.c.bf16 %v2582_v28, %v2580_v26 }
 0x898   :  { %1933 = vmatmul.msk.bf16.vlgmr.msra.gmra.mxu1 %vm111_vm2, %v931_v27 }
 0x915   :  { %v966_v30 = vpop.f32.mrf.mxu1 }
 0x916   :  { %v967_v31 = vadd.f32 %v2134_v29, %v966_v30 }
 0x918   :  { %979 = vrot.lane.b32.xlu1 %v967_v31, %s2254_s30  ;;  %973 = vrot.lane.b32.xlu0 %v967_v31, %s2252_s28  ;;  %v991_v34 = vpack.c.bf16 %v967_v31, %v967_v31 }
 0x91a   :  { %v1000_v35 = vunpack.c.l.b16 %v991_v34 }
 0x91c   :  { %v2595_v38 = vpack.c.b16 %v1000_v35, %v1000_v35 }
 0x91d   :  { %v968_v32 = vpop.f32.mrf.mxu1 }
 0x91e   :  { %v969_v33 = vadd.f32 %v2134_v29, %v968_v32 }
 0x920   :  { %975 = vrot.lane.b32.xlu2 %v969_v33, %s2252_s28  ;;  %985 = vrot.lane.b32.xlu1 %v967_v31, %s2251_s27  ;;  %v992_v36 = vpack.c.bf16 %v969_v33, %v969_v33 }
 0x921   :  { %987 = vrot.lane.b32.xlu0 %v969_v33, %s2251_s27 }
 0x922   :  { %v1024_v50 = vunpack.c.l.b16 %v992_v36 }
 0x924   :  { %v2600_v37 = vpack.c.b16 %v1024_v50, %v1024_v50 }
 0x928   :  { %981 = vrot.lane.b32.xlu2 %v969_v33, %s2254_s30 }
 0x929   :  { %1002 = vrot.lane.b32.xlu0 %v2595_v38, %s2253_s29 }
 0x930   :  { %1026 = vrot.lane.b32.xlu2 %v2600_v37, %s2253_s29 }
 0x97a   :  { %v976_v51 = vpop.permute.xlu2 %975 }
 0x97b   :  { %v994_v39 = vpack.c.bf16 %v976_v51, %v976_v51 }
 0x97d   :  { %v1072_v40 = vunpack.c.l.b16 %v994_v39 }
 0x97f   :  { %v1073_v41 = vpack.c.b16 %v1072_v40, %v1072_v40 }
 0x981   :  { %1074 = vrot.lane.b32.xlu1 %v1073_v41, %s2253_s29 }
 0x982   :  { %v982_v42 = vpop.permute.xlu2 %981 }
 0x983   :  { %v996_v54 = vpack.c.bf16 %v982_v42, %v982_v42 }
 0x985   :  { %v1120_v52 = vunpack.c.l.b16 %v996_v54 }
 0x987   :  { %v2617_v1 = vpack.c.b16 %v1120_v52, %v1120_v52 }
 0x98a   :  { %v1027_v43 = vpop.permute.xlu2 %1026  ;;  %v980_v44 = vpop.permute.xlu1 %979 }
 0x98b   :  { %v1032_v45 = vsel %vm162_vm3, %v1027_v43, 0  ;;  %v995_v10 = vpack.c.bf16 %v980_v44, %v980_v44  ;;  %v974_v47 = vpop.permute.xlu0 %973 }
 0x98c   :  { %v993_v48 = vpack.c.bf16 %v974_v47, %v974_v47  ;;  %1041 = vmatpush.bf16.xpose.msrb.mxu3 %v1032_v45 }
 0x98d   :  { %v1096_v49 = vunpack.c.l.b16 %v995_v10 }
 0x98e   :  { %v1048_v11 = vunpack.c.l.b16 %v993_v48 }
 0x98f   :  { %v2606_v53 = vpack.c.b16 %v1096_v49, %v1096_v49 }
 0x990   :  { %v2608_v56 = vpack.c.b16 %v1048_v11, %v1048_v11 }
 0x991   :  { %1098 = vrot.lane.b32.xlu2 %v2606_v53, %s2253_s29 }
 0x992   :  { %1050 = vrot.lane.b32.xlu0 %v2608_v56, %s2253_s29  ;;  %v986_v57 = vpop.permute.xlu1 %985 }
 0x993   :  { %v997_v58 = vpack.c.bf16 %v986_v57, %v986_v57  ;;  %v988_v60 = vpop.permute.xlu0 %987  ;;  %1935 = vmatmul.msk.bf16.vlgmr.msrb.gmra.mxu3 %vm162_vm3, %v992_v36 }
 0x994   :  { %v998_v61 = vpack.c.bf16 %v988_v60, %v988_v60 }
 0x995   :  { %v1144_v62 = vunpack.c.l.b16 %v997_v58 }
 0x996   :  { %v1168_v63 = vunpack.c.l.b16 %v998_v61 }
 0x997   :  { %v2615_v0 = vpack.c.b16 %v1144_v62, %v1144_v62 }
 0x998   :  { %v2619_v2 = vpack.c.b16 %v1168_v63, %v1168_v63 }
 0x999   :  { %1146 = vrot.lane.b32.xlu2 %v2615_v0, %s2253_s29 }
 0x99a   :  { %1170 = vrot.lane.b32.xlu1 %v2619_v2, %s2253_s29  ;;  %1122 = vrot.lane.b32.xlu0 %v2617_v1, %s2253_s29  ;;  %s1835_s29 = sshll.u32 %s2825_s18, 4  ;;  %s1836_s29 = int_to_ptr.hbm [resolvable:$true] %s1835_s29 }
 0x99b   :  { %v1003_v3 = vpop.permute.xlu0 %1002 }
 0x99c   :  { %v1008_v4 = vsel %vm162_vm3, %v1003_v3, 0 }
 0x99d   :  { %1017 = vmatpush.bf16.xpose.msrb.mxu2 %v1008_v4 }
 0x9a2   :  { %1350 = vrot.lane.b32.xlu0 %v1073_v41, %s2255_s0 }
 0x9a4   :  { %1934 = vmatmul.msk.bf16.vlgmr.msrb.gmra.mxu2 %vm162_vm3, %v991_v34 }
 0x9eb   :  { %v1099_v5 = vpop.permute.xlu2 %1098 }
 0x9ec   :  { %v1104_v6 = vsel %vm162_vm3, %v1099_v5, 0 }
 0x9ed   :  { %1113 = vmatpush.bf16.xpose.msra.mxu3 %v1104_v6 }
 0x9f3   :  { %v1075_v59 = vpop.permute.xlu1 %1074  ;;  %v1147_v8 = vpop.permute.xlu2 %1146 }
 0x9f4   :  { %v1080_v7 = vsel %vm162_vm3, %v1075_v59, 0  ;;  %1938 = vmatmul.msk.bf16.vlgmr.msra.gmra.mxu3 %vm162_vm3, %v995_v10  ;;  %v1152_v13 = vsel %vm162_vm3, %v1147_v8, 0 }
 0x9f5   :  { %1089 = vmatpush.bf16.xpose.msra.mxu2 %v1080_v7 }
 0x9fc   :  { %1937 = vmatmul.msk.bf16.vlgmr.msra.gmra.mxu2 %vm162_vm3, %v994_v39 }
 0xa04   :  { %v1051_v9 = vpop.permute.xlu0 %1050 }
 0xa05   :  { %v1056_v12 = vsel %vm162_vm3, %v1051_v9, 0 }
 0xa06   :  { %1065 = vmatpush.bf16.xpose.msrb.mxu1 %v1056_v12 }
 0xa0c   :  { %v1171_v14 = vpop.permute.xlu1 %1170  ;;  %v1123_v15 = vpop.permute.xlu0 %1122 }
 0xa0d   :  { %v1176_v16 = vsel %vm162_vm3, %v1171_v14, 0  ;;  %v1128_v17 = vsel %vm162_vm3, %v1123_v15, 0  ;;  %1936 = vmatmul.msk.bf16.vlgmr.msrb.gmra.mxu1 %vm162_vm3, %v993_v48 }
 0xa0e   :  { %1161 = vmatpush.bf16.xpose.msra.mxu1 %v1152_v13  ;;  %1137 = vmatpush.bf16.xpose.msrb.mxu0 %v1128_v17 }
 0xa0f   :  { %1185 = vmatpush.bf16.xpose.msrb.mxu2 %v1176_v16 }
 0xa14   :  { %v1351_v18 = vpop.permute.xlu0 %1350 }
 0xa15   :  { %v1356_v55 = vsel %vm451_vm4, %v1351_v18, 0  ;;  %1939 = vmatmul.msk.bf16.vlgmr.msrb.gmra.mxu0 %vm162_vm3, %v996_v54 }
 0xa16   :  { %1941 = vmatmul.msk.bf16.vlgmr.msrb.gmra.mxu2 %vm162_vm3, %v998_v61  ;;  %v1043_v19 = vpop.f32.mrf.mxu3 }
 0xa17   :  { %1365 = vmatpush.bf16.msra.mxu2 %v1356_v55  ;;  %v1194_v20 = vsel %vm162_vm3, %v1043_v19, -inf }
 0xa18   :  { %1195 = vmax.xlane.f32.xlu2 %v1194_v20 }
 0xa1d   :  { %1940 = vmatmul.msk.bf16.vlgmr.msra.gmra.mxu1 %vm162_vm3, %v997_v58 }
 0xa1e   :  { %v1045_v21 = vpop.f32.mrf.mxu3 }
 0xa27   :  { %v1019_v22 = vpop.f32.mrf.mxu2 }
 0xa28   :  { %v1191_v23 = vsel %vm162_vm3, %v1019_v22, -inf }
 0xa29   :  { %1192 = vmax.xlane.f32.xlu1 %v1191_v23 }
 0xa2f   :  { %v1021_v24 = vpop.f32.mrf.mxu2 }
 0xa30   :  { %1308 = vrot.lane.b32.xlu2 %v2600_v37, %s2255_s0 }
 0xa77   :  { %v1115_v25 = vpop.f32.mrf.mxu3 }
 0xa78   :  { %v1203_v27 = vsel %vm162_vm3, %v1115_v25, -inf }
 0xa79   :  { %1204 = vmax.xlane.f32.xlu0 %v1203_v27 }
 0xa7f   :  { %v1091_v29 = vpop.f32.mrf.mxu2  ;;  %v1117_v30 = vpop.f32.mrf.mxu3 }
 0xa80   :  { %v1200_v31 = vsel %vm162_vm3, %v1091_v29, -inf }
 0xa81   :  { %1201 = vmax.xlane.f32.xlu0 %v1200_v31 }
 0xa87   :  { %v1093_v32 = vpop.f32.mrf.mxu2 }
 0xa8a   :  { %v1067_v33 = vpop.f32.mrf.mxu1 }
 0xa8b   :  { %v1196_v34 = vpop.xlane.xlu2 %1195  ;;  %v1197_v35 = vsel %vm162_vm3, %v1067_v33, -inf }
 0xa8c   :  { %1198 = vmax.xlane.f32.xlu1 %v1197_v35  ;;  %v1216_v11 = vsub.f32 %v1043_v19, %v1196_v34 }
 0xa8e   :  { %v1225_v54 = vmul.f32 1.442695, %v1216_v11 }
 0xa92   :  { %v1069_v36 = vpop.f32.mrf.mxu1  ;;  %v2650_v50 = vpop.f32.mrf.mxu0 }
 0xa93   :  { %v1309_v51 = vpop.permute.xlu2 %1308 }
 0xa94   :  { %v1314_v37 = vsel %vm451_vm4, %v1309_v51, 0 }
 0xa95   :  { %1329 = vrot.lane.b32.xlu0 %v2608_v56, %s2255_s0  ;;  %1323 = vmatpush.bf16.msra.mxu0 %v1314_v37 }
 0xa99   :  { %v2655_v39 = vpop.f32.mrf.mxu2 }
 0xa9a   :  { %v1141_v40 = vpop.f32.mrf.mxu0  ;;  %v1163_v41 = vpop.f32.mrf.mxu1  ;;  %v1212_v49 = vsel %vm162_vm3, %v2655_v39, -inf }
 0xa9b   :  { %v1209_v56 = vsel %vm162_vm3, %v1163_v41, -inf }
 0xa9c   :  { %v1193_v42 = vpop.xlane.xlu1 %1192 }
 0xa9d   :  { %v1215_v43 = vsub.f32 %v1019_v22, %v1193_v42 }
 0xa9f   :  { %v1223_v44 = vmul.f32 1.442695, %v1215_v43 }
 0xaa1   :  { %v1189_v45 = vpop.f32.mrf.mxu2  ;;  %2185 = vpow2.f32 %v1223_v44 }
 0xaa2   :  { %v1165_v10 = vpop.f32.mrf.mxu1  ;;  %2187 = vpow2.f32 %v1225_v54 }
 0xaa5   :  { %1287 = vrot.lane.b32.xlu1 %v2595_v38, %s2255_s0  ;;  %v1206_v38 = vsel %vm162_vm3, %v2650_v50, -inf }
 0xaa7   :  { %v2186_v47 = vpop.eup %2185 }
 0xaa8   :  { %v1239_v48 = vsel %vm162_vm3, %v2186_v47, 0.0  ;;  %v2188_v57 = vpop.eup %2187 }
 0xaa9   :  { %1240 = vadd.xlane.f32.xlu2 %v1239_v48  ;;  %v1242_v58 = vsel %vm162_vm3, %v2188_v57, 0.0 }
 0xab1   :  { %1213 = vmax.xlane.f32.xlu2 %v1212_v49 }
 0xabf   :  { %1210 = vmax.xlane.f32.xlu0 %v1209_v56 }
 0xac7   :  { %1243 = vadd.xlane.f32.xlu0 %v1242_v58 }
 0xacf   :  { %1207 = vmax.xlane.f32.xlu1 %v1206_v38 }
 0xaec   :  { %v1205_v60 = vpop.xlane.xlu0 %1204 }
 0xaed   :  { %v1219_v52 = vsub.f32 %v1115_v25, %v1205_v60 }
 0xaef   :  { %v1231_v61 = vmul.f32 1.442695, %v1219_v52 }
 0xaf1   :  { %2189 = vpow2.f32 %v1231_v61 }
 0xaf4   :  { %v1202_v62 = vpop.xlane.xlu0 %1201 }
 0xaf5   :  { %v1218_v63 = vsub.f32 %v1091_v29, %v1202_v62 }
 0xaf7   :  { %v2666_v3 = vpop.eup %2189  ;;  %v1229_v4 = vmul.f32 1.442695, %v1218_v63 }
 0xaf8   :  { %v1251_v5 = vsel %vm162_vm3, %v2666_v3, 0.0 }
 0xaf9   :  { %2191 = vpow2.f32 %v1229_v4  ;;  %1252 = vadd.xlane.f32.xlu1 %v1251_v5 }
 0xaff   :  { %v2192_v6 = vpop.eup %2191  ;;  %v1199_v59 = vpop.xlane.xlu1 %1198 }
 0xb00   :  { %v1217_v7 = vsub.f32 %v1067_v33, %v1199_v59  ;;  %v1248_v8 = vsel %vm162_vm3, %v2192_v6, 0.0 }
 0xb01   :  { %1249 = vadd.xlane.f32.xlu1 %v1248_v8 }
 0xb02   :  { %v1227_v9 = vmul.f32 1.442695, %v1217_v7 }
 0xb04   :  { %2193 = vpow2.f32 %v1227_v9 }
 0xb07   :  { %v1330_v12 = vpop.permute.xlu0 %1329 }
 0xb08   :  { %v1335_v13 = vsel %vm451_vm4, %v1330_v12, 0 }
 0xb09   :  { %1344 = vmatpush.bf16.msrb.mxu1 %v1335_v13 }
 0xb0a   :  { %v2194_v14 = vpop.eup %2193 }
 0xb0b   :  { %v1245_v15 = vsel %vm162_vm3, %v2194_v14, 0.0 }
 0xb0c   :  { %1246 = vadd.xlane.f32.xlu2 %v1245_v15 }
 0xb17   :  { %v1288_v16 = vpop.permute.xlu1 %1287 }
 0xb18   :  { %v1293_v17 = vsel %vm451_vm4, %v1288_v16, 0 }
 0xb19   :  { %1302 = vmatpush.bf16.msrb.mxu3 %v1293_v17 }
 0xb1a   :  { %1371 = vrot.lane.b32.xlu1 %v2606_v53, %s2255_s0 }
 0xb1c   :  { %v1241_v18 = vpop.xlane.xlu2 %1240 }
 0xb1d   :  { %2195 = vrcp.f32 %v1241_v18 }
 0xb23   :  { %v2196_v55 = vpop.eup %2195 }
 0xb24   :  { %v1271_v19 = vmul.f32 %v2196_v55, %v2186_v47  ;;  %v1214_v21 = vpop.xlane.xlu2 %1213 }
 0xb25   :  { %v1222_v24 = vsub.f32 %v2655_v39, %v1214_v21 }
 0xb26   :  { %v1279_v20 = vpack.c.bf16 %v1271_v19, %v1271_v19 }
 0xb27   :  { %v1237_v27 = vmul.f32 1.442695, %v1222_v24 }
 0xb28   :  { %1942 = vmatmul.msk.bf16.vlgmr.msrb.gmra.mxu3 %vm162_vm3, %v1279_v20 }
 0xb32   :  { %v1211_v22 = vpop.xlane.xlu0 %1210 }
 0xb33   :  { %v1221_v23 = vsub.f32 %v1163_v41, %v1211_v22 }
 0xb35   :  { %v1235_v25 = vmul.f32 1.442695, %v1221_v23 }
 0xb37   :  { %2197 = vpow2.f32 %v1235_v25 }
 0xb3a   :  { %v1244_v29 = vpop.xlane.xlu0 %1243 }
 0xb3b   :  { %2199 = vrcp.f32 %v1244_v29 }
 0xb3c   :  { %2201 = vpow2.f32 %v1237_v27 }
 0xb3d   :  { %v2678_v30 = vpop.eup %2197 }
 0xb3e   :  { %v1257_v53 = vsel %vm162_vm3, %v2678_v30, 0.0 }
 0xb3f   :  { %1258 = vadd.xlane.f32.xlu2 %v1257_v53 }
 0xb41   :  { %v2200_v31 = vpop.eup %2199 }
 0xb42   :  { %v1272_v32 = vmul.f32 %v2200_v31, %v2188_v57  ;;  %v1208_v33 = vpop.xlane.xlu1 %1207  ;;  %v2202_v34 = vpop.eup %2201  ;;  %v2058_v31 = vld [vmem:[%s2813_s6 + $0x18] sm:$0xff] }
 0xb43   :  { %v1220_v35 = vsub.f32 %v2650_v50, %v1208_v33  ;;  %v1260_v37 = vsel %vm162_vm3, %v2202_v34, 0.0 }
 0xb44   :  { %v1280_v36 = vpack.c.bf16 %v1272_v32, %v1272_v32  ;;  %v2057_v32 = vld [vmem:[%s2813_s6 + $0x10] sm:$0xff] }
 0xb45   :  { %v1233_v51 = vmul.f32 1.442695, %v1220_v35 }
 0xb46   :  { %1943 = vmatmul.msk.bf16.vlgmr.msra.gmra.mxu0 %vm162_vm3, %v1280_v36 }
 0xb47   :  { %2203 = vpow2.f32 %v1233_v51  ;;  %1261 = vadd.xlane.f32.xlu2 %v1260_v37 }
 0xb4d   :  { %v2204_v39 = vpop.eup %2203 }
 0xb4e   :  { %v1254_v40 = vsel %vm162_vm3, %v2204_v39, 0.0 }
 0xb4f   :  { %1255 = vadd.xlane.f32.xlu0 %v1254_v40 }
 0xb5f   :  { %1392 = vrot.lane.b32.xlu2 %v2617_v1, %s2255_s0 }
 0xb63   :  { %1434 = vrot.lane.b32.xlu0 %v2619_v2, %s2255_s0 }
 0xb6b   :  { %1413 = vrot.lane.b32.xlu0 %v2615_v0, %s2255_s0 }
 0xb6c   :  { %v1253_v50 = vpop.xlane.xlu1 %1252 }
 0xb74   :  { %v1250_v41 = vpop.xlane.xlu1 %1249 }
 0xb75   :  { %2205 = vrcp.f32 %v1250_v41 }
 0xb7b   :  { %v2206_v42 = vpop.eup %2205 }
 0xb7c   :  { %v1274_v43 = vmul.f32 %v2206_v42, %v2192_v6 }
 0xb7e   :  { %v1282_v44 = vpack.c.bf16 %v1274_v43, %v1274_v43 }
 0xb7f   :  { %v1247_v45 = vpop.xlane.xlu2 %1246 }
 0xb80   :  { %2207 = vrcp.f32 %v1247_v45  ;;  %1945 = vmatmul.msk.bf16.vlgmr.msra.gmra.mxu2 %vm162_vm3, %v1282_v44 }
 0xb81   :  { %2209 = vrcp.f32 %v1253_v50 }
 0xb86   :  { %v2208_v10 = vpop.eup %2207 }
 0xb87   :  { %v1273_v47 = vmul.f32 %v2208_v10, %v2194_v14  ;;  %v2210_v1 = vpop.eup %2209 }
 0xb88   :  { %v1275_v2 = vmul.f32 %v2210_v1, %v2666_v3  ;;  %v2135_v1 = vld [vmem:[%s2814_s7 + $0x1] ss:$0 sm:$0xff] }
 0xb89   :  { %v1281_v48 = vpack.c.bf16 %v1273_v47, %v1273_v47 }
 0xb8a   :  { %v1283_v11 = vpack.c.bf16 %v1275_v2, %v1275_v2 }
 0xb8b   :  { %1944 = vmatmul.msk.bf16.vlgmr.msrb.gmra.mxu1 %vm162_vm3, %v1281_v48 }
 0xb8c   :  { %v1372_v0 = vpop.permute.xlu1 %1371 }
 0xb8d   :  { %v1377_v49 = vsel %vm451_vm4, %v1372_v0, 0 }
 0xb8e   :  { %1386 = vmatpush.bf16.msra.mxu3 %v1377_v49 }
 0xb91   :  { %1946 = vmatmul.msk.bf16.vlgmr.msra.gmra.mxu3 %vm162_vm3, %v1283_v11 }
 0xb92   :  { %1517 = vmatpush.bf16.msrb.mxu3 %v2058_v31 }
 0xb96   :  { %1518 = vmatpush.bf16.msrb.mxu3 %v2057_v32 }
 0xbab   :  { %v1304_v54 = vpop.f32.mrf.mxu3 }
 0xbb2   :  { %v1259_v56 = vpop.xlane.xlu2 %1258 }
 0xbb3   :  { %v1306_v57 = vpop.f32.mrf.mxu3 }
 0xbba   :  { %v1262_v58 = vpop.xlane.xlu2 %1261 }
 0xbc2   :  { %v1256_v38 = vpop.xlane.xlu0 %1255  ;;  %v1393_v60 = vpop.permute.xlu2 %1392 }
 0xbc3   :  { %2211 = vrcp.f32 %v1256_v38  ;;  %v1398_v52 = vsel %vm451_vm4, %v1393_v60, 0  ;;  %v1325_v61 = vpop.f32.mrf.mxu0 }
 0xbc4   :  { %1407 = vmatpush.bf16.msrb.mxu0 %v1398_v52  ;;  %2213 = vrcp.f32 %v1262_v58 }
 0xbc5   :  { %2215 = vrcp.f32 %v1259_v56 }
 0xbc9   :  { %v2212_v62 = vpop.eup %2211 }
 0xbca   :  { %v1276_v63 = vmul.f32 %v2212_v62, %v2204_v39  ;;  %v2214_v5 = vpop.eup %2213 }
 0xbcb   :  { %v1327_v3 = vpop.f32.mrf.mxu0  ;;  %v1278_v6 = vmul.f32 %v2214_v5, %v2202_v34  ;;  %v2216_v9 = vpop.eup %2215 }
 0xbcc   :  { %v1284_v4 = vpack.c.bf16 %v1276_v63, %v1276_v63  ;;  %v1277_v12 = vmul.f32 %v2216_v9, %v2678_v30 }
 0xbcd   :  { %v1286_v8 = vpack.c.bf16 %v1278_v6, %v1278_v6 }
 0xbce   :  { %1947 = vmatmul.msk.bf16.vlgmr.msrb.gmra.mxu0 %vm162_vm3, %v1284_v4  ;;  %v1285_v15 = vpack.c.bf16 %v1277_v12, %v1277_v12 }
 0xbd5   :  { %v1435_v59 = vpop.permute.xlu0 %1434 }
 0xbd6   :  { %v1440_v7 = vsel %vm451_vm4, %v1435_v59, 0  ;;  %v2059_v59 = vld [vmem:[%s2817_s10 + $0x10] sm:$0xff] }
 0xbd7   :  { %1449 = vmatpush.bf16.msrb.mxu2 %v1440_v7 }
 0xbda   :  { %1949 = vmatmul.msk.bf16.vlgmr.msrb.gmra.mxu2 %vm162_vm3, %v1286_v8  ;;  %v2068_v8 = vld [vmem:[%s2819_s12 + $0x78] sm:$0xff] }
 0xbdd   :  { %v1414_v13 = vpop.permute.xlu0 %1413 }
 0xbde   :  { %v1419_v14 = vsel %vm451_vm4, %v1414_v13, 0  ;;  %v2067_v13 = vld [vmem:[%s2819_s12 + $0x70] sm:$0xff] }
 0xbdf   :  { %1428 = vmatpush.bf16.msra.mxu1 %v1419_v14 }
 0xbe2   :  { %1948 = vmatmul.msk.bf16.vlgmr.msra.gmra.mxu1 %vm162_vm3, %v1285_v15 }
 0xbe3   :  { %1698 = vmatpush.bf16.msrb.mxu1 %v2068_v8 }
 0xbe7   :  { %1699 = vmatpush.bf16.msrb.mxu1 %v2067_v13  ;;  %v2070_v13 = vld [vmem:[%s2823_s16 + $0x8] sm:$0xff] }
 0xbe8   :  { %1820 = vmatpush.bf16.msra.mxu3 %v2070_v13 }
 0xc03   :  { %v1367_v16 = vpop.f32.mrf.mxu2 }
 0xc08   :  { %v1346_v17 = vpop.f32.mrf.mxu1 }
 0xc09   :  { %v2111_v18 = vpack.i.bf16 %v1367_v16, %v1346_v17  ;;  %v2066_v17 = vld [vmem:[%s2819_s12 + $0x68] sm:$0xff] }
 0xc0a   :  { %1700 = vmatpush.bf16.msrb.mxu1 %v2066_v17 }
 0xc0b   :  { %2112 = vrot.lane.b32.xlu1 %v2111_v18, %s2256_s19  ;;  %v1369_v55 = vpop.f32.mrf.mxu2 }
 0xc10   :  { %v1348_v19 = vpop.f32.mrf.mxu1 }
 0xc11   :  { %v2065_v19 = vld [vmem:[%s2819_s12 + $0x60] sm:$0xff] }
 0xc12   :  { %1701 = vmatpush.bf16.msrb.mxu1 %v2065_v19 }
 0xc14   :  { %v1388_v20 = vpop.f32.mrf.mxu3 }
 0xc1c   :  { %v1390_v21 = vpop.f32.mrf.mxu3 }
 0xc4b   :  { %v1409_v22 = vpop.f32.mrf.mxu0 }
 0xc4c   :  { %v2116_v23 = vpack.i.bf16 %v1409_v22, %v1388_v20 }
 0xc4e   :  { %2117 = vrot.lane.b32.xlu2 %v2116_v23, %s2258_s20 }
 0xc53   :  { %v1411_v24 = vpop.f32.mrf.mxu0 }
 0xc5d   :  { %v1451_v25 = vpop.f32.mrf.mxu2 }
 0xc5f   :  { %v1430_v27 = vpop.f32.mrf.mxu1 }
 0xc60   :  { %v2121_v29 = vpack.i.bf16 %v1451_v25, %v1430_v27 }
 0xc62   :  { %2122 = vrot.lane.b32.xlu0 %v2121_v29, %s2833_s5  ;;  %s1833_s5 = sshll.u32 %s2260_s21, 4  ;;  %s1834_s5 = int_to_ptr.vmem [resolvable:$true] %s1833_s5 }
 0xc65   :  { %v1453_v30 = vpop.f32.mrf.mxu2 }
 0xc66   :  { %v2136_v30 = vld [vmem:[%s2815_s8 + $0x1] ss:$0 sm:$0xff] }
 0xc67   :  { %v1432_v53 = vpop.f32.mrf.mxu1 }
 0xc7d   :  { %v2113_v33 = vpop.permute.xlu1 %2112 }
 0xc7e   :  { %v2115_v35 = vunpack.i.h.bf16 %v2113_v33  ;;  %v2114_v36 = vunpack.i.l.bf16 %v2113_v33  ;;  %v2137_v33 = vld [vmem:[%s2816_s9 + $0x1] ss:$0 sm:$0xff] }
 0xc80   :  { %v1479_v40 = vsel %vm162_vm3, %v1304_v54, %v2114_v36  ;;  %v1480_v50 = vsel %vm162_vm3, %v1325_v61, %v2115_v35 }
 0xca8   :  { %v2118_v34 = vpop.permute.xlu2 %2117 }
 0xca9   :  { %v2120_v51 = vunpack.i.h.bf16 %v2118_v34  ;;  %v2119_v37 = vunpack.i.l.bf16 %v2118_v34 }
 0xcab   :  { %v1482_v43 = vsel %vm641_vm5, %v1480_v50, %v2120_v51  ;;  %v1481_v44 = vsel %vm641_vm5, %v1479_v40, %v2119_v37  ;;  %v2064_v40 = vld [vmem:[%s2819_s12 + $0x58] sm:$0xff]  ;;  %v2063_v50 = vld [vmem:[%s2819_s12 + $0x50] sm:$0xff] }
 0xcac   :  { %1702 = vmatpush.bf16.msrb.mxu1 %v2064_v40 }
 0xcb0   :  { %1703 = vmatpush.bf16.msrb.mxu1 %v2063_v50 }
 0xcd4   :  { %v2123_v39 = vpop.permute.xlu0 %2122 }
 0xcd5   :  { %v2125_v41 = vunpack.i.h.bf16 %v2123_v39  ;;  %v2124_v42 = vunpack.i.l.bf16 %v2123_v39 }
 0xcd7   :  { %v1484_v45 = vsel %vm644_vm6, %v1482_v43, %v2125_v41  ;;  %v1483_v10 = vsel %vm644_vm6, %v1481_v44, %v2124_v42  ;;  %v2062_v41 = vld [vmem:[%s2819_s12 + $0x48] sm:$0xff]  ;;  %v2061_v42 = vld [vmem:[%s2819_s12 + $0x40] sm:$0xff] }
 0xcd8   :  { %v1485_v47 = vpack.c.bf16 %v1484_v45, %v1483_v10  ;;  %1704 = vmatpush.bf16.msrb.mxu1 %v2062_v41  ;;  %v2138_v44 = vld [vmem:[%s2818_s11 + $0x1] ss:$0 sm:$0xff]  ;;  %v2142_v41 = vld [vmem:[%s2824_s17] ss:$0 sm:$0xff] }
 0xcda   :  { %1963 = vmatmul.msk.bf16.vlgmr.msrb.gmra.mxu3 %vm111_vm2, %v1485_v47 }
 0xcdc   :  { %1705 = vmatpush.bf16.msrb.mxu1 %v2061_v42 }
 0xd5d   :  { %v1520_v48 = vpop.f32.mrf.mxu3 }
 0xd5e   :  { %v1521_v2 = vadd.f32 %v2135_v1, %v1520_v48 }
 0xd60   :  { %v1525_v0 = vadd.f32 %v1521_v2, %v2580_v26 }
 0xd62   :  { %v1531_v49 = vsel %vm111_vm2, %v1525_v0, 0.0 }
 0xd63   :  { %1532 = vadd.xlane.f32.xlu1 %v1531_v49 }
 0xd65   :  { %v1522_v11 = vpop.f32.mrf.mxu3 }
 0xd66   :  { %v1523_v54 = vadd.f32 %v2135_v1, %v1522_v11 }
 0xd68   :  { %v1526_v56 = vadd.f32 %v1523_v54, %v2582_v28  ;;  %v2060_v28 = vld [vmem:[%s2817_s10 + $0x18] sm:$0xff] }
 0xd69   :  { %1617 = vmatpush.bf16.msra.mxu0 %v2060_v28 }
 0xd6a   :  { %v1534_v57 = vsel %vm111_vm2, %v1526_v56, 0.0 }
 0xd6b   :  { %1535 = vadd.xlane.f32.xlu2 %v1534_v57 }
 0xd6d   :  { %1618 = vmatpush.bf16.msra.mxu0 %v2059_v59 }
 0xdd6   :  { %v1533_v58 = vpop.xlane.xlu1 %1532 }
 0xdd7   :  { %v1537_v38 = vmul.f32 %v1533_v58, %v2509_v46 }
 0xdd9   :  { %v1539_v60 = vsub.f32 %v1525_v0, %v1537_v38  ;;  %v2139_v0 = vld [vmem:[%s2820_s13 + $0x1] ss:$0 sm:$0xff] }
 0xddb   :  { %v1541_v52 = vmul.f32 %v1539_v60, %v1539_v60 }
 0xddd   :  { %v1543_v61 = vsel %vm111_vm2, %v1541_v52, 0.0 }
 0xdde   :  { %v1536_v62 = vpop.xlane.xlu2 %1535  ;;  %1544 = vadd.xlane.f32.xlu0 %v1543_v61 }
 0xddf   :  { %v1538_v26 = vmul.f32 %v1536_v62, %v2509_v46 }
 0xde1   :  { %v1540_v63 = vsub.f32 %v1526_v56, %v1538_v26 }
 0xde3   :  { %v1542_v3 = vmul.f32 %v1540_v63, %v1540_v63 }
 0xde5   :  { %v1546_v4 = vsel %vm111_vm2, %v1542_v3, 0.0 }
 0xde6   :  { %1547 = vadd.xlane.f32.xlu1 %v1546_v4 }
 0xe51   :  { %v1545_v5 = vpop.xlane.xlu0 %1544 }
 0xe52   :  { %v1549_v6 = vmul.f32 %v1545_v5, %v2509_v46 }
 0xe54   :  { %v1551_v7 = vadd.f32 1e-05, %v1549_v6 }
 0xe56   :  { %2217 = vrsqrt.f32 %v1551_v7  ;;  %vm1559_vm4 = vweird.f32 %v1551_v7 }
 0xe59   :  { %v1548_v9 = vpop.xlane.xlu1 %1547 }
 0xe5a   :  { %v1550_v12 = vmul.f32 %v1548_v9, %v2509_v46 }
 0xe5c   :  { %v2218_v14 = vpop.eup %2217  ;;  %v1552_v15 = vadd.f32 1e-05, %v1550_v12 }
 0xe5d   :  { %v1554_v16 = vmul.f32 %v2218_v14, %v1551_v7  ;;  %vm1560_vm3 = vweird.f32 %v2218_v14 }
 0xe5e   :  { %2219 = vrsqrt.f32 %v1552_v15  ;;  %vm1561_vm6 = vmor %vm1559_vm4, %vm1560_vm3  ;;  %vm1569_vm10 = vweird.f32 %v1552_v15 }
 0xe5f   :  { %v1555_v18 = vmul.f32 %v2218_v14, %v1554_v16 }
 0xe61   :  { %v1556_v55 = vmul.f32 0.5, %v1555_v18 }
 0xe63   :  { %v1557_v20 = vsub.f32 1.5, %v1556_v55 }
 0xe64   :  { %v2220_v21 = vpop.eup %2219 }
 0xe65   :  { %v1558_v22 = vmul.f32 %v2218_v14, %v1557_v20  ;;  %v1564_v23 = vmul.f32 %v2220_v21, %v1552_v15  ;;  %vm1570_vm9 = vweird.f32 %v2220_v21 }
 0xe66   :  { %vm1571_vm11 = vmor %vm1569_vm10, %vm1570_vm9 }
 0xe67   :  { %v1565_v24 = vmul.f32 %v2220_v21, %v1564_v23  ;;  %v1562_v25 = vsel %vm1561_vm6, %v2218_v14, %v1558_v22 }
 0xe68   :  { %v1573_v53 = vmul.f32 %v1562_v25, %v1539_v60 }
 0xe69   :  { %v1566_v27 = vmul.f32 0.5, %v1565_v24 }
 0xe6a   :  { %v1578_v34 = vmul.f32 %v2136_v30, %v1573_v53 }
 0xe6b   :  { %v1567_v29 = vsub.f32 1.5, %v1566_v27  ;;  %v2140_v27 = vld [vmem:[%s2821_s14 + $0x1] ss:$0 sm:$0xff] }
 0xe6c   :  { %v1583_v51 = vadd.f32 %v2137_v33, %v1578_v34 }
 0xe6d   :  { %v1568_v31 = vmul.f32 %v2220_v21, %v1567_v29 }
 0xe6f   :  { %v1572_v32 = vsel %vm1571_vm11, %v2220_v21, %v1568_v31 }
 0xe70   :  { %v1574_v35 = vmul.f32 %v1572_v32, %v1540_v63  ;;  %v2141_v32 = vld [vmem:[%s2822_s15 + $0x1] ss:$0 sm:$0xff] }
 0xe72   :  { %v1579_v36 = vmul.f32 %v2136_v30, %v1574_v35 }
 0xe74   :  { %v1584_v37 = vadd.f32 %v2137_v33, %v1579_v36 }
 0xe76   :  { %v1585_v39 = vpack.c.bf16 %v1584_v37, %v1583_v51 }
 0xe78   :  { %1979 = vmatmul.msk.bf16.vlgmr.msra.gmra.mxu0 %vm111_vm2, %v1585_v39 }
 0xef5   :  { %v1620_v43 = vpop.f32.mrf.mxu0 }
 0xef6   :  { %v1621_v45 = vadd.f32 %v2138_v44, %v1620_v43 }
 0xef8   :  { %v1625_v1 = vmax.f32 %v1621_v45, 0.0 }
 0xefd   :  { %v1622_v10 = vpop.f32.mrf.mxu0 }
 0xefe   :  { %v1623_v47 = vadd.f32 %v2138_v44, %v1622_v10 }
 0xf00   :  { %v1626_v48 = vmax.f32 %v1623_v47, 0.0 }
 0xf02   :  { %v1627_v2 = vpack.c.bf16 %v1626_v48, %v1625_v1 }
 0xf04   :  { %1706 = vmatmul.bf16.vlgmr.msrb.gmra.mxu1 %v1627_v2 }
 0xf81   :  { %v1707_v49 = vpop.f32.mrf.mxu1 }
 0xf82   :  { %v1708_v11 = vadd.f32 %v2139_v0, %v1707_v49 }
 0xf84   :  { %v1712_v54 = vadd.f32 %v1708_v11, %v1583_v51  ;;  %v1772_v51 = vld [vmem:[%s2834_s24] sm:$0x1] }
 0xf86   :  { %v1718_v56 = vsel %vm111_vm2, %v1712_v54, 0.0 }
 0xf87   :  { %1719 = vadd.xlane.f32.xlu2 %v1718_v56 }
 0xf89   :  { %v1709_v57 = vpop.f32.mrf.mxu1 }
 0xf8a   :  { %v1710_v58 = vadd.f32 %v2139_v0, %v1709_v57 }
 0xf8c   :  { %v1713_v38 = vadd.f32 %v1710_v58, %v1584_v37  ;;  %v2069_v37 = vld [vmem:[%s2823_s16] sm:$0xff] }
 0xf8d   :  { %1821 = vmatpush.bf16.msra.mxu3 %v2069_v37 }
 0xf8e   :  { %v1721_v60 = vsel %vm111_vm2, %v1713_v38, 0.0 }
 0xf8f   :  { %1722 = vadd.xlane.f32.xlu0 %v1721_v60 }
 0xffa   :  { %v1720_v52 = vpop.xlane.xlu2 %1719 }
 0xffb   :  { %v1724_v61 = vmul.f32 %v1720_v52, %v2509_v46 }
 0xffd   :  { %v1726_v62 = vsub.f32 %v1712_v54, %v1724_v61 }
 0xfff   :  { %v1728_v26 = vmul.f32 %v1726_v62, %v1726_v62 }
0x1001   :  { %v1730_v63 = vsel %vm111_vm2, %v1728_v26, 0.0 }
0x1002   :  { %v1723_v3 = vpop.xlane.xlu0 %1722  ;;  %1731 = vadd.xlane.f32.xlu1 %v1730_v63 }
0x1003   :  { %v1725_v4 = vmul.f32 %v1723_v3, %v2509_v46 }
0x1005   :  { %v1727_v28 = vsub.f32 %v1713_v38, %v1725_v4 }
0x1007   :  { %v1729_v5 = vmul.f32 %v1727_v28, %v1727_v28 }
0x1009   :  { %v1733_v6 = vsel %vm111_vm2, %v1729_v5, 0.0 }
0x100a   :  { %1734 = vadd.xlane.f32.xlu2 %v1733_v6 }
0x1075   :  { %v1732_v59 = vpop.xlane.xlu1 %1731 }
0x1076   :  { %v1736_v7 = vmul.f32 %v1732_v59, %v2509_v46 }
0x1078   :  { %v1738_v8 = vadd.f32 1e-05, %v1736_v7 }
0x107a   :  { %2221 = vrsqrt.f32 %v1738_v8  ;;  %vm1746_vm13 = vweird.f32 %v1738_v8 }
0x107d   :  { %v1735_v9 = vpop.xlane.xlu2 %1734 }
0x107e   :  { %v1737_v12 = vmul.f32 %v1735_v9, %v2509_v46 }
0x1080   :  { %v2222_v14 = vpop.eup %2221  ;;  %v1739_v15 = vadd.f32 1e-05, %v1737_v12 }
0x1081   :  { %v1741_v16 = vmul.f32 %v2222_v14, %v1738_v8  ;;  %vm1747_vm12 = vweird.f32 %v2222_v14 }
0x1082   :  { %2223 = vrsqrt.f32 %v1739_v15  ;;  %vm1748_vm14 = vmor %vm1746_vm13, %vm1747_vm12  ;;  %vm1756_vm0 = vweird.f32 %v1739_v15 }
0x1083   :  { %v1742_v17 = vmul.f32 %v2222_v14, %v1741_v16 }
0x1085   :  { %v1743_v18 = vmul.f32 0.5, %v1742_v17 }
0x1087   :  { %v1744_v55 = vsub.f32 1.5, %v1743_v18 }
0x1088   :  { %v2224_v19 = vpop.eup %2223 }
0x1089   :  { %v1745_v20 = vmul.f32 %v2222_v14, %v1744_v55  ;;  %v1751_v21 = vmul.f32 %v2224_v19, %v1739_v15  ;;  %vm1757_vm15 = vweird.f32 %v2224_v19 }
0x108a   :  { %vm1758_vm1 = vmor %vm1756_vm0, %vm1757_vm15 }
0x108b   :  { %v1752_v22 = vmul.f32 %v2224_v19, %v1751_v21  ;;  %v1749_v46 = vsel %vm1748_vm14, %v2222_v14, %v1745_v20 }
0x108c   :  { %v1760_v25 = vmul.f32 %v1749_v46, %v1726_v62 }
0x108d   :  { %v1753_v23 = vmul.f32 0.5, %v1752_v22 }
0x108e   :  { %v1765_v31 = vmul.f32 %v2140_v27, %v1760_v25 }
0x108f   :  { %v1754_v24 = vsub.f32 1.5, %v1753_v23 }
0x1090   :  { %v1770_v34 = vadd.f32 %v2141_v32, %v1765_v31 }
0x1091   :  { %v1755_v29 = vmul.f32 %v2224_v19, %v1754_v24 }
0x1093   :  { %v1759_v30 = vsel %vm1758_vm1, %v2224_v19, %v1755_v29 }
0x1094   :  { %v1761_v53 = vmul.f32 %v1759_v30, %v1727_v28 }
0x1096   :  { %v1766_v33 = vmul.f32 %v2140_v27, %v1761_v53 }
0x1098   :  { %v1771_v35 = vadd.f32 %v2141_v32, %v1766_v33 }
0x109a   :  { %v1773_v36 = vpack.c.bf16 %v1771_v35, %v1770_v34 }
0x109c   :  { %1784 = vmatpush.bf16.msra.mxu2 %v1773_v36 }
0x109f   :  { %2031 = vmatmul.msk.bf16.vlgmr.msra.gmra.mxu2 %vm641_vm5, %v1772_v51 }
0x1122   :  { %v1786_v39 = vpop.f32.mrf.mxu2 }
0x1123   :  { %v1790_v40 = vpack.c.bf16 %v1786_v39, %v1786_v39 }
0x1125   :  { %2040 = vmatmul.msk.bf16.vlgmr.msra.gmra.mxu3 %vm111_vm2, %v1790_v40 }
0x112a   :  { %v1788_v50 = vpop.f32.mrf.mxu2 }
0x11a8   :  { %v1823_v42 = vpop.f32.mrf.mxu3 }
0x11a9   :  { %v1824_v43 = vadd.f32 %v2142_v41, %v1823_v42 }
0x11ab   :  { %1827 = vst [vmem:[#allocation2] sm:$0x3] %v1824_v43 }
0x11ac   :  { %1838 = dma.vmem_to_hbm [thread:$0]  %s1834_s5, 32, %s1836_s29, [#allocation3]  }
0x11b0   :  { %v1825_v44 = vpop.f32.mrf.mxu3 }
0x11b1   :  { %2249 = dma.done.wait [#allocation3], 32  }
0x11b2   :  { %2250 = vsyncadd [#allocation3], 4294967264 }
0x11b3   :  { %1843 = vsyncpa [#allocation3], 1 }

</bundles_post_ra>
